<compile_context>
chip_gen: v7x
topology: tpu7x:2x2x1
jax: 0.10.0
libtpu: 0.0.40
codegen_flags: <defaults>
</compile_context>

<pallas_src>
import math

import jax
import jax.numpy as jnp
from jax.experimental import pallas as pl
from jax.experimental.pallas import tpu as pltpu

# ------------------------- model config (small, synthetic) -------------------------
VOCAB = 100          # synthetic vocab
MAX_POS = 32         # max position embeddings
HIDDEN = 32          # hidden size
N_HEADS = 4
HEAD_DIM = HIDDEN // N_HEADS
FFN = 64             # intermediate size
N_LAYERS = 2
NUM_CLASSES = 3
LN_EPS = 1e-12


# ------------------------------- in-kernel helpers ---------------------------------
def _layernorm(x, gamma, beta):
    mu = jnp.mean(x, axis=-1, keepdims=True)
    var = jnp.mean((x - mu) ** 2, axis=-1, keepdims=True)
    return (x - mu) * jax.lax.rsqrt(var + LN_EPS) * gamma + beta


def _gelu(x):
    # tanh-approximation GELU: maps onto the EUP slot instead of an erf VALU polynomial.
    # TODO(synk): DistilBERT uses exact erf-GELU; tanh approximation differs slightly.
    return 0.5 * x * (1.0 + jnp.tanh(0.7978845608028654 * (x + 0.044715 * x * x * x)))


_BF16 = jnp.bfloat16


# ------------------------------- fused forward kernel -------------------------------
def fused_forward_kernel(emb_ref, mask_ref,
                         emb_g_ref, emb_b_ref,
                         wqkv_ref, bqkv_ref, wo_ref, bo_ref,
                         ln1g_ref, ln1b_ref,
                         w1_ref, b1_ref, w2_ref, b2_ref,
                         ln2g_ref, ln2b_ref,
                         wp_ref, bp_ref, wc_ref, bc_ref,
                         o_ref):
    """Whole BertFewShotModel forward for one batch, entirely VMEM-resident.

    emb_ref : (B*S, H)            word+position embeddings (pre-LayerNorm), f32
    mask_ref: (N_HEADS*B, S, S)   additive attention mask, pre-broadcast (hoisted)
    o_ref   : (B, NUM_CLASSES)    logits
    """
    BH = mask_ref.shape[0]                 # N_HEADS * B (head-major folded batch)
    S = mask_ref.shape[1]
    B = BH // N_HEADS

    # Embedding LayerNorm over the full (B*S, H) slab (f32 on the VPU/EUP path).
    h = _layernorm(emb_ref[...].astype(jnp.float32), emb_g_ref[...], emb_b_ref[...])
    mask = mask_ref[...]                   # already broadcast once in the wrapper

    for l in range(N_LAYERS):              # static unroll (N_LAYERS=2)
        # ---- fused QKV projection (score scale folded into the Q columns) ----
        qkv = jnp.dot(h.astype(_BF16), wqkv_ref[l],
                      preferred_element_type=jnp.float32) + bqkv_ref[l]   # (B*S, 3H)

        # One layout transform: heads off the lane axis onto a leading folded-batch dim.
        qkv = qkv.reshape(B, S, 3 * N_HEADS, HEAD_DIM)
        qkv = jnp.transpose(qkv, (2, 0, 1, 3))                            # (3*NH, B, S, dh)
        q = qkv[0 * N_HEADS:1 * N_HEADS].reshape(BH, S, HEAD_DIM).astype(_BF16)
        k = qkv[1 * N_HEADS:2 * N_HEADS].reshape(BH, S, HEAD_DIM).astype(_BF16)
        v = qkv[2 * N_HEADS:3 * N_HEADS].reshape(BH, S, HEAD_DIM).astype(_BF16)

        # ---- attention: ONE scores einsum + ONE context einsum over (NH*B) ----
        s = jnp.einsum('bqd,bkd->bqk', q, k,
                       preferred_element_type=jnp.float32) + mask         # (NH*B, S, S)
        s = s - jnp.max(s, axis=-1, keepdims=True)
        p = jnp.exp(s)
        p = p * pl.reciprocal(jnp.sum(p, axis=-1, keepdims=True), approx=True)
        ctx = jnp.einsum('bqk,bkd->bqd', p.astype(_BF16), v,
                         preferred_element_type=jnp.float32)              # (NH*B, S, dh)

        # One layout transform back to a (B*S, H) slab, then ONE full-Wo matmul.
        ctx = ctx.reshape(N_HEADS, B, S, HEAD_DIM)
        ctx = jnp.transpose(ctx, (1, 2, 0, 3)).reshape(B * S, HIDDEN)
        attn_out = jnp.dot(ctx.astype(_BF16), wo_ref[l],
                           preferred_element_type=jnp.float32) + bo_ref[l]
        h1 = _layernorm(h + attn_out, ln1g_ref[l], ln1b_ref[l])

        # ---- feed-forward (bf16 MXU operands, f32 accumulate + elementwise) ----
        ff = jnp.dot(h1.astype(_BF16), w1_ref[l],
                     preferred_element_type=jnp.float32) + b1_ref[l]
        ff = _gelu(ff)
        ff = jnp.dot(ff.astype(_BF16), w2_ref[l],
                     preferred_element_type=jnp.float32) + b2_ref[l]
        h = _layernorm(h1 + ff, ln2g_ref[l], ln2b_ref[l])

    # ---- BERT-style pooler on the CLS token + classifier ----
    cls = h.reshape(B, S, HIDDEN)[:, 0, :]                                # (B, H)
    pooled = jnp.tanh(jnp.dot(cls.astype(_BF16), wp_ref[...],
                              preferred_element_type=jnp.float32) + bp_ref[...])
    logits = jnp.dot(pooled.astype(_BF16), wc_ref[...],
                     preferred_element_type=jnp.float32) + bc_ref[...]
    o_ref[...] = logits.astype(o_ref.dtype)


# --------------------------------- parameters --------------------------------------
def init_params(key):
    std = 0.02
    scale = 1.0 / math.sqrt(HEAD_DIM)
    keys = jax.random.split(key, 4 + N_LAYERS)
    params = {
        "word_emb": jax.random.normal(keys[0], (VOCAB, HIDDEN), jnp.float32) * std,
        "pos_emb": jax.random.normal(keys[1], (MAX_POS, HIDDEN), jnp.float32) * std,
        "emb_ln_g": jnp.ones((1, HIDDEN), jnp.float32),
        "emb_ln_b": jnp.zeros((1, HIDDEN), jnp.float32),
        # Matmul weights stored bf16 (single MXU pass); biases / LN params stay f32.
        "pooler_w": (jax.random.normal(keys[2], (HIDDEN, HIDDEN), jnp.float32) * std
                     ).astype(jnp.bfloat16),
        "pooler_b": jnp.zeros((1, HIDDEN), jnp.float32),
        "cls_w": (jax.random.normal(keys[3], (HIDDEN, NUM_CLASSES), jnp.float32) * std
                  ).astype(jnp.bfloat16),
        "cls_b": jnp.zeros((1, NUM_CLASSES), jnp.float32),
    }

    wqkv, bqkv, wo, bo = [], [], [], []
    ln1g, ln1b, w1, b1, w2, b2, ln2g, ln2b = [], [], [], [], [], [], [], []
    for l in range(N_LAYERS):
        lk = jax.random.split(keys[4 + l], 6)
        wq = jax.random.normal(lk[0], (HIDDEN, HIDDEN), jnp.float32) * std
        wk = jax.random.normal(lk[1], (HIDDEN, HIDDEN), jnp.float32) * std
        wv = jax.random.normal(lk[2], (HIDDEN, HIDDEN), jnp.float32) * std
        bq = jnp.zeros((1, HIDDEN), jnp.float32)
        bk = jnp.zeros((1, HIDDEN), jnp.float32)
        bv = jnp.zeros((1, HIDDEN), jnp.float32)
        # Fused QKV projection; fold 1/sqrt(head_dim) score scale into Wq/bq.
        wqkv.append(jnp.concatenate([wq * scale, wk, wv], axis=1).astype(jnp.bfloat16))
        bqkv.append(jnp.concatenate([bq * scale, bk, bv], axis=1))        # (1, 3H) f32
        wo.append((jax.random.normal(lk[3], (HIDDEN, HIDDEN), jnp.float32) * std
                   ).astype(jnp.bfloat16))
        bo.append(jnp.zeros((1, HIDDEN), jnp.float32))
        ln1g.append(jnp.ones((1, HIDDEN), jnp.float32))
        ln1b.append(jnp.zeros((1, HIDDEN), jnp.float32))
        w1.append((jax.random.normal(lk[4], (HIDDEN, FFN), jnp.float32) * std
                   ).astype(jnp.bfloat16))
        b1.append(jnp.zeros((1, FFN), jnp.float32))
        w2.append((jax.random.normal(lk[5], (FFN, HIDDEN), jnp.float32) * std
                   ).astype(jnp.bfloat16))
        b2.append(jnp.zeros((1, HIDDEN), jnp.float32))
        ln2g.append(jnp.ones((1, HIDDEN), jnp.float32))
        ln2b.append(jnp.zeros((1, HIDDEN), jnp.float32))

    stack = lambda xs: jnp.stack(xs, axis=0)                              # (N_LAYERS, ...)
    params.update(dict(
        wqkv=stack(wqkv), bqkv=stack(bqkv), wo=stack(wo), bo=stack(bo),
        ln1g=stack(ln1g), ln1b=stack(ln1b), w1=stack(w1), b1=stack(b1),
        w2=stack(w2), b2=stack(b2), ln2g=stack(ln2g), ln2b=stack(ln2b)))
    return params


# ----------------------------------- forward ----------------------------------------
@jax.jit
def bert_fewshot_forward(params, input_ids, attention_mask):
    """Equivalent of BertFewShotModel.forward(input_ids, attention_mask) -> logits (B, C)."""
    B, S = input_ids.shape
    # Embedding gather (glue); everything downstream runs inside one Pallas kernel.
    word = jnp.take(params["word_emb"], input_ids, axis=0)               # (B, S, H)
    pos = params["pos_emb"][:S][None, :, :]                              # (1, S, H)
    emb = (word + pos).reshape(B * S, HIDDEN)                            # (B*S, H) slab

    # Additive attention mask, pre-broadcast ONCE to the head-major folded batch layout
    # used inside the kernel: (N_HEADS*B, S, S), 0 attended / -1e9 padded.
    add_mask = (1.0 - attention_mask.astype(jnp.float32)) * -1e9         # (B, S)
    mask_bh = jnp.broadcast_to(add_mask[None, :, None, :],
                               (N_HEADS, B, S, S)).reshape(N_HEADS * B, S, S)

    args = (emb, mask_bh,
            params["emb_ln_g"], params["emb_ln_b"],
            params["wqkv"], params["bqkv"], params["wo"], params["bo"],
            params["ln1g"], params["ln1b"],
            params["w1"], params["b1"], params["w2"], params["b2"],
            params["ln2g"], params["ln2b"],
            params["pooler_w"], params["pooler_b"],
            params["cls_w"], params["cls_b"])

    vmem_spec = pl.BlockSpec(memory_space=pltpu.MemorySpace.VMEM)        # whole array in VMEM
    return pl.pallas_call(
        fused_forward_kernel,
        out_shape=jax.ShapeDtypeStruct((B, NUM_CLASSES), jnp.float32),
        in_specs=[vmem_spec] * len(args),
        out_specs=vmem_spec,
    )(*args)


# ------------------------------------------ main ------------------------------------
if __name__ == "__main__":
    key = jax.random.PRNGKey(0)
    pkey, ikey = jax.random.split(key)
    params = init_params(pkey)

    B, S = 2, 8
    input_ids = jax.random.randint(ikey, (B, S), 0, VOCAB, dtype=jnp.int32)
    attention_mask = jnp.array([[1, 1, 1, 1, 1, 1, 1, 1],
                                [1, 1, 1, 1, 1, 0, 0, 0]], dtype=jnp.int32)

    logits = bert_fewshot_forward(params, input_ids, attention_mask)
    jax.block_until_ready(logits)
    assert logits.shape == (B, NUM_CLASSES)
    assert bool(jnp.all(jnp.isfinite(logits)))
    print("KERNEL_OK")
</pallas_src>

<mosaic_0001>
module attributes {stable_mosaic.version = 11 : i64} {
  func.func @fused_forward_kernel(%arg0: memref<16x32xf32, #tpu.memory_space<vmem>>, %arg1: memref<8x8x8xf32, #tpu.memory_space<vmem>>, %arg2: memref<1x32xf32, #tpu.memory_space<vmem>>, %arg3: memref<1x32xf32, #tpu.memory_space<vmem>>, %arg4: memref<2x32x96xbf16, #tpu.memory_space<vmem>>, %arg5: memref<2x1x96xf32, #tpu.memory_space<vmem>>, %arg6: memref<2x32x32xbf16, #tpu.memory_space<vmem>>, %arg7: memref<2x1x32xf32, #tpu.memory_space<vmem>>, %arg8: memref<2x1x32xf32, #tpu.memory_space<vmem>>, %arg9: memref<2x1x32xf32, #tpu.memory_space<vmem>>, %arg10: memref<2x32x64xbf16, #tpu.memory_space<vmem>>, %arg11: memref<2x1x64xf32, #tpu.memory_space<vmem>>, %arg12: memref<2x64x32xbf16, #tpu.memory_space<vmem>>, %arg13: memref<2x1x32xf32, #tpu.memory_space<vmem>>, %arg14: memref<2x1x32xf32, #tpu.memory_space<vmem>>, %arg15: memref<2x1x32xf32, #tpu.memory_space<vmem>>, %arg16: memref<32x32xbf16, #tpu.memory_space<vmem>>, %arg17: memref<1x32xf32, #tpu.memory_space<vmem>>, %arg18: memref<32x3xbf16, #tpu.memory_space<vmem>>, %arg19: memref<1x3xf32, #tpu.memory_space<vmem>>, %arg20: memref<2x3xf32, #tpu.memory_space<vmem>>) attributes {dimension_semantics = [], scalar_prefetch = 0 : i64, scratch_operands = 0 : i64, tpu.core_type = #tpu.core_type<tc>} {
    %c0 = arith.constant 0 : index
    %c0_0 = arith.constant 0 : index
    %0 = vector.load %arg0[%c0, %c0_0] : memref<16x32xf32, #tpu.memory_space<vmem>>, vector<16x32xf32>
    %c0_1 = arith.constant 0 : index
    %c0_2 = arith.constant 0 : index
    %1 = vector.load %arg2[%c0_1, %c0_2] : memref<1x32xf32, #tpu.memory_space<vmem>>, vector<1x32xf32>
    %c0_3 = arith.constant 0 : index
    %c0_4 = arith.constant 0 : index
    %2 = vector.load %arg3[%c0_3, %c0_4] : memref<1x32xf32, #tpu.memory_space<vmem>>, vector<1x32xf32>
    %cst = arith.constant dense<0.000000e+00> : vector<16xf32>
    %3 = vector.multi_reduction <add>, %0, %cst [1] : vector<16x32xf32> to vector<16xf32>
    %4 = vector.shape_cast %3 : vector<16xf32> to vector<16x1xf32>
    %cst_5 = arith.constant 3.200000e+01 : f32
    %5 = vector.broadcast %cst_5 : f32 to vector<16x1xf32>
    %6 = arith.divf %4, %5 : vector<16x1xf32>
    %7 = vector.broadcast %6 : vector<16x1xf32> to vector<16x32xf32>
    %8 = arith.subf %0, %7 : vector<16x32xf32>
    %9 = arith.mulf %8, %8 : vector<16x32xf32>
    %cst_6 = arith.constant dense<0.000000e+00> : vector<16xf32>
    %10 = vector.multi_reduction <add>, %9, %cst_6 [1] : vector<16x32xf32> to vector<16xf32>
    %11 = vector.shape_cast %10 : vector<16xf32> to vector<16x1xf32>
    %cst_7 = arith.constant 3.200000e+01 : f32
    %12 = vector.broadcast %cst_7 : f32 to vector<16x1xf32>
    %13 = arith.divf %11, %12 : vector<16x1xf32>
    %14 = vector.broadcast %6 : vector<16x1xf32> to vector<16x32xf32>
    %15 = arith.subf %0, %14 : vector<16x32xf32>
    %cst_8 = arith.constant 9.99999996E-13 : f32
    %16 = vector.broadcast %cst_8 : f32 to vector<16x1xf32>
    %17 = arith.addf %13, %16 : vector<16x1xf32>
    %18 = math.rsqrt %17 : vector<16x1xf32>
    %19 = vector.broadcast %18 : vector<16x1xf32> to vector<16x32xf32>
    %20 = arith.mulf %15, %19 : vector<16x32xf32>
    %21 = vector.broadcast %1 : vector<1x32xf32> to vector<16x32xf32>
    %22 = arith.mulf %20, %21 : vector<16x32xf32>
    %23 = vector.broadcast %2 : vector<1x32xf32> to vector<16x32xf32>
    %24 = arith.addf %22, %23 : vector<16x32xf32>
    %c0_9 = arith.constant 0 : index
    %c0_10 = arith.constant 0 : index
    %c0_11 = arith.constant 0 : index
    %25 = vector.load %arg1[%c0_9, %c0_10, %c0_11] : memref<8x8x8xf32, #tpu.memory_space<vmem>>, vector<8x8x8xf32>
    %26 = arith.truncf %24 : vector<16x32xf32> to vector<16x32xbf16>
    %c0_12 = arith.constant 0 : index
    %c0_13 = arith.constant 0 : index
    %c0_14 = arith.constant 0 : index
    %27 = vector.load %arg4[%c0_12, %c0_13, %c0_14] : memref<2x32x96xbf16, #tpu.memory_space<vmem>>, vector<1x32x96xbf16>
    %28 = vector.shape_cast %27 : vector<1x32x96xbf16> to vector<32x96xbf16>
    %cst_15 = arith.constant dense<0.000000e+00> : vector<16x96xf32>
    %29 = tpu.matmul %26, %28, %cst_15 {dimension_numbers = #tpu.dot_dimension_numbers<[1], [0], [0], [1], [0, 0, 1, 1], [], []>} : vector<16x32xbf16>, vector<32x96xbf16>, vector<16x96xf32> -> vector<16x96xf32>
    %c0_16 = arith.constant 0 : index
    %c0_17 = arith.constant 0 : index
    %c0_18 = arith.constant 0 : index
    %30 = vector.load %arg5[%c0_16, %c0_17, %c0_18] : memref<2x1x96xf32, #tpu.memory_space<vmem>>, vector<1x1x96xf32>
    %31 = vector.shape_cast %30 : vector<1x1x96xf32> to vector<1x96xf32>
    %32 = vector.broadcast %31 : vector<1x96xf32> to vector<16x96xf32>
    %33 = arith.addf %29, %32 : vector<16x96xf32>
    %34 = vector.shape_cast %33 : vector<16x96xf32> to vector<2x8x12x8xf32>
    %35 = tpu.transpose %34, [2, 0, 1, 3] : vector<2x8x12x8xf32> -> vector<12x2x8x8xf32>
    %36 = vector.extract_strided_slice %35 {offsets = [0, 0, 0, 0], sizes = [4, 2, 8, 8], strides = [1, 1, 1, 1]} : vector<12x2x8x8xf32> to vector<4x2x8x8xf32>
    %37 = vector.shape_cast %36 : vector<4x2x8x8xf32> to vector<8x8x8xf32>
    %38 = arith.truncf %37 : vector<8x8x8xf32> to vector<8x8x8xbf16>
    %39 = vector.extract_strided_slice %35 {offsets = [4, 0, 0, 0], sizes = [4, 2, 8, 8], strides = [1, 1, 1, 1]} : vector<12x2x8x8xf32> to vector<4x2x8x8xf32>
    %40 = vector.shape_cast %39 : vector<4x2x8x8xf32> to vector<8x8x8xf32>
    %41 = arith.truncf %40 : vector<8x8x8xf32> to vector<8x8x8xbf16>
    %42 = vector.extract_strided_slice %35 {offsets = [8, 0, 0, 0], sizes = [4, 2, 8, 8], strides = [1, 1, 1, 1]} : vector<12x2x8x8xf32> to vector<4x2x8x8xf32>
    %43 = vector.shape_cast %42 : vector<4x2x8x8xf32> to vector<8x8x8xf32>
    %44 = arith.truncf %43 : vector<8x8x8xf32> to vector<8x8x8xbf16>
    "tpu.trace_start"() <{level = 10 : i32, message = "bqd,bkd->bqk"}> : () -> ()
    %cst_19 = arith.constant dense<0.000000e+00> : vector<8x8x8xf32>
    %45 = tpu.matmul %38, %41, %cst_19 {dimension_numbers = #tpu.dot_dimension_numbers<[2], [2], [1], [1], [0, 0, 0, 1, 1, 1], [0], [0]>} : vector<8x8x8xbf16>, vector<8x8x8xbf16>, vector<8x8x8xf32> -> vector<8x8x8xf32>
    "tpu.trace_stop"() : () -> ()
    %46 = arith.addf %45, %25 : vector<8x8x8xf32>
    %cst_20 = arith.constant dense<0xFF800000> : vector<8x8xf32>
    %47 = vector.multi_reduction <maximumf>, %46, %cst_20 [2] : vector<8x8x8xf32> to vector<8x8xf32>
    %48 = vector.shape_cast %47 : vector<8x8xf32> to vector<8x8x1xf32>
    %49 = vector.broadcast %48 : vector<8x8x1xf32> to vector<8x8x8xf32>
    %50 = arith.subf %46, %49 : vector<8x8x8xf32>
    %51 = math.exp %50 : vector<8x8x8xf32>
    %cst_21 = arith.constant dense<0.000000e+00> : vector<8x8xf32>
    %52 = vector.multi_reduction <add>, %51, %cst_21 [2] : vector<8x8x8xf32> to vector<8x8xf32>
    %53 = vector.shape_cast %52 : vector<8x8xf32> to vector<8x8x1xf32>
    %54 = tpu.reciprocal %53 {approx = true} : vector<8x8x1xf32> -> vector<8x8x1xf32>
    %55 = vector.broadcast %54 : vector<8x8x1xf32> to vector<8x8x8xf32>
    %56 = arith.mulf %51, %55 : vector<8x8x8xf32>
    %57 = arith.truncf %56 : vector<8x8x8xf32> to vector<8x8x8xbf16>
    "tpu.trace_start"() <{level = 10 : i32, message = "bqk,bkd->bqd"}> : () -> ()
    %cst_22 = arith.constant dense<0.000000e+00> : vector<8x8x8xf32>
    %58 = tpu.matmul %57, %44, %cst_22 {dimension_numbers = #tpu.dot_dimension_numbers<[2], [1], [1], [2], [0, 0, 0, 1, 1, 2], [0], [0]>} : vector<8x8x8xbf16>, vector<8x8x8xbf16>, vector<8x8x8xf32> -> vector<8x8x8xf32>
    "tpu.trace_stop"() : () -> ()
    %59 = vector.shape_cast %58 : vector<8x8x8xf32> to vector<4x2x8x8xf32>
    %60 = tpu.transpose %59, [1, 2, 0, 3] : vector<4x2x8x8xf32> -> vector<2x8x4x8xf32>
    %61 = vector.shape_cast %60 : vector<2x8x4x8xf32> to vector<16x32xf32>
    %62 = arith.truncf %61 : vector<16x32xf32> to vector<16x32xbf16>
    %c0_23 = arith.constant 0 : index
    %c0_24 = arith.constant 0 : index
    %c0_25 = arith.constant 0 : index
    %63 = vector.load %arg6[%c0_23, %c0_24, %c0_25] : memref<2x32x32xbf16, #tpu.memory_space<vmem>>, vector<1x32x32xbf16>
    %64 = vector.shape_cast %63 : vector<1x32x32xbf16> to vector<32x32xbf16>
    %cst_26 = arith.constant dense<0.000000e+00> : vector<16x32xf32>
    %65 = tpu.matmul %62, %64, %cst_26 {dimension_numbers = #tpu.dot_dimension_numbers<[1], [0], [0], [1], [0, 0, 1, 1], [], []>} : vector<16x32xbf16>, vector<32x32xbf16>, vector<16x32xf32> -> vector<16x32xf32>
    %c0_27 = arith.constant 0 : index
    %c0_28 = arith.constant 0 : index
    %c0_29 = arith.constant 0 : index
    %66 = vector.load %arg7[%c0_27, %c0_28, %c0_29] : memref<2x1x32xf32, #tpu.memory_space<vmem>>, vector<1x1x32xf32>
    %67 = vector.shape_cast %66 : vector<1x1x32xf32> to vector<1x32xf32>
    %68 = vector.broadcast %67 : vector<1x32xf32> to vector<16x32xf32>
    %69 = arith.addf %65, %68 : vector<16x32xf32>
    %70 = arith.addf %24, %69 : vector<16x32xf32>
    %c0_30 = arith.constant 0 : index
    %c0_31 = arith.constant 0 : index
    %c0_32 = arith.constant 0 : index
    %71 = vector.load %arg8[%c0_30, %c0_31, %c0_32] : memref<2x1x32xf32, #tpu.memory_space<vmem>>, vector<1x1x32xf32>
    %72 = vector.shape_cast %71 : vector<1x1x32xf32> to vector<1x32xf32>
    %c0_33 = arith.constant 0 : index
    %c0_34 = arith.constant 0 : index
    %c0_35 = arith.constant 0 : index
    %73 = vector.load %arg9[%c0_33, %c0_34, %c0_35] : memref<2x1x32xf32, #tpu.memory_space<vmem>>, vector<1x1x32xf32>
    %74 = vector.shape_cast %73 : vector<1x1x32xf32> to vector<1x32xf32>
    %cst_36 = arith.constant dense<0.000000e+00> : vector<16xf32>
    %75 = vector.multi_reduction <add>, %70, %cst_36 [1] : vector<16x32xf32> to vector<16xf32>
    %76 = vector.shape_cast %75 : vector<16xf32> to vector<16x1xf32>
    %cst_37 = arith.constant 3.200000e+01 : f32
    %77 = vector.broadcast %cst_37 : f32 to vector<16x1xf32>
    %78 = arith.divf %76, %77 : vector<16x1xf32>
    %79 = vector.broadcast %78 : vector<16x1xf32> to vector<16x32xf32>
    %80 = arith.subf %70, %79 : vector<16x32xf32>
    %81 = arith.mulf %80, %80 : vector<16x32xf32>
    %cst_38 = arith.constant dense<0.000000e+00> : vector<16xf32>
    %82 = vector.multi_reduction <add>, %81, %cst_38 [1] : vector<16x32xf32> to vector<16xf32>
    %83 = vector.shape_cast %82 : vector<16xf32> to vector<16x1xf32>
    %cst_39 = arith.constant 3.200000e+01 : f32
    %84 = vector.broadcast %cst_39 : f32 to vector<16x1xf32>
    %85 = arith.divf %83, %84 : vector<16x1xf32>
    %86 = vector.broadcast %78 : vector<16x1xf32> to vector<16x32xf32>
    %87 = arith.subf %70, %86 : vector<16x32xf32>
    %cst_40 = arith.constant 9.99999996E-13 : f32
    %88 = vector.broadcast %cst_40 : f32 to vector<16x1xf32>
    %89 = arith.addf %85, %88 : vector<16x1xf32>
    %90 = math.rsqrt %89 : vector<16x1xf32>
    %91 = vector.broadcast %90 : vector<16x1xf32> to vector<16x32xf32>
    %92 = arith.mulf %87, %91 : vector<16x32xf32>
    %93 = vector.broadcast %72 : vector<1x32xf32> to vector<16x32xf32>
    %94 = arith.mulf %92, %93 : vector<16x32xf32>
    %95 = vector.broadcast %74 : vector<1x32xf32> to vector<16x32xf32>
    %96 = arith.addf %94, %95 : vector<16x32xf32>
    %97 = arith.truncf %96 : vector<16x32xf32> to vector<16x32xbf16>
    %c0_41 = arith.constant 0 : index
    %c0_42 = arith.constant 0 : index
    %c0_43 = arith.constant 0 : index
    %98 = vector.load %arg10[%c0_41, %c0_42, %c0_43] : memref<2x32x64xbf16, #tpu.memory_space<vmem>>, vector<1x32x64xbf16>
    %99 = vector.shape_cast %98 : vector<1x32x64xbf16> to vector<32x64xbf16>
    %cst_44 = arith.constant dense<0.000000e+00> : vector<16x64xf32>
    %100 = tpu.matmul %97, %99, %cst_44 {dimension_numbers = #tpu.dot_dimension_numbers<[1], [0], [0], [1], [0, 0, 1, 1], [], []>} : vector<16x32xbf16>, vector<32x64xbf16>, vector<16x64xf32> -> vector<16x64xf32>
    %c0_45 = arith.constant 0 : index
    %c0_46 = arith.constant 0 : index
    %c0_47 = arith.constant 0 : index
    %101 = vector.load %arg11[%c0_45, %c0_46, %c0_47] : memref<2x1x64xf32, #tpu.memory_space<vmem>>, vector<1x1x64xf32>
    %102 = vector.shape_cast %101 : vector<1x1x64xf32> to vector<1x64xf32>
    %103 = vector.broadcast %102 : vector<1x64xf32> to vector<16x64xf32>
    %104 = arith.addf %100, %103 : vector<16x64xf32>
    %cst_48 = arith.constant 5.000000e-01 : f32
    %105 = vector.broadcast %cst_48 : f32 to vector<16x64xf32>
    %106 = arith.mulf %105, %104 : vector<16x64xf32>
    %cst_49 = arith.constant 4.471500e-02 : f32
    %107 = vector.broadcast %cst_49 : f32 to vector<16x64xf32>
    %108 = arith.mulf %107, %104 : vector<16x64xf32>
    %109 = arith.mulf %108, %104 : vector<16x64xf32>
    %110 = arith.mulf %109, %104 : vector<16x64xf32>
    %111 = arith.addf %104, %110 : vector<16x64xf32>
    %cst_50 = arith.constant 0.797884583 : f32
    %112 = vector.broadcast %cst_50 : f32 to vector<16x64xf32>
    %113 = arith.mulf %112, %111 : vector<16x64xf32>
    %114 = math.tanh %113 : vector<16x64xf32>
    %cst_51 = arith.constant 1.000000e+00 : f32
    %115 = vector.broadcast %cst_51 : f32 to vector<16x64xf32>
    %116 = arith.addf %115, %114 : vector<16x64xf32>
    %117 = arith.mulf %106, %116 : vector<16x64xf32>
    %118 = arith.truncf %117 : vector<16x64xf32> to vector<16x64xbf16>
    %c0_52 = arith.constant 0 : index
    %c0_53 = arith.constant 0 : index
    %c0_54 = arith.constant 0 : index
    %119 = vector.load %arg12[%c0_52, %c0_53, %c0_54] : memref<2x64x32xbf16, #tpu.memory_space<vmem>>, vector<1x64x32xbf16>
    %120 = vector.shape_cast %119 : vector<1x64x32xbf16> to vector<64x32xbf16>
    %cst_55 = arith.constant dense<0.000000e+00> : vector<16x32xf32>
    %121 = tpu.matmul %118, %120, %cst_55 {dimension_numbers = #tpu.dot_dimension_numbers<[1], [0], [0], [1], [0, 0, 1, 1], [], []>} : vector<16x64xbf16>, vector<64x32xbf16>, vector<16x32xf32> -> vector<16x32xf32>
    %c0_56 = arith.constant 0 : index
    %c0_57 = arith.constant 0 : index
    %c0_58 = arith.constant 0 : index
    %122 = vector.load %arg13[%c0_56, %c0_57, %c0_58] : memref<2x1x32xf32, #tpu.memory_space<vmem>>, vector<1x1x32xf32>
    %123 = vector.shape_cast %122 : vector<1x1x32xf32> to vector<1x32xf32>
    %124 = vector.broadcast %123 : vector<1x32xf32> to vector<16x32xf32>
    %125 = arith.addf %121, %124 : vector<16x32xf32>
    %126 = arith.addf %96, %125 : vector<16x32xf32>
    %c0_59 = arith.constant 0 : index
    %c0_60 = arith.constant 0 : index
    %c0_61 = arith.constant 0 : index
    %127 = vector.load %arg14[%c0_59, %c0_60, %c0_61] : memref<2x1x32xf32, #tpu.memory_space<vmem>>, vector<1x1x32xf32>
    %128 = vector.shape_cast %127 : vector<1x1x32xf32> to vector<1x32xf32>
    %c0_62 = arith.constant 0 : index
    %c0_63 = arith.constant 0 : index
    %c0_64 = arith.constant 0 : index
    %129 = vector.load %arg15[%c0_62, %c0_63, %c0_64] : memref<2x1x32xf32, #tpu.memory_space<vmem>>, vector<1x1x32xf32>
    %130 = vector.shape_cast %129 : vector<1x1x32xf32> to vector<1x32xf32>
    %cst_65 = arith.constant dense<0.000000e+00> : vector<16xf32>
    %131 = vector.multi_reduction <add>, %126, %cst_65 [1] : vector<16x32xf32> to vector<16xf32>
    %132 = vector.shape_cast %131 : vector<16xf32> to vector<16x1xf32>
    %cst_66 = arith.constant 3.200000e+01 : f32
    %133 = vector.broadcast %cst_66 : f32 to vector<16x1xf32>
    %134 = arith.divf %132, %133 : vector<16x1xf32>
    %135 = vector.broadcast %134 : vector<16x1xf32> to vector<16x32xf32>
    %136 = arith.subf %126, %135 : vector<16x32xf32>
    %137 = arith.mulf %136, %136 : vector<16x32xf32>
    %cst_67 = arith.constant dense<0.000000e+00> : vector<16xf32>
    %138 = vector.multi_reduction <add>, %137, %cst_67 [1] : vector<16x32xf32> to vector<16xf32>
    %139 = vector.shape_cast %138 : vector<16xf32> to vector<16x1xf32>
    %cst_68 = arith.constant 3.200000e+01 : f32
    %140 = vector.broadcast %cst_68 : f32 to vector<16x1xf32>
    %141 = arith.divf %139, %140 : vector<16x1xf32>
    %142 = vector.broadcast %134 : vector<16x1xf32> to vector<16x32xf32>
    %143 = arith.subf %126, %142 : vector<16x32xf32>
    %cst_69 = arith.constant 9.99999996E-13 : f32
    %144 = vector.broadcast %cst_69 : f32 to vector<16x1xf32>
    %145 = arith.addf %141, %144 : vector<16x1xf32>
    %146 = math.rsqrt %145 : vector<16x1xf32>
    %147 = vector.broadcast %146 : vector<16x1xf32> to vector<16x32xf32>
    %148 = arith.mulf %143, %147 : vector<16x32xf32>
    %149 = vector.broadcast %128 : vector<1x32xf32> to vector<16x32xf32>
    %150 = arith.mulf %148, %149 : vector<16x32xf32>
    %151 = vector.broadcast %130 : vector<1x32xf32> to vector<16x32xf32>
    %152 = arith.addf %150, %151 : vector<16x32xf32>
    %153 = arith.truncf %152 : vector<16x32xf32> to vector<16x32xbf16>
    %c1 = arith.constant 1 : index
    %c0_70 = arith.constant 0 : index
    %c0_71 = arith.constant 0 : index
    %154 = vector.load %arg4[%c1, %c0_70, %c0_71] : memref<2x32x96xbf16, #tpu.memory_space<vmem>>, vector<1x32x96xbf16>
    %155 = vector.shape_cast %154 : vector<1x32x96xbf16> to vector<32x96xbf16>
    %cst_72 = arith.constant dense<0.000000e+00> : vector<16x96xf32>
    %156 = tpu.matmul %153, %155, %cst_72 {dimension_numbers = #tpu.dot_dimension_numbers<[1], [0], [0], [1], [0, 0, 1, 1], [], []>} : vector<16x32xbf16>, vector<32x96xbf16>, vector<16x96xf32> -> vector<16x96xf32>
    %c1_73 = arith.constant 1 : index
    %c0_74 = arith.constant 0 : index
    %c0_75 = arith.constant 0 : index
    %157 = vector.load %arg5[%c1_73, %c0_74, %c0_75] : memref<2x1x96xf32, #tpu.memory_space<vmem>>, vector<1x1x96xf32>
    %158 = vector.shape_cast %157 : vector<1x1x96xf32> to vector<1x96xf32>
    %159 = vector.broadcast %158 : vector<1x96xf32> to vector<16x96xf32>
    %160 = arith.addf %156, %159 : vector<16x96xf32>
    %161 = vector.shape_cast %160 : vector<16x96xf32> to vector<2x8x12x8xf32>
    %162 = tpu.transpose %161, [2, 0, 1, 3] : vector<2x8x12x8xf32> -> vector<12x2x8x8xf32>
    %163 = vector.extract_strided_slice %162 {offsets = [0, 0, 0, 0], sizes = [4, 2, 8, 8], strides = [1, 1, 1, 1]} : vector<12x2x8x8xf32> to vector<4x2x8x8xf32>
    %164 = vector.shape_cast %163 : vector<4x2x8x8xf32> to vector<8x8x8xf32>
    %165 = arith.truncf %164 : vector<8x8x8xf32> to vector<8x8x8xbf16>
    %166 = vector.extract_strided_slice %162 {offsets = [4, 0, 0, 0], sizes = [4, 2, 8, 8], strides = [1, 1, 1, 1]} : vector<12x2x8x8xf32> to vector<4x2x8x8xf32>
    %167 = vector.shape_cast %166 : vector<4x2x8x8xf32> to vector<8x8x8xf32>
    %168 = arith.truncf %167 : vector<8x8x8xf32> to vector<8x8x8xbf16>
    %169 = vector.extract_strided_slice %162 {offsets = [8, 0, 0, 0], sizes = [4, 2, 8, 8], strides = [1, 1, 1, 1]} : vector<12x2x8x8xf32> to vector<4x2x8x8xf32>
    %170 = vector.shape_cast %169 : vector<4x2x8x8xf32> to vector<8x8x8xf32>
    %171 = arith.truncf %170 : vector<8x8x8xf32> to vector<8x8x8xbf16>
    "tpu.trace_start"() <{level = 10 : i32, message = "bqd,bkd->bqk"}> : () -> ()
    %cst_76 = arith.constant dense<0.000000e+00> : vector<8x8x8xf32>
    %172 = tpu.matmul %165, %168, %cst_76 {dimension_numbers = #tpu.dot_dimension_numbers<[2], [2], [1], [1], [0, 0, 0, 1, 1, 1], [0], [0]>} : vector<8x8x8xbf16>, vector<8x8x8xbf16>, vector<8x8x8xf32> -> vector<8x8x8xf32>
    "tpu.trace_stop"() : () -> ()
    %173 = arith.addf %172, %25 : vector<8x8x8xf32>
    %cst_77 = arith.constant dense<0xFF800000> : vector<8x8xf32>
    %174 = vector.multi_reduction <maximumf>, %173, %cst_77 [2] : vector<8x8x8xf32> to vector<8x8xf32>
    %175 = vector.shape_cast %174 : vector<8x8xf32> to vector<8x8x1xf32>
    %176 = vector.broadcast %175 : vector<8x8x1xf32> to vector<8x8x8xf32>
    %177 = arith.subf %173, %176 : vector<8x8x8xf32>
    %178 = math.exp %177 : vector<8x8x8xf32>
    %cst_78 = arith.constant dense<0.000000e+00> : vector<8x8xf32>
    %179 = vector.multi_reduction <add>, %178, %cst_78 [2] : vector<8x8x8xf32> to vector<8x8xf32>
    %180 = vector.shape_cast %179 : vector<8x8xf32> to vector<8x8x1xf32>
    %181 = tpu.reciprocal %180 {approx = true} : vector<8x8x1xf32> -> vector<8x8x1xf32>
    %182 = vector.broadcast %181 : vector<8x8x1xf32> to vector<8x8x8xf32>
    %183 = arith.mulf %178, %182 : vector<8x8x8xf32>
    %184 = arith.truncf %183 : vector<8x8x8xf32> to vector<8x8x8xbf16>
    "tpu.trace_start"() <{level = 10 : i32, message = "bqk,bkd->bqd"}> : () -> ()
    %cst_79 = arith.constant dense<0.000000e+00> : vector<8x8x8xf32>
    %185 = tpu.matmul %184, %171, %cst_79 {dimension_numbers = #tpu.dot_dimension_numbers<[2], [1], [1], [2], [0, 0, 0, 1, 1, 2], [0], [0]>} : vector<8x8x8xbf16>, vector<8x8x8xbf16>, vector<8x8x8xf32> -> vector<8x8x8xf32>
    "tpu.trace_stop"() : () -> ()
    %186 = vector.shape_cast %185 : vector<8x8x8xf32> to vector<4x2x8x8xf32>
    %187 = tpu.transpose %186, [1, 2, 0, 3] : vector<4x2x8x8xf32> -> vector<2x8x4x8xf32>
    %188 = vector.shape_cast %187 : vector<2x8x4x8xf32> to vector<16x32xf32>
    %189 = arith.truncf %188 : vector<16x32xf32> to vector<16x32xbf16>
    %c1_80 = arith.constant 1 : index
    %c0_81 = arith.constant 0 : index
    %c0_82 = arith.constant 0 : index
    %190 = vector.load %arg6[%c1_80, %c0_81, %c0_82] : memref<2x32x32xbf16, #tpu.memory_space<vmem>>, vector<1x32x32xbf16>
    %191 = vector.shape_cast %190 : vector<1x32x32xbf16> to vector<32x32xbf16>
    %cst_83 = arith.constant dense<0.000000e+00> : vector<16x32xf32>
    %192 = tpu.matmul %189, %191, %cst_83 {dimension_numbers = #tpu.dot_dimension_numbers<[1], [0], [0], [1], [0, 0, 1, 1], [], []>} : vector<16x32xbf16>, vector<32x32xbf16>, vector<16x32xf32> -> vector<16x32xf32>
    %c1_84 = arith.constant 1 : index
    %c0_85 = arith.constant 0 : index
    %c0_86 = arith.constant 0 : index
    %193 = vector.load %arg7[%c1_84, %c0_85, %c0_86] : memref<2x1x32xf32, #tpu.memory_space<vmem>>, vector<1x1x32xf32>
    %194 = vector.shape_cast %193 : vector<1x1x32xf32> to vector<1x32xf32>
    %195 = vector.broadcast %194 : vector<1x32xf32> to vector<16x32xf32>
    %196 = arith.addf %192, %195 : vector<16x32xf32>
    %197 = arith.addf %152, %196 : vector<16x32xf32>
    %c1_87 = arith.constant 1 : index
    %c0_88 = arith.constant 0 : index
    %c0_89 = arith.constant 0 : index
    %198 = vector.load %arg8[%c1_87, %c0_88, %c0_89] : memref<2x1x32xf32, #tpu.memory_space<vmem>>, vector<1x1x32xf32>
    %199 = vector.shape_cast %198 : vector<1x1x32xf32> to vector<1x32xf32>
    %c1_90 = arith.constant 1 : index
    %c0_91 = arith.constant 0 : index
    %c0_92 = arith.constant 0 : index
    %200 = vector.load %arg9[%c1_90, %c0_91, %c0_92] : memref<2x1x32xf32, #tpu.memory_space<vmem>>, vector<1x1x32xf32>
    %201 = vector.shape_cast %200 : vector<1x1x32xf32> to vector<1x32xf32>
    %cst_93 = arith.constant dense<0.000000e+00> : vector<16xf32>
    %202 = vector.multi_reduction <add>, %197, %cst_93 [1] : vector<16x32xf32> to vector<16xf32>
    %203 = vector.shape_cast %202 : vector<16xf32> to vector<16x1xf32>
    %cst_94 = arith.constant 3.200000e+01 : f32
    %204 = vector.broadcast %cst_94 : f32 to vector<16x1xf32>
    %205 = arith.divf %203, %204 : vector<16x1xf32>
    %206 = vector.broadcast %205 : vector<16x1xf32> to vector<16x32xf32>
    %207 = arith.subf %197, %206 : vector<16x32xf32>
    %208 = arith.mulf %207, %207 : vector<16x32xf32>
    %cst_95 = arith.constant dense<0.000000e+00> : vector<16xf32>
    %209 = vector.multi_reduction <add>, %208, %cst_95 [1] : vector<16x32xf32> to vector<16xf32>
    %210 = vector.shape_cast %209 : vector<16xf32> to vector<16x1xf32>
    %cst_96 = arith.constant 3.200000e+01 : f32
    %211 = vector.broadcast %cst_96 : f32 to vector<16x1xf32>
    %212 = arith.divf %210, %211 : vector<16x1xf32>
    %213 = vector.broadcast %205 : vector<16x1xf32> to vector<16x32xf32>
    %214 = arith.subf %197, %213 : vector<16x32xf32>
    %cst_97 = arith.constant 9.99999996E-13 : f32
    %215 = vector.broadcast %cst_97 : f32 to vector<16x1xf32>
    %216 = arith.addf %212, %215 : vector<16x1xf32>
    %217 = math.rsqrt %216 : vector<16x1xf32>
    %218 = vector.broadcast %217 : vector<16x1xf32> to vector<16x32xf32>
    %219 = arith.mulf %214, %218 : vector<16x32xf32>
    %220 = vector.broadcast %199 : vector<1x32xf32> to vector<16x32xf32>
    %221 = arith.mulf %219, %220 : vector<16x32xf32>
    %222 = vector.broadcast %201 : vector<1x32xf32> to vector<16x32xf32>
    %223 = arith.addf %221, %222 : vector<16x32xf32>
    %224 = arith.truncf %223 : vector<16x32xf32> to vector<16x32xbf16>
    %c1_98 = arith.constant 1 : index
    %c0_99 = arith.constant 0 : index
    %c0_100 = arith.constant 0 : index
    %225 = vector.load %arg10[%c1_98, %c0_99, %c0_100] : memref<2x32x64xbf16, #tpu.memory_space<vmem>>, vector<1x32x64xbf16>
    %226 = vector.shape_cast %225 : vector<1x32x64xbf16> to vector<32x64xbf16>
    %cst_101 = arith.constant dense<0.000000e+00> : vector<16x64xf32>
    %227 = tpu.matmul %224, %226, %cst_101 {dimension_numbers = #tpu.dot_dimension_numbers<[1], [0], [0], [1], [0, 0, 1, 1], [], []>} : vector<16x32xbf16>, vector<32x64xbf16>, vector<16x64xf32> -> vector<16x64xf32>
    %c1_102 = arith.constant 1 : index
    %c0_103 = arith.constant 0 : index
    %c0_104 = arith.constant 0 : index
    %228 = vector.load %arg11[%c1_102, %c0_103, %c0_104] : memref<2x1x64xf32, #tpu.memory_space<vmem>>, vector<1x1x64xf32>
    %229 = vector.shape_cast %228 : vector<1x1x64xf32> to vector<1x64xf32>
    %230 = vector.broadcast %229 : vector<1x64xf32> to vector<16x64xf32>
    %231 = arith.addf %227, %230 : vector<16x64xf32>
    %cst_105 = arith.constant 5.000000e-01 : f32
    %232 = vector.broadcast %cst_105 : f32 to vector<16x64xf32>
    %233 = arith.mulf %232, %231 : vector<16x64xf32>
    %cst_106 = arith.constant 4.471500e-02 : f32
    %234 = vector.broadcast %cst_106 : f32 to vector<16x64xf32>
    %235 = arith.mulf %234, %231 : vector<16x64xf32>
    %236 = arith.mulf %235, %231 : vector<16x64xf32>
    %237 = arith.mulf %236, %231 : vector<16x64xf32>
    %238 = arith.addf %231, %237 : vector<16x64xf32>
    %cst_107 = arith.constant 0.797884583 : f32
    %239 = vector.broadcast %cst_107 : f32 to vector<16x64xf32>
    %240 = arith.mulf %239, %238 : vector<16x64xf32>
    %241 = math.tanh %240 : vector<16x64xf32>
    %cst_108 = arith.constant 1.000000e+00 : f32
    %242 = vector.broadcast %cst_108 : f32 to vector<16x64xf32>
    %243 = arith.addf %242, %241 : vector<16x64xf32>
    %244 = arith.mulf %233, %243 : vector<16x64xf32>
    %245 = arith.truncf %244 : vector<16x64xf32> to vector<16x64xbf16>
    %c1_109 = arith.constant 1 : index
    %c0_110 = arith.constant 0 : index
    %c0_111 = arith.constant 0 : index
    %246 = vector.load %arg12[%c1_109, %c0_110, %c0_111] : memref<2x64x32xbf16, #tpu.memory_space<vmem>>, vector<1x64x32xbf16>
    %247 = vector.shape_cast %246 : vector<1x64x32xbf16> to vector<64x32xbf16>
    %cst_112 = arith.constant dense<0.000000e+00> : vector<16x32xf32>
    %248 = tpu.matmul %245, %247, %cst_112 {dimension_numbers = #tpu.dot_dimension_numbers<[1], [0], [0], [1], [0, 0, 1, 1], [], []>} : vector<16x64xbf16>, vector<64x32xbf16>, vector<16x32xf32> -> vector<16x32xf32>
    %c1_113 = arith.constant 1 : index
    %c0_114 = arith.constant 0 : index
    %c0_115 = arith.constant 0 : index
    %249 = vector.load %arg13[%c1_113, %c0_114, %c0_115] : memref<2x1x32xf32, #tpu.memory_space<vmem>>, vector<1x1x32xf32>
    %250 = vector.shape_cast %249 : vector<1x1x32xf32> to vector<1x32xf32>
    %251 = vector.broadcast %250 : vector<1x32xf32> to vector<16x32xf32>
    %252 = arith.addf %248, %251 : vector<16x32xf32>
    %253 = arith.addf %223, %252 : vector<16x32xf32>
    %c1_116 = arith.constant 1 : index
    %c0_117 = arith.constant 0 : index
    %c0_118 = arith.constant 0 : index
    %254 = vector.load %arg14[%c1_116, %c0_117, %c0_118] : memref<2x1x32xf32, #tpu.memory_space<vmem>>, vector<1x1x32xf32>
    %255 = vector.shape_cast %254 : vector<1x1x32xf32> to vector<1x32xf32>
    %c1_119 = arith.constant 1 : index
    %c0_120 = arith.constant 0 : index
    %c0_121 = arith.constant 0 : index
    %256 = vector.load %arg15[%c1_119, %c0_120, %c0_121] : memref<2x1x32xf32, #tpu.memory_space<vmem>>, vector<1x1x32xf32>
    %257 = vector.shape_cast %256 : vector<1x1x32xf32> to vector<1x32xf32>
    %cst_122 = arith.constant dense<0.000000e+00> : vector<16xf32>
    %258 = vector.multi_reduction <add>, %253, %cst_122 [1] : vector<16x32xf32> to vector<16xf32>
    %259 = vector.shape_cast %258 : vector<16xf32> to vector<16x1xf32>
    %cst_123 = arith.constant 3.200000e+01 : f32
    %260 = vector.broadcast %cst_123 : f32 to vector<16x1xf32>
    %261 = arith.divf %259, %260 : vector<16x1xf32>
    %262 = vector.broadcast %261 : vector<16x1xf32> to vector<16x32xf32>
    %263 = arith.subf %253, %262 : vector<16x32xf32>
    %264 = arith.mulf %263, %263 : vector<16x32xf32>
    %cst_124 = arith.constant dense<0.000000e+00> : vector<16xf32>
    %265 = vector.multi_reduction <add>, %264, %cst_124 [1] : vector<16x32xf32> to vector<16xf32>
    %266 = vector.shape_cast %265 : vector<16xf32> to vector<16x1xf32>
    %cst_125 = arith.constant 3.200000e+01 : f32
    %267 = vector.broadcast %cst_125 : f32 to vector<16x1xf32>
    %268 = arith.divf %266, %267 : vector<16x1xf32>
    %269 = vector.broadcast %261 : vector<16x1xf32> to vector<16x32xf32>
    %270 = arith.subf %253, %269 : vector<16x32xf32>
    %cst_126 = arith.constant 9.99999996E-13 : f32
    %271 = vector.broadcast %cst_126 : f32 to vector<16x1xf32>
    %272 = arith.addf %268, %271 : vector<16x1xf32>
    %273 = math.rsqrt %272 : vector<16x1xf32>
    %274 = vector.broadcast %273 : vector<16x1xf32> to vector<16x32xf32>
    %275 = arith.mulf %270, %274 : vector<16x32xf32>
    %276 = vector.broadcast %255 : vector<1x32xf32> to vector<16x32xf32>
    %277 = arith.mulf %275, %276 : vector<16x32xf32>
    %278 = vector.broadcast %257 : vector<1x32xf32> to vector<16x32xf32>
    %279 = arith.addf %277, %278 : vector<16x32xf32>
    %280 = vector.shape_cast %279 : vector<16x32xf32> to vector<2x8x32xf32>
    %281 = vector.extract_strided_slice %280 {offsets = [0, 0, 0], sizes = [2, 1, 32], strides = [1, 1, 1]} : vector<2x8x32xf32> to vector<2x1x32xf32>
    %282 = vector.shape_cast %281 : vector<2x1x32xf32> to vector<2x32xf32>
    %283 = arith.truncf %282 : vector<2x32xf32> to vector<2x32xbf16>
    %c0_127 = arith.constant 0 : index
    %c0_128 = arith.constant 0 : index
    %284 = vector.load %arg16[%c0_127, %c0_128] : memref<32x32xbf16, #tpu.memory_space<vmem>>, vector<32x32xbf16>
    %cst_129 = arith.constant dense<0.000000e+00> : vector<2x32xf32>
    %285 = tpu.matmul %283, %284, %cst_129 {dimension_numbers = #tpu.dot_dimension_numbers<[1], [0], [0], [1], [0, 0, 1, 1], [], []>} : vector<2x32xbf16>, vector<32x32xbf16>, vector<2x32xf32> -> vector<2x32xf32>
    %c0_130 = arith.constant 0 : index
    %c0_131 = arith.constant 0 : index
    %286 = vector.load %arg17[%c0_130, %c0_131] : memref<1x32xf32, #tpu.memory_space<vmem>>, vector<1x32xf32>
    %287 = vector.broadcast %286 : vector<1x32xf32> to vector<2x32xf32>
    %288 = arith.addf %285, %287 : vector<2x32xf32>
    %289 = math.tanh %288 : vector<2x32xf32>
    %290 = arith.truncf %289 : vector<2x32xf32> to vector<2x32xbf16>
    %c0_132 = arith.constant 0 : index
    %c0_133 = arith.constant 0 : index
    %291 = vector.load %arg18[%c0_132, %c0_133] : memref<32x3xbf16, #tpu.memory_space<vmem>>, vector<32x3xbf16>
    %cst_134 = arith.constant dense<0.000000e+00> : vector<2x3xf32>
    %292 = tpu.matmul %290, %291, %cst_134 {dimension_numbers = #tpu.dot_dimension_numbers<[1], [0], [0], [1], [0, 0, 1, 1], [], []>} : vector<2x32xbf16>, vector<32x3xbf16>, vector<2x3xf32> -> vector<2x3xf32>
    %c0_135 = arith.constant 0 : index
    %c0_136 = arith.constant 0 : index
    %293 = vector.load %arg19[%c0_135, %c0_136] : memref<1x3xf32, #tpu.memory_space<vmem>>, vector<1x3xf32>
    %294 = vector.broadcast %293 : vector<1x3xf32> to vector<2x3xf32>
    %295 = arith.addf %292, %294 : vector<2x3xf32>
    %c0_137 = arith.constant 0 : index
    %c0_138 = arith.constant 0 : index
    %296 = vector.load %arg20[%c0_137, %c0_138] : memref<2x3xf32, #tpu.memory_space<vmem>>, vector<2x3xf32>
    tpu.vector_store %arg20[%c0_137, %c0_138], %295 {strides = array<i32>} : memref<2x3xf32, #tpu.memory_space<vmem>>, vector<2x3xf32>,
    return
  }
}

</mosaic_0001>

<bundles_post_ra>
// kernel: bert_fewshot_forward.1
= control target key start
LH: loop header
LB: loop body
LE: loop exit
PB: predicated region body
PF: predicated region fallthrough
CT: control target
= control target key end

     0   :  { %s7153_s0 = inlined_call_operand.vmem [shape: f32[16,32], index: 0, kind: input, shape index: {}]   ;;  %s7154_s1 = inlined_call_operand.vmem [shape: f32[8,8,8], index: 1, kind: input, shape index: {}]   ;;  %s7155_s2 = inlined_call_operand.vmem [shape: f32[1,32], index: 2, kind: input, shape index: {}]   ;;  %s7156_s3 = inlined_call_operand.vmem [shape: f32[1,32], index: 3, kind: input, shape index: {}]   ;;  %s7157_s4 = inlined_call_operand.vmem [shape: bf16[2,32,96], index: 4, kind: input, shape index: {}]   ;;  %s7158_s5 = inlined_call_operand.vmem [shape: f32[2,1,96], index: 5, kind: input, shape index: {}]   ;;  %s7159_s6 = inlined_call_operand.vmem [shape: bf16[2,32,32], index: 6, kind: input, shape index: {}]   ;;  %s7160_s7 = inlined_call_operand.vmem [shape: f32[2,1,32], index: 7, kind: input, shape index: {}]   ;;  %s7161_s8 = inlined_call_operand.vmem [shape: f32[2,1,32], index: 8, kind: input, shape index: {}]   ;;  %s7162_s9 = inlined_call_operand.vmem [shape: f32[2,1,32], index: 9, kind: input, shape index: {}]   ;;  %s7163_s10 = inlined_call_operand.vmem [shape: bf16[2,32,64], index: 10, kind: input, shape index: {}]   ;;  %s7164_s11 = inlined_call_operand.vmem [shape: f32[2,1,64], index: 11, kind: input, shape index: {}]   ;;  %s7165_s12 = inlined_call_operand.vmem [shape: bf16[2,64,32], index: 12, kind: input, shape index: {}]   ;;  %s7166_s13 = inlined_call_operand.vmem [shape: f32[2,1,32], index: 13, kind: input, shape index: {}]   ;;  %s7167_s14 = inlined_call_operand.vmem [shape: f32[2,1,32], index: 14, kind: input, shape index: {}]   ;;  %s7168_s15 = inlined_call_operand.vmem [shape: f32[2,1,32], index: 15, kind: input, shape index: {}]   ;;  %s7169_s16 = inlined_call_operand.vmem [shape: bf16[32,32], index: 16, kind: input, shape index: {}]   ;;  %s7170_s17 = inlined_call_operand.vmem [shape: f32[1,32], index: 17, kind: input, shape index: {}]   ;;  %s7171_s18 = inlined_call_operand.vmem [shape: bf16[32,3], index: 18, kind: input, shape index: {}]   ;;  %s7172_s19 = inlined_call_operand.vmem [shape: f32[1,3], index: 19, kind: input, shape index: {}]   ;;  %s7173_s20 = inlined_call_operand.hbm [shape: f32[2,3], index: 20, kind: output, shape index: {}]  }
   0x1   :  { %7192 = sst [smem:[#allocation5_spill]] %s7153_s0 }
   0x2   :  { %7193 = sst [smem:[#allocation6_spill]] %s7154_s1 }
   0x3   :  { %7194 = sst [smem:[#allocation7_spill]] %s7155_s2 }
   0x4   :  { %7195 = sst [smem:[#allocation8_spill]] %s7156_s3 }
   0x5   :  { %7196 = sst [smem:[#allocation9_spill]] %s7157_s4 }
   0x6   :  { %s7197_s23 = sld [smem:[#allocation5_spill]]  ;;  %vm71_vm0 = vcmask 261120  }
   0xc   :  { %v67_v0 = vld [vmem:[%s7197_s23] sm:$0xff]  ;;  %v68_v1 = vld [vmem:[%s7197_s23 + $0x8] sm:$0xff] }
   0xd   :  { %v72_v2 = vsel %vm71_vm0, %v67_v0, 0.0  ;;  %v75_v3 = vsel %vm71_vm0, %v68_v1, 0.0 }
   0xe   :  { %73 = vadd.xlane.f32.xlu0 %v72_v2 }
  0x12   :  { %76 = vadd.xlane.f32.xlu0 %v75_v3 }
  0x13   :  { %25 = vsyncpa [#allocation3], 0  ;;  %s7198_s26 = sld [smem:[#allocation9_spill]]  ;;  %v5919_v15 = vmov 0.0   ;;  %vm5920_vm1 = vmmov 0   ;;  %s7199_s30 = sld [smem:[#allocation7_spill]]  ;;  %v264_v43 = vlaneseq }
  0x14   :  { %5440 = vmatprep.subr.bf16.mxu0 %v5919_v15  ;;  %5444 = vmatprep.mubr.msk.bf16.mxu0 %vm5920_vm1, %v5919_v15  ;;  %s7200_s1 = sld [smem:[#allocation8_spill]]  ;;  %v5182_v34 = vld [vmem:[%s7158_s5] ss:$0 sm:$0xff]  ;;  %s5921_s24 = smov 88   ;;  %v5930_v41 = vmov 1983009808  }
  0x15   :  { %5448 = vmatprep.subr.bf16.mxu1 %v5919_v15  ;;  %5450 = vmatprep.mubr.msk.bf16.mxu1 %vm5920_vm1, %v5919_v15  ;;  %s5922_s2 = smov 96   ;;  %s5923_s25 = smov 80   ;;  %v262_v42 = vunpack.c.l.s4 %v5930_v41  ;;  %v5931_v46 = vmov 1934713408   ;;  %v265_v49 = vshrl.u32 %v264_v43, 7  ;;  %vm1099_vm2 = vcmask 64512  }
  0x16   :  { %s5924_s3 = smov 72   ;;  %s5925_s27 = smov 120   ;;  %v326_v47 = vunpack.c.l.s4 %v5931_v46  ;;  %vm1567_vm3 = vcmask 1043456   ;;  %vm2231_vm4 = vcmask 130048   ;;  %vm2234_vm5 = vcmask 195584  }
  0x17   :  { %s7190_s28 = smov 112   ;;  %s7188_s4 = smov 104   ;;  %v263_v48 = vunpack.c.0.s8 %v262_v42  ;;  %vm2477_vm6 = vcmask 523264   ;;  %vm5038_vm7 = vcmask 1041409   ;;  %vm5164_vm8 = vcmask 17408  }
  0x18   :  { %s7179_s29 = smov 64   ;;  %v327_v52 = vunpack.c.0.s8 %v326_v47  ;;  %s7186_s22 = smov 48  }
  0x19   :  { %v5769_v14 = vld [vmem:[%s7198_s26] sm:$0xff]   ;;  %v5770_v16 = vld [vmem:[%s7198_s26 + $0x8] sm:$0xff]   ;;  %v6125_v53 = vsub.s32 %v263_v48, %v265_v49  ;;  %s7181_s23 = smov 40  }
  0x1a   :  { %5441 = vmatpush3.bf16.msra.mxu0 %v5769_v14  ;;  %v5180_v25 = vld [vmem:[%s7199_s30] ss:$0 sm:$0xff]  ;;  %s7177_s30 = smov 56   ;;  %v6127_v60 = vsub.s32 %v327_v52, %v265_v49 }
  0x1b   :  { %5442 = vmatprep.subr.bf16.mxu0 %v5919_v15  ;;  %v5181_v29 = vld [vmem:[%s7200_s1] ss:$0 sm:$0xff]  ;;  %s7201_s1 = sld [smem:[#allocation6_spill]] }
  0x1e   :  { %5443 = vmatpush3.bf16.msra.mxu0 %v5770_v16 }
  0x1f   :  { %5454 = vmatprep.subr.bf16.mxu0 %v5919_v15 }
  0x9b   :  { %v74_v4 = vpop.xlane.xlu0 %73 }
  0x9c   :  { %v79_v5 = vmul.f32 0.03125, %v74_v4 }
  0x9e   :  { %v81_v6 = vsub.f32 %v67_v0, %v79_v5 }
  0x9f   :  { %v77_v7 = vpop.xlane.xlu0 %76 }
  0xa0   :  { %v80_v8 = vmul.f32 0.03125, %v77_v7  ;;  %v83_v9 = vmul.f32 %v81_v6, %v81_v6 }
  0xa2   :  { %v82_v10 = vsub.f32 %v68_v1, %v80_v8  ;;  %v85_v11 = vsel %vm71_vm0, %v83_v9, 0.0 }
  0xa3   :  { %86 = vadd.xlane.f32.xlu1 %v85_v11 }
  0xa4   :  { %v84_v12 = vmul.f32 %v82_v10, %v82_v10 }
  0xa6   :  { %v88_v13 = vsel %vm71_vm0, %v84_v12, 0.0 }
  0xa7   :  { %89 = vadd.xlane.f32.xlu1 %v88_v13 }
 0x130   :  { %v87_v17 = vpop.xlane.xlu1 %86 }
 0x131   :  { %v91_v18 = vmul.f32 0.03125, %v87_v17 }
 0x133   :  { %v93_v19 = vadd.f32 1e-12, %v91_v18 }
 0x134   :  { %v90_v20 = vpop.xlane.xlu1 %89 }
 0x135   :  { %5793 = vrsqrt.f32 %v93_v19  ;;  %v92_v21 = vmul.f32 0.03125, %v90_v20 }
 0x137   :  { %v94_v22 = vadd.f32 1e-12, %v92_v21 }
 0x139   :  { %5795 = vrsqrt.f32 %v94_v22 }
 0x13f   :  { %v5794_v23 = vpop.eup %5793 }
 0x140   :  { %v97_v24 = vmul.f32 %v5794_v23, %v81_v6 }
 0x142   :  { %v105_v28 = vmul.f32 %v5180_v25, %v97_v24 }
 0x143   :  { %v5796_v26 = vpop.eup %5795 }
 0x144   :  { %v98_v27 = vmul.f32 %v5796_v26, %v82_v10  ;;  %v6073_v31 = vadd.f32 %v5181_v29, %v105_v28 }
 0x146   :  { %v106_v30 = vmul.f32 %v5180_v25, %v98_v27 }
 0x148   :  { %v6075_v32 = vadd.f32 %v5181_v29, %v106_v30 }
 0x14a   :  { %v123_v33 = vpack.c.bf16 %v6075_v32, %v6073_v31 }
 0x14c   :  { %5445 = vmatmul.mubr.msk.bf16.vlgmr.msra.gmra.mrb[0].mxu0 %vm71_vm0, %v123_v33 }
 0x14d   :  { %5456 = vmatprep.mubr.msk.bf16.mxu0 %vm5920_vm1, %v5919_v15 }
 0x21f   :  { %v184_v35 = vpop.f32.mrb[0].mxu0 }
 0x220   :  { %v6085_v36 = vadd.f32 %v5182_v34, %v184_v35  ;;  %v5446_v37 = vpop.f32.mrb[1].mxu0 }
 0x221   :  { %v187_v38 = vpop.f32.mrb[2].mxu0 }
 0x222   :  { %217 = vrot.lane.b32.xlu1 %v6085_v36, %s5921_s24  ;;  %211 = vrot.lane.b32.xlu0 %v6085_v36, %s5922_s2  ;;  %v5447_v39 = vpop.f32.mrb[3].mxu0  ;;  %v6091_v40 = vadd.f32 %v5182_v34, %v187_v38 }
 0x226   :  { %223 = vrot.lane.b32.xlu0 %v6085_v36, %s5923_s25  ;;  %213 = vrot.lane.b32.xlu1 %v6091_v40, %s5922_s2 }
 0x22a   :  { %229 = vrot.lane.b32.xlu0 %v6085_v36, %s5924_s3  ;;  %219 = vrot.lane.b32.xlu1 %v6091_v40, %s5921_s24 }
 0x22e   :  { %193 = vrot.lane.b32.xlu0 %v6085_v36, %s5925_s27  ;;  %225 = vrot.lane.b32.xlu1 %v6091_v40, %s5923_s25 }
 0x232   :  { %199 = vrot.lane.b32.xlu0 %v6085_v36, %s7190_s28  ;;  %231 = vrot.lane.b32.xlu1 %v6091_v40, %s5924_s3 }
 0x236   :  { %205 = vrot.lane.b32.xlu0 %v6085_v36, %s7188_s4  ;;  %195 = vrot.lane.b32.xlu1 %v6091_v40, %s5925_s27 }
 0x23a   :  { %235 = vrot.lane.b32.xlu0 %v6085_v36, %s7179_s29  ;;  %201 = vrot.lane.b32.xlu1 %v6091_v40, %s7190_s28  ;;  %s7210_s28 = smov 24  }
 0x23e   :  { %207 = vrot.lane.b32.xlu1 %v6091_v40, %s7188_s4 }
 0x242   :  { %241 = vrot.lane.b32.xlu1 %v6085_v36, %s7177_s30 }
 0x246   :  { %237 = vrot.lane.b32.xlu1 %v6091_v40, %s7179_s29  ;;  %s7185_s29 = smov 16  }
 0x24a   :  { %243 = vrot.lane.b32.xlu1 %v6091_v40, %s7177_s30  ;;  %s7184_s30 = smov 8  }
 0x294   :  { %v218_v44 = vpop.permute.xlu1 %217  ;;  %v212_v45 = vpop.permute.xlu0 %211 }
 0x298   :  { %v224_v50 = vpop.permute.xlu0 %223  ;;  %v214_v51 = vpop.permute.xlu1 %213 }
 0x299   :  { %v291_v54 = vcombine.low %v212_v45, %v224_v50  ;;  %v292_v55 = vcombine.high %v212_v45, %v224_v50 }
 0x29b   :  { %v299_v61 = vrot.slane %v291_v54, %v6125_v53  ;;  %v306_v62 = vrot.slane %v292_v55, %v6125_v53 }
 0x29c   :  { %v230_v56 = vpop.permute.xlu0 %229  ;;  %v220_v57 = vpop.permute.xlu1 %219 }
 0x29d   :  { %v307_v58 = vcombine.low %v218_v44, %v230_v56  ;;  %v308_v59 = vcombine.high %v218_v44, %v230_v56 }
 0x29f   :  { %v315_v63 = vrot.slane %v307_v58, %v6125_v53  ;;  %v322_v0 = vrot.slane %v308_v59, %v6125_v53 }
 0x2a0   :  { %v194_v1 = vpop.permute.xlu0 %193  ;;  %v226_v2 = vpop.permute.xlu1 %225 }
 0x2a1   :  { %v355_v3 = vcombine.low %v299_v61, %v315_v63  ;;  %v356_v4 = vcombine.high %v299_v61, %v315_v63  ;;  %v371_v5 = vcombine.low %v306_v62, %v322_v0  ;;  %v372_v6 = vcombine.high %v306_v62, %v322_v0 }
 0x2a2   :  { %v495_v11 = vcombine.low %v214_v51, %v226_v2  ;;  %v496_v12 = vcombine.high %v214_v51, %v226_v2 }
 0x2a3   :  { %v363_v7 = vrot.slane %v355_v3, %v6127_v60  ;;  %v370_v8 = vrot.slane %v356_v4, %v6127_v60  ;;  %v379_v9 = vrot.slane %v371_v5, %v6127_v60  ;;  %v386_v10 = vrot.slane %v372_v6, %v6127_v60 }
 0x2a4   :  { %v200_v13 = vpop.permute.xlu0 %199  ;;  %v232_v14 = vpop.permute.xlu1 %231  ;;  %v503_v28 = vrot.slane %v495_v11, %v6125_v53  ;;  %v510_v29 = vrot.slane %v496_v12, %v6125_v53 }
 0x2a5   :  { %v5187_v16 = vcombine.low %v363_v7, %v370_v8  ;;  %v5189_v17 = vcombine.high %v363_v7, %v370_v8  ;;  %v5191_v18 = vcombine.low %v379_v9, %v386_v10  ;;  %v5193_v19 = vcombine.high %v379_v9, %v386_v10 }
 0x2a6   :  { %v259_v20 = vcombine.low %v6085_v36, %v200_v13  ;;  %v260_v21 = vcombine.high %v6085_v36, %v200_v13  ;;  %v511_v22 = vcombine.low %v220_v57, %v232_v14  ;;  %v512_v23 = vcombine.high %v220_v57, %v232_v14 }
 0x2a7   :  { %v6140_v24 = vrot.slane %v5187_v16, %v6125_v53  ;;  %v6143_v25 = vrot.slane %v5189_v17, %v6125_v53  ;;  %v6146_v26 = vrot.slane %v5191_v18, %v6125_v53  ;;  %v6149_v27 = vrot.slane %v5193_v19, %v6125_v53 }
 0x2a8   :  { %v519_v30 = vrot.slane %v511_v22, %v6125_v53  ;;  %v526_v33 = vrot.slane %v512_v23, %v6125_v53  ;;  %v206_v34 = vpop.permute.xlu0 %205  ;;  %v196_v35 = vpop.permute.xlu1 %195  ;;  %v267_v37 = vrot.slane %v259_v20, %v6125_v53  ;;  %v274_v38 = vrot.slane %v260_v21, %v6125_v53 }
 0x2a9   :  { %v275_v39 = vcombine.low %v194_v1, %v206_v34  ;;  %v276_v41 = vcombine.high %v194_v1, %v206_v34  ;;  %v747_v48 = vcombine.low %v6140_v24, %v6143_v25  ;;  %v779_v49 = vcombine.low %v6146_v26, %v6149_v27 }
 0x2aa   :  { %v559_v42 = vcombine.low %v503_v28, %v519_v30  ;;  %v560_v43 = vcombine.high %v503_v28, %v519_v30  ;;  %v575_v44 = vcombine.low %v510_v29, %v526_v33  ;;  %v576_v45 = vcombine.high %v510_v29, %v526_v33 }
 0x2ab   :  { %v283_v46 = vrot.slane %v275_v39, %v6125_v53  ;;  %v290_v47 = vrot.slane %v276_v41, %v6125_v53  ;;  %v755_v8 = vrot.slane %v747_v48, %v6127_v60  ;;  %v787_v9 = vrot.slane %v779_v49, %v6127_v60 }
 0x2ac   :  { %v567_v50 = vrot.slane %v559_v42, %v6127_v60  ;;  %v574_v51 = vrot.slane %v560_v43, %v6127_v60  ;;  %v583_v52 = vrot.slane %v575_v44, %v6127_v60  ;;  %v590_v54 = vrot.slane %v576_v45, %v6127_v60  ;;  %v202_v55 = vpop.permute.xlu1 %201 }
 0x2ad   :  { %v323_v56 = vcombine.low %v267_v37, %v283_v46  ;;  %v324_v57 = vcombine.high %v267_v37, %v283_v46  ;;  %v339_v58 = vcombine.low %v274_v38, %v290_v47  ;;  %v340_v59 = vcombine.high %v274_v38, %v290_v47 }
 0x2ae   :  { %v5197_v61 = vcombine.low %v567_v50, %v574_v51  ;;  %v5199_v62 = vcombine.high %v567_v50, %v574_v51  ;;  %v5201_v63 = vcombine.low %v583_v52, %v590_v54  ;;  %v5203_v0 = vcombine.high %v583_v52, %v590_v54 }
 0x2af   :  { %v331_v1 = vrot.slane %v323_v56, %v6127_v60  ;;  %v338_v2 = vrot.slane %v324_v57, %v6127_v60  ;;  %v347_v3 = vrot.slane %v339_v58, %v6127_v60  ;;  %v354_v4 = vrot.slane %v340_v59, %v6127_v60 }
 0x2b0   :  { %v6172_v5 = vrot.slane %v5197_v61, %v6125_v53  ;;  %v6175_v6 = vrot.slane %v5199_v62, %v6125_v53  ;;  %v208_v7 = vpop.permute.xlu1 %207  ;;  %v463_v14 = vcombine.low %v6091_v40, %v202_v55  ;;  %v464_v16 = vcombine.high %v6091_v40, %v202_v55 }
 0x2b1   :  { %v5186_v10 = vcombine.low %v331_v1, %v338_v2  ;;  %v5188_v11 = vcombine.high %v331_v1, %v338_v2  ;;  %v5190_v12 = vcombine.low %v347_v3, %v354_v4  ;;  %v5192_v13 = vcombine.high %v347_v3, %v354_v4 }
 0x2b2   :  { %v479_v17 = vcombine.low %v196_v35, %v208_v7  ;;  %v480_v18 = vcombine.high %v196_v35, %v208_v7  ;;  %v6182_v19 = vrot.slane %v5201_v63, %v6125_v53  ;;  %v6185_v20 = vrot.slane %v5203_v0, %v6125_v53 }
 0x2b3   :  { %v6188_v21 = vrot.slane %v5186_v10, %v6125_v53  ;;  %v6191_v22 = vrot.slane %v5188_v11, %v6125_v53  ;;  %v471_v23 = vrot.slane %v463_v14, %v6125_v53  ;;  %v478_v28 = vrot.slane %v464_v16, %v6125_v53 }
 0x2b4   :  { %v487_v29 = vrot.slane %v479_v17, %v6125_v53  ;;  %v494_v30 = vrot.slane %v480_v18, %v6125_v53  ;;  %v6198_v33 = vrot.slane %v5190_v12, %v6125_v53  ;;  %v6201_v34 = vrot.slane %v5192_v13, %v6125_v53 }
 0x2b5   :  { %v799_v35 = vcombine.low %v755_v8, %v787_v9  ;;  %v951_v37 = vcombine.low %v6172_v5, %v6175_v6  ;;  %v983_v45 = vcombine.low %v6182_v19, %v6185_v20  ;;  %v731_v46 = vcombine.low %v6188_v21, %v6191_v22 }
 0x2b6   :  { %v527_v38 = vcombine.low %v471_v23, %v487_v29  ;;  %v528_v39 = vcombine.high %v471_v23, %v487_v29  ;;  %v543_v41 = vcombine.low %v478_v28, %v494_v30  ;;  %v544_v42 = vcombine.high %v478_v28, %v494_v30 }
 0x2b7   :  { %v1083_v43 = vpack.c.bf16 %v799_v35, %v799_v35  ;;  %v959_v44 = vrot.slane %v951_v37, %v6127_v60  ;;  %v991_v52 = vrot.slane %v983_v45, %v6127_v60  ;;  %v739_v54 = vrot.slane %v731_v46, %v6127_v60 }
 0x2b8   :  { %v535_v47 = vrot.slane %v527_v38, %v6127_v60  ;;  %v542_v48 = vrot.slane %v528_v39, %v6127_v60  ;;  %v551_v49 = vrot.slane %v543_v41, %v6127_v60  ;;  %v558_v50 = vrot.slane %v544_v42, %v6127_v60 }
 0x2b9   :  { %v1104_v51 = vsel %vm1099_vm2, %v1083_v43, 0  ;;  %v763_v55 = vcombine.low %v6198_v33, %v6201_v34  ;;  %v1003_v61 = vcombine.low %v959_v44, %v991_v52  ;;  %v800_v63 = vcombine.high %v755_v8, %v787_v9 }
 0x2ba   :  { %v5196_v56 = vcombine.low %v535_v47, %v542_v48  ;;  %v5198_v57 = vcombine.high %v535_v47, %v542_v48  ;;  %v5200_v58 = vcombine.low %v551_v49, %v558_v50  ;;  %v5202_v59 = vcombine.high %v551_v49, %v558_v50  ;;  %5449 = vmatpush3.bf16.xpose.msra.mxu1 %v1104_v51 }
 0x2bb   :  { %5460 = vmatprep.subr.bf16.mxu1 %v5919_v15  ;;  %v771_v62 = vrot.slane %v763_v55, %v6127_v60  ;;  %v1084_v4 = vpack.c.bf16 %v1003_v61, %v1003_v61  ;;  %v1085_v10 = vpack.c.bf16 %v800_v63, %v800_v63  ;;  %v1004_v16 = vcombine.high %v959_v44, %v991_v52 }
 0x2bc   :  { %v879_v0 = vrot.slane %v5196_v56, %v6125_v53  ;;  %v895_v1 = vrot.slane %v5198_v57, %v6125_v53  ;;  %v911_v2 = vrot.slane %v5200_v58, %v6125_v53  ;;  %v927_v3 = vrot.slane %v5202_v59, %v6125_v53 }
 0x2bd   :  { %v795_v7 = vcombine.low %v739_v54, %v771_v62  ;;  %v1150_v13 = vsel %vm1099_vm2, %v1084_v4, 0  ;;  %v748_v17 = vcombine.high %v6140_v24, %v6143_v25  ;;  %v732_v18 = vcombine.high %v6188_v21, %v6191_v22 }
 0x2be   :  { %v935_v11 = vcombine.low %v879_v0, %v895_v1  ;;  %v967_v12 = vcombine.low %v911_v2, %v927_v3  ;;  %5455 = vmatpush3.bf16.xpose.msra.mxu0 %v1150_v13  ;;  %v764_v23 = vcombine.high %v6198_v33, %v6201_v34  ;;  %v1196_v28 = vsel %vm1099_vm2, %v1085_v10, 0  ;;  %v116_v13 = vld [vmem:[%s7201_s1 + $0x8] sm:$0xff] }
 0x2bf   :  { %v1075_v14 = vpack.c.bf16 %v795_v7, %v795_v7  ;;  %5466 = vmatprep.subr.bf16.mxu0 %v5919_v15  ;;  %v780_v29 = vcombine.high %v6146_v26, %v6149_v27  ;;  %v796_v30 = vcombine.high %v739_v54, %v771_v62  ;;  %v762_v25 = vrot.slane %v748_v17, %v6127_v60 }
 0x2c0   :  { %v943_v8 = vrot.slane %v935_v11, %v6127_v60  ;;  %v975_v9 = vrot.slane %v967_v12, %v6127_v60  ;;  %v1086_v21 = vpack.c.bf16 %v1004_v16, %v1004_v16  ;;  %v952_v33 = vcombine.high %v6172_v5, %v6175_v6  ;;  %v117_v16 = vld [vmem:[%s7201_s1 + $0x10] sm:$0xff] }
 0x2c1   :  { %5451 = vmatmul.mubr.msk.bf16.vlgmr.msra.gmra.mrb[0].mxu1 %vm1099_vm2, %v1075_v14  ;;  %v794_v22 = vrot.slane %v780_v29, %v6127_v60  ;;  %v984_v34 = vcombine.high %v6182_v19, %v6185_v20  ;;  %v1077_v38 = vpack.c.bf16 %v796_v30, %v796_v30  ;;  %v746_v39 = vrot.slane %v732_v18, %v6127_v60 }
 0x2c2   :  { %5461 = vmatpush3.bf16.xpose.msra.mxu1 %v1196_v28  ;;  %5462 = vmatprep.mubr.msk.bf16.mxu1 %vm5920_vm1, %v5919_v15  ;;  %v999_v24 = vcombine.low %v943_v8, %v975_v9  ;;  %v966_v35 = vrot.slane %v952_v33, %v6127_v60  ;;  %v1242_v41 = vsel %vm1099_vm2, %v1086_v21, 0  ;;  %v778_v43 = vrot.slane %v764_v23, %v6127_v60 }
 0x2c3   :  { %5472 = vmatprep.subr.bf16.mxu1 %v5919_v15  ;;  %v801_v27 = vcombine.low %v762_v25, %v794_v22  ;;  %v998_v37 = vrot.slane %v984_v34, %v6127_v60  ;;  %v936_v6 = vcombine.high %v879_v0, %v895_v1  ;;  %v968_v19 = vcombine.high %v911_v2, %v927_v3  ;;  %v115_v2 = vld [vmem:[%s7201_s1] sm:$0xff] }
 0x2c4   :  { %v1076_v26 = vpack.c.bf16 %v999_v24, %v999_v24  ;;  %v1000_v44 = vcombine.high %v943_v8, %v975_v9  ;;  %v802_v45 = vcombine.high %v762_v25, %v794_v22  ;;  %v797_v46 = vcombine.low %v746_v39, %v778_v43  ;;  %v118_v22 = vld [vmem:[%s7201_s1 + $0x18] sm:$0xff]  ;;  %v119_v34 = vld [vmem:[%s7201_s1 + $0x20] sm:$0xff] }
 0x2c5   :  { %v1087_v42 = vpack.c.bf16 %v801_v27, %v801_v27  ;;  %v1005_v5 = vcombine.low %v966_v35, %v998_v37  ;;  %v950_v50 = vrot.slane %v936_v6, %v6127_v60  ;;  %v982_v51 = vrot.slane %v968_v19, %v6127_v60  ;;  %v120_v6 = vld [vmem:[%s7201_s1 + $0x28] sm:$0xff] }
 0x2c6   :  { %5457 = vmatmul.mubr.msk.bf16.vlgmr.msra.gmra.mrb[4].mxu0 %vm1099_vm2, %v1076_v26  ;;  %v1078_v48 = vpack.c.bf16 %v1000_v44, %v1000_v44  ;;  %v1089_v49 = vpack.c.bf16 %v802_v45, %v802_v45  ;;  %v1079_v52 = vpack.c.bf16 %v797_v46, %v797_v46  ;;  %v1006_v55 = vcombine.high %v966_v35, %v998_v37 }
 0x2c7   :  { %5467 = vmatpush3.bf16.xpose.msra.mxu0 %v1242_v41  ;;  %5468 = vmatprep.mubr.msk.bf16.mxu0 %vm5920_vm1, %v5919_v15  ;;  %v1288_v20 = vsel %vm1099_vm2, %v1087_v42, 0  ;;  %v1088_v47 = vpack.c.bf16 %v1005_v5, %v1005_v5  ;;  %v1001_v57 = vcombine.low %v950_v50, %v982_v51  ;;  %v798_v58 = vcombine.high %v746_v39, %v778_v43 }
 0x2c8   :  { %5478 = vmatprep.subr.bf16.mxu0 %v5919_v15  ;;  %v1380_v56 = vsel %vm1099_vm2, %v1089_v49, 0  ;;  %v1090_v59 = vpack.c.bf16 %v1006_v55, %v1006_v55  ;;  %v1002_v0 = vcombine.high %v950_v50, %v982_v51 }
 0x2c9   :  { %5463 = vmatmul.mubr.msk.bf16.vlgmr.msra.gmra.mrb[4].mxu1 %vm1099_vm2, %v1077_v38  ;;  %v1334_v54 = vsel %vm1099_vm2, %v1088_v47, 0  ;;  %v1080_v61 = vpack.c.bf16 %v1001_v57, %v1001_v57  ;;  %v1081_v62 = vpack.c.bf16 %v798_v58, %v798_v58  ;;  %v122_v57 = vld [vmem:[%s7201_s1 + $0x38] sm:$0xff] }
 0x2ca   :  { %5473 = vmatpush3.bf16.xpose.msra.mxu1 %v1288_v20  ;;  %5474 = vmatprep.mubr.msk.bf16.mxu1 %vm5920_vm1, %v5919_v15  ;;  %v1426_v63 = vsel %vm1099_vm2, %v1090_v59, 0  ;;  %v1082_v1 = vpack.c.bf16 %v1002_v0, %v1002_v0  ;;  %v121_v20 = vld [vmem:[%s7201_s1 + $0x30] sm:$0xff] }
 0x2cb   :  { %5484 = vmatprep.subr.bf16.mxu1 %v5919_v15 }
 0x2ce   :  { %5469 = vmatmul.mubr.msk.bf16.vlgmr.msra.gmra.mrb[8].mxu0 %vm1099_vm2, %v1078_v48 }
 0x2cf   :  { %5479 = vmatpush3.bf16.xpose.msra.mxu0 %v1334_v54  ;;  %5480 = vmatprep.mubr.msk.bf16.mxu0 %vm5920_vm1, %v5919_v15 }
 0x2d0   :  { %5490 = vmatprep.subr.bf16.mxu0 %v5919_v15 }
 0x2d1   :  { %5475 = vmatmul.mubr.msk.bf16.vlgmr.msra.gmra.mrb[8].mxu1 %vm1099_vm2, %v1079_v52 }
 0x2d2   :  { %5485 = vmatpush3.bf16.xpose.msra.mxu1 %v1380_v56  ;;  %5486 = vmatprep.mubr.msk.bf16.mxu1 %vm5920_vm1, %v5919_v15 }
 0x2d3   :  { %5496 = vmatprep.subr.bf16.mxu1 %v5919_v15 }
 0x2d6   :  { %5481 = vmatmul.mubr.msk.bf16.vlgmr.msra.gmra.mrb[12].mxu0 %vm1099_vm2, %v1080_v61 }
 0x2d7   :  { %5491 = vmatpush3.bf16.xpose.msra.mxu0 %v1426_v63  ;;  %5492 = vmatprep.mubr.msk.bf16.mxu0 %vm5920_vm1, %v5919_v15 }
 0x2d8   :  { %5502 = vmatprep.subr.bf16.mxu0 %v5919_v15 }
 0x2d9   :  { %5487 = vmatmul.mubr.msk.bf16.vlgmr.msra.gmra.mrb[12].mxu1 %vm1099_vm2, %v1081_v62 }
 0x2da   :  { %5498 = vmatprep.mubr.msk.bf16.mxu1 %vm5920_vm1, %v5919_v15 }
 0x2de   :  { %5493 = vmatmul.mubr.msk.bf16.vlgmr.msra.gmra.mrb[16].mxu0 %vm1099_vm2, %v1082_v1  ;;  %v6336_v1 = vpop.permute.xlu1 %241 }
 0x2df   :  { %5504 = vmatprep.mubr.msk.bf16.mxu0 %vm5920_vm1, %v5919_v15 }
 0x394   :  { %v1140_v3 = vpop.f32.mrb[0].mxu1 }
 0x395   :  { %v6288_v4 = vadd.f32 %v1140_v3, %v115_v2  ;;  %v5452_v7 = vpop.f32.mrb[1].mxu1  ;;  %v6338_v2 = vpop.permute.xlu0 %235 }
 0x396   :  { %v1143_v10 = vpop.f32.mrb[2].mxu1  ;;  %v6340_v3 = vpop.permute.xlu1 %237 }
 0x397   :  { %v5453_v11 = vpop.f32.mrb[3].mxu1  ;;  %v1468_v12 = vsel %vm1099_vm2, %v6288_v4, -inf }
 0x398   :  { %1469 = vmax.xlane.f32.xlu0 %v1468_v12 }
 0x399   :  { %v1186_v14 = vpop.f32.mrb[4].mxu0 }
 0x39a   :  { %v6298_v8 = vadd.f32 %v1186_v14, %v116_v13  ;;  %v5458_v9 = vpop.f32.mrb[5].mxu0  ;;  %v6343_v11 = vpop.permute.xlu1 %243 }
 0x39b   :  { %v1189_v18 = vpop.f32.mrb[6].mxu0 }
 0x39c   :  { %v1232_v17 = vpop.f32.mrb[4].mxu1  ;;  %v5459_v29 = vpop.f32.mrb[7].mxu0  ;;  %v1471_v30 = vsel %vm1099_vm2, %v6298_v8, -inf }
 0x39d   :  { %v6300_v23 = vadd.f32 %v1232_v17, %v117_v16  ;;  %v5464_v28 = vpop.f32.mrb[5].mxu1  ;;  %1472 = vmax.xlane.f32.xlu1 %v1471_v30 }
 0x39e   :  { %v1235_v24 = vpop.f32.mrb[6].mxu1 }
 0x39f   :  { %v5465_v25 = vpop.f32.mrb[7].mxu1  ;;  %v1474_v21 = vsel %vm1099_vm2, %v6300_v23, -inf }
 0x3a0   :  { %1475 = vmax.xlane.f32.xlu0 %v1474_v21 }
 0x3a1   :  { %v1278_v33 = vpop.f32.mrb[8].mxu0 }
 0x3a2   :  { %v6312_v26 = vadd.f32 %v1278_v33, %v118_v22  ;;  %v5470_v27 = vpop.f32.mrb[9].mxu0 }
 0x3a3   :  { %v1281_v37 = vpop.f32.mrb[10].mxu0 }
 0x3a4   :  { %v1324_v35 = vpop.f32.mrb[8].mxu1  ;;  %v5471_v41 = vpop.f32.mrb[11].mxu0  ;;  %v1477_v42 = vsel %vm1099_vm2, %v6312_v26, -inf }
 0x3a5   :  { %v6314_v38 = vadd.f32 %v1324_v35, %v119_v34  ;;  %v5476_v39 = vpop.f32.mrb[9].mxu1  ;;  %1478 = vmax.xlane.f32.xlu0 %v1477_v42 }
 0x3a6   :  { %v1327_v43 = vpop.f32.mrb[10].mxu1 }
 0x3a7   :  { %v5477_v5 = vpop.f32.mrb[11].mxu1  ;;  %v1480_v19 = vsel %vm1099_vm2, %v6314_v38, -inf }
 0x3a9   :  { %1481 = vmax.xlane.f32.xlu0 %v1480_v19  ;;  %v1370_v44 = vpop.f32.mrb[12].mxu0 }
 0x3aa   :  { %v1371_v45 = vadd.f32 %v1370_v44, %v120_v6  ;;  %v5482_v46 = vpop.f32.mrb[13].mxu0 }
 0x3ab   :  { %v1373_v48 = vpop.f32.mrb[14].mxu0 }
 0x3ac   :  { %v1416_v47 = vpop.f32.mrb[12].mxu1  ;;  %v5483_v51 = vpop.f32.mrb[15].mxu0  ;;  %v1483_v52 = vsel %vm1099_vm2, %v1371_v45, -inf }
 0x3ad   :  { %v1417_v49 = vadd.f32 %v1416_v47, %v121_v20  ;;  %v5488_v50 = vpop.f32.mrb[13].mxu1  ;;  %1484 = vmax.xlane.f32.xlu1 %v1483_v52 }
 0x3ae   :  { %v1419_v54 = vpop.f32.mrb[14].mxu1 }
 0x3af   :  { %v5489_v55 = vpop.f32.mrb[15].mxu1  ;;  %v1486_v56 = vsel %vm1099_vm2, %v1417_v49, -inf }
 0x3b0   :  { %1487 = vmax.xlane.f32.xlu0 %v1486_v56 }
 0x3b1   :  { %v1462_v58 = vpop.f32.mrb[16].mxu0 }
 0x3b2   :  { %v1463_v59 = vadd.f32 %v1462_v58, %v122_v57  ;;  %v5494_v61 = vpop.f32.mrb[17].mxu0 }
 0x3b3   :  { %v1465_v62 = vpop.f32.mrb[18].mxu0 }
 0x3b4   :  { %v5495_v63 = vpop.f32.mrb[19].mxu0  ;;  %v1489_v0 = vsel %vm1099_vm2, %v1463_v59, -inf }
 0x3b5   :  { %1490 = vmax.xlane.f32.xlu1 %v1489_v0 }
 0x3c6   :  { %247 = vrot.lane.b32.xlu0 %v6085_v36, %s7186_s22  ;;  %249 = vrot.lane.b32.xlu1 %v6091_v40, %s7186_s22 }
 0x425   :  { %v1470_v7 = vpop.xlane.xlu0 %1469 }
 0x426   :  { %v1492_v10 = vsub.f32 %v6288_v4, %v1470_v7 }
 0x428   :  { %v1500_v12 = vmul.f32 1.442695, %v1492_v10 }
 0x42a   :  { %5797 = vpow2.f32 %v1500_v12  ;;  %v1473_v13 = vpop.xlane.xlu1 %1472 }
 0x42b   :  { %v1493_v14 = vsub.f32 %v6298_v8, %v1473_v13 }
 0x42d   :  { %v1502_v16 = vmul.f32 1.442695, %v1493_v14  ;;  %v1476_v28 = vpop.xlane.xlu0 %1475 }
 0x42e   :  { %v1494_v29 = vsub.f32 %v6300_v23, %v1476_v28 }
 0x42f   :  { %5799 = vpow2.f32 %v1502_v16 }
 0x430   :  { %v1504_v25 = vmul.f32 1.442695, %v1494_v29 }
 0x432   :  { %v1479_v8 = vpop.xlane.xlu0 %1478  ;;  %5801 = vpow2.f32 %v1504_v25 }
 0x433   :  { %v1495_v22 = vsub.f32 %v6312_v26, %v1479_v8 }
 0x434   :  { %v6346_v9 = vpop.eup %5797 }
 0x435   :  { %v1516_v17 = vsel %vm1099_vm2, %v6346_v9, 0.0  ;;  %v1506_v37 = vmul.f32 1.442695, %v1495_v22 }
 0x436   :  { %1517 = vadd.xlane.f32.xlu0 %v1516_v17  ;;  %v1482_v30 = vpop.xlane.xlu0 %1481 }
 0x437   :  { %v1496_v21 = vsub.f32 %v6314_v38, %v1482_v30 }
 0x439   :  { %v6350_v18 = vpop.eup %5799  ;;  %v1508_v34 = vmul.f32 1.442695, %v1496_v21 }
 0x43a   :  { %v1519_v4 = vsel %vm1099_vm2, %v6350_v18, 0.0  ;;  %v1485_v24 = vpop.xlane.xlu1 %1484 }
 0x43b   :  { %1520 = vadd.xlane.f32.xlu1 %v1519_v4  ;;  %v1497_v27 = vsub.f32 %v1371_v45, %v1485_v24  ;;  %5803 = vpow2.f32 %v1508_v34 }
 0x43c   :  { %5805 = vpow2.f32 %v1506_v37  ;;  %v6361_v42 = vpop.eup %5801 }
 0x43d   :  { %v1488_v35 = vpop.xlane.xlu0 %1487  ;;  %v1522_v26 = vsel %vm1099_vm2, %v6361_v42, 0.0 }
 0x43e   :  { %v1498_v39 = vsub.f32 %v1417_v49, %v1488_v35 }
 0x440   :  { %v1512_v23 = vmul.f32 1.442695, %v1498_v39 }
 0x441   :  { %v248_v48 = vpop.permute.xlu0 %247 }
 0x442   :  { %v1491_v33 = vpop.xlane.xlu1 %1490  ;;  %v395_v51 = vcombine.low %v6338_v2, %v248_v48  ;;  %v396_v52 = vcombine.high %v6338_v2, %v248_v48 }
 0x444   :  { %v403_v58 = vrot.slane %v395_v51, %v6125_v53 }
 0x445   :  { %v6365_v38 = vpop.eup %5803 }
 0x446   :  { %v6367_v43 = vpop.eup %5805  ;;  %v1528_v5 = vsel %vm1099_vm2, %v6365_v38, 0.0  ;;  %v250_v50 = vpop.permute.xlu1 %249 }
 0x447   :  { %v1525_v19 = vsel %vm1099_vm2, %v6367_v43, 0.0  ;;  %v599_v2 = vcombine.low %v6340_v3, %v250_v50  ;;  %v600_v12 = vcombine.high %v6340_v3, %v250_v50 }
 0x449   :  { %v607_v3 = vrot.slane %v599_v2, %v6125_v53  ;;  %v614_v25 = vrot.slane %v600_v12, %v6125_v53 }
 0x44c   :  { %253 = vrot.lane.b32.xlu0 %v6085_v36, %s7181_s23  ;;  %255 = vrot.lane.b32.xlu1 %v6091_v40, %s7181_s23  ;;  %v1499_v36 = vsub.f32 %v1463_v59, %v1491_v33  ;;  %v1510_v40 = vmul.f32 1.442695, %v1497_v27  ;;  %v410_v59 = vrot.slane %v396_v52, %v6125_v53  ;;  %s7183_s23 = smov 24  }
 0x44e   :  { %v1514_v41 = vmul.f32 1.442695, %v1499_v36  ;;  %5807 = vpow2.f32 %v1510_v40 }
 0x450   :  { %5809 = vpow2.f32 %v1514_v41 }
 0x451   :  { %5811 = vpow2.f32 %v1512_v23 }
 0x458   :  { %v6371_v6 = vpop.eup %5807 }
 0x459   :  { %v1531_v44 = vsel %vm1099_vm2, %v6371_v6, 0.0 }
 0x45a   :  { %v6375_v20 = vpop.eup %5809 }
 0x45b   :  { %v6379_v45 = vpop.eup %5811  ;;  %v1537_v46 = vsel %vm1099_vm2, %v6375_v20, 0.0 }
 0x45c   :  { %v1534_v47 = vsel %vm1099_vm2, %v6379_v45, 0.0 }
 0x46b   :  { %1523 = vadd.xlane.f32.xlu0 %v1522_v26 }
 0x46f   :  { %1529 = vadd.xlane.f32.xlu0 %v1528_v5 }
 0x470   :  { %1526 = vadd.xlane.f32.xlu1 %v1525_v19 }
 0x473   :  { %1532 = vadd.xlane.f32.xlu0 %v1531_v44 }
 0x474   :  { %1538 = vadd.xlane.f32.xlu1 %v1537_v46 }
 0x477   :  { %1535 = vadd.xlane.f32.xlu0 %v1534_v47 }
 0x4c3   :  { %v1518_v49 = vpop.xlane.xlu0 %1517 }
 0x4c4   :  { %5813 = vrcp.f32 %v1518_v49 }
 0x4c7   :  { %v254_v54 = vpop.permute.xlu0 %253 }
 0x4c8   :  { %v411_v55 = vcombine.low %v6336_v1, %v254_v54  ;;  %v412_v56 = vcombine.high %v6336_v1, %v254_v54  ;;  %v1521_v57 = vpop.xlane.xlu1 %1520 }
 0x4c9   :  { %5815 = vrcp.f32 %v1521_v57 }
 0x4ca   :  { %v419_v61 = vrot.slane %v411_v55, %v6125_v53  ;;  %v426_v62 = vrot.slane %v412_v56, %v6125_v53 }
 0x4cc   :  { %v427_v63 = vcombine.low %v403_v58, %v419_v61  ;;  %v428_v0 = vcombine.high %v403_v58, %v419_v61  ;;  %v443_v7 = vcombine.low %v410_v59, %v426_v62  ;;  %v444_v10 = vcombine.high %v410_v59, %v426_v62  ;;  %v256_v13 = vpop.permute.xlu1 %255 }
 0x4cd   :  { %v615_v4 = vcombine.low %v6343_v11, %v256_v13  ;;  %v616_v28 = vcombine.high %v6343_v11, %v256_v13 }
 0x4ce   :  { %v435_v1 = vrot.slane %v427_v63, %v6127_v60  ;;  %v442_v14 = vrot.slane %v428_v0, %v6127_v60  ;;  %v451_v16 = vrot.slane %v443_v7, %v6127_v60  ;;  %v458_v17 = vrot.slane %v444_v10, %v6127_v60  ;;  %v5814_v47 = vpop.eup %5813 }
 0x4cf   :  { %v623_v21 = vrot.slane %v615_v4, %v6125_v53  ;;  %v630_v22 = vrot.slane %v616_v28, %v6125_v53  ;;  %v1548_v57 = vmul.f32 %v5814_v47, %v6346_v9 }
 0x4d0   :  { %v803_v8 = vcombine.low %v435_v1, %v442_v14  ;;  %v5194_v29 = vcombine.high %v435_v1, %v442_v14  ;;  %v819_v30 = vcombine.low %v451_v16, %v458_v17  ;;  %v5195_v24 = vcombine.high %v451_v16, %v458_v17 }
 0x4d1   :  { %v631_v35 = vcombine.low %v607_v3, %v623_v21  ;;  %v632_v37 = vcombine.high %v607_v3, %v623_v21  ;;  %v647_v36 = vcombine.low %v614_v25, %v630_v22  ;;  %v648_v39 = vcombine.high %v614_v25, %v630_v22 }
 0x4d2   :  { %v6406_v33 = vrot.slane %v803_v8, %v6125_v53  ;;  %v6409_v34 = vrot.slane %v5194_v29, %v6125_v53  ;;  %v6412_v11 = vrot.slane %v819_v30, %v6125_v53  ;;  %v6415_v27 = vrot.slane %v5195_v24, %v6125_v53 }
 0x4d3   :  { %v639_v23 = vrot.slane %v631_v35, %v6127_v60  ;;  %v646_v26 = vrot.slane %v632_v37, %v6127_v60  ;;  %v655_v5 = vrot.slane %v647_v36, %v6127_v60  ;;  %v662_v19 = vrot.slane %v648_v39, %v6127_v60  ;;  %v5816_v13 = vpop.eup %5815 }
 0x4d4   :  { %v835_v40 = vcombine.low %v6406_v33, %v6409_v34  ;;  %v851_v41 = vcombine.low %v6412_v11, %v6415_v27  ;;  %v1556_v2 = vpack.c.bf16 %v1548_v57, %v1548_v57  ;;  %v1549_v16 = vmul.f32 %v5816_v13, %v6350_v18 }
 0x4d5   :  { %v1007_v48 = vcombine.low %v639_v23, %v646_v26  ;;  %v5204_v49 = vcombine.high %v639_v23, %v646_v26  ;;  %v1023_v50 = vcombine.low %v655_v5, %v662_v19  ;;  %v5205_v51 = vcombine.high %v655_v5, %v662_v19 }
 0x4d6   :  { %v843_v44 = vrot.slane %v835_v40, %v6127_v60  ;;  %v859_v46 = vrot.slane %v851_v41, %v6127_v60  ;;  %v1557_v8 = vpack.c.bf16 %v1549_v16, %v1549_v16  ;;  %v836_v30 = vcombine.high %v6406_v33, %v6409_v34 }
 0x4d7   :  { %v1014_v55 = vrot.slane %v1007_v48, %v6125_v53  ;;  %v1022_v56 = vrot.slane %v5204_v49, %v6125_v53  ;;  %v1030_v58 = vrot.slane %v1023_v50, %v6125_v53  ;;  %v1038_v59 = vrot.slane %v5205_v51, %v6125_v53 }
 0x4d8   :  { %v867_v52 = vcombine.low %v843_v44, %v859_v46  ;;  %v868_v54 = vcombine.high %v843_v44, %v859_v46  ;;  %v852_v24 = vcombine.high %v6412_v11, %v6415_v27  ;;  %v850_v25 = vrot.slane %v836_v30, %v6127_v60 }
 0x4d9   :  { %v1039_v62 = vcombine.low %v1014_v55, %v1022_v56  ;;  %v1055_v7 = vcombine.low %v1030_v58, %v1038_v59  ;;  %v1040_v35 = vcombine.high %v1014_v55, %v1022_v56  ;;  %v1056_v37 = vcombine.high %v1030_v58, %v1038_v59 }
 0x4da   :  { %v1091_v61 = vpack.c.bf16 %v867_v52, %v867_v52  ;;  %v1093_v0 = vpack.c.bf16 %v868_v54, %v868_v54  ;;  %v866_v21 = vrot.slane %v852_v24, %v6127_v60 }
 0x4db   :  { %v1047_v10 = vrot.slane %v1039_v62, %v6127_v60  ;;  %v1063_v12 = vrot.slane %v1055_v7, %v6127_v60  ;;  %v1054_v40 = vrot.slane %v1040_v35, %v6127_v60  ;;  %v1070_v33 = vrot.slane %v1056_v37, %v6127_v60 }
 0x4dc   :  { %v1569_v63 = vsel %vm1567_vm3, %v1091_v61, 0  ;;  %v1661_v9 = vsel %vm1567_vm3, %v1093_v0, 0  ;;  %v869_v39 = vcombine.low %v850_v25, %v866_v21  ;;  %v870_v46 = vcombine.high %v850_v25, %v866_v21 }
 0x4dd   :  { %5497 = vmatpush3.bf16.msra.mxu1 %v1569_v63  ;;  %v1071_v1 = vcombine.low %v1047_v10, %v1063_v12  ;;  %v1072_v14 = vcombine.high %v1047_v10, %v1063_v12  ;;  %v1073_v26 = vcombine.low %v1054_v40, %v1070_v33  ;;  %v1074_v56 = vcombine.high %v1054_v40, %v1070_v33 }
 0x4de   :  { %5508 = vmatprep.subr.bf16.mxu1 %v5919_v15  ;;  %v1095_v41 = vpack.c.bf16 %v869_v39, %v869_v39  ;;  %v1097_v51 = vpack.c.bf16 %v870_v46, %v870_v46 }
 0x4df   :  { %v1092_v17 = vpack.c.bf16 %v1071_v1, %v1071_v1  ;;  %v1094_v28 = vpack.c.bf16 %v1072_v14, %v1072_v14  ;;  %v1096_v49 = vpack.c.bf16 %v1073_v26, %v1073_v26  ;;  %v1098_v59 = vpack.c.bf16 %v1074_v56, %v1074_v56 }
 0x4e0   :  { %5499 = vmatmul.mubr.msk.bf16.vlgmr.msra.gmra.mrb[16].mxu1 %vm1099_vm2, %v1556_v2  ;;  %v1753_v44 = vsel %vm1567_vm3, %v1095_v41, 0 }
 0x4e1   :  { %5509 = vmatpush3.bf16.msra.mxu1 %v1661_v9  ;;  %5510 = vmatprep.mubr.msk.bf16.mxu1 %vm5920_vm1, %v5919_v15  ;;  %v1615_v4 = vsel %vm1567_vm3, %v1092_v17, 0  ;;  %v1707_v29 = vsel %vm1567_vm3, %v1094_v28, 0  ;;  %v1799_v55 = vsel %vm1567_vm3, %v1096_v49, 0  ;;  %v1891_v63 = vsel %vm1567_vm3, %v1098_v59, 0 }
 0x4e2   :  { %5520 = vmatprep.subr.bf16.mxu1 %v5919_v15  ;;  %5503 = vmatpush3.bf16.msra.mxu0 %v1615_v4 }
 0x4e3   :  { %5514 = vmatprep.subr.bf16.mxu0 %v5919_v15 }
 0x4e5   :  { %5505 = vmatmul.mubr.msk.bf16.vlgmr.msra.gmra.mrb[20].mxu0 %vm1099_vm2, %v1557_v8 }
 0x4e6   :  { %5515 = vmatpush3.bf16.msra.mxu0 %v1707_v29  ;;  %5516 = vmatprep.mubr.msk.bf16.mxu0 %vm5920_vm1, %v5919_v15 }
 0x4e7   :  { %5526 = vmatprep.subr.bf16.mxu0 %v5919_v15 }
 0x4f8   :  { %v1524_v18 = vpop.xlane.xlu0 %1523 }
 0x4f9   :  { %5817 = vrcp.f32 %v1524_v18 }
 0x4fc   :  { %v1530_v3 = vpop.xlane.xlu0 %1529 }
 0x4fd   :  { %5819 = vrcp.f32 %v1530_v3  ;;  %v1527_v22 = vpop.xlane.xlu1 %1526 }
 0x4fe   :  { %5821 = vrcp.f32 %v1527_v22 }
 0x500   :  { %v1533_v36 = vpop.xlane.xlu0 %1532 }
 0x501   :  { %5823 = vrcp.f32 %v1533_v36  ;;  %v1539_v19 = vpop.xlane.xlu1 %1538 }
 0x503   :  { %v5818_v34 = vpop.eup %5817 }
 0x504   :  { %v1550_v11 = vmul.f32 %v5818_v34, %v6361_v42  ;;  %v1536_v27 = vpop.xlane.xlu0 %1535 }
 0x505   :  { %5825 = vrcp.f32 %v1536_v27 }
 0x506   :  { %v1558_v23 = vpack.c.bf16 %v1550_v11, %v1550_v11  ;;  %5827 = vrcp.f32 %v1539_v19 }
 0x507   :  { %v5820_v5 = vpop.eup %5819 }
 0x508   :  { %5511 = vmatmul.mubr.msk.bf16.vlgmr.msra.gmra.mrb[20].mxu1 %vm1099_vm2, %v1558_v23  ;;  %v5822_v47 = vpop.eup %5821  ;;  %v1552_v48 = vmul.f32 %v5820_v5, %v6365_v38 }
 0x509   :  { %5521 = vmatpush3.bf16.msra.mxu1 %v1753_v44  ;;  %5522 = vmatprep.mubr.msk.bf16.mxu1 %vm5920_vm1, %v5919_v15  ;;  %v1551_v42 = vmul.f32 %v5822_v47, %v6367_v43  ;;  %v1845_v43 = vsel %vm1567_vm3, %v1097_v51, 0 }
 0x50a   :  { %5532 = vmatprep.subr.bf16.mxu1 %v5919_v15  ;;  %v1560_v54 = vpack.c.bf16 %v1552_v48, %v1552_v48 }
 0x50b   :  { %v1559_v50 = vpack.c.bf16 %v1551_v42, %v1551_v42  ;;  %v5824_v52 = vpop.eup %5823 }
 0x50c   :  { %v1553_v38 = vmul.f32 %v5824_v52, %v6371_v6 }
 0x50d   :  { %5517 = vmatmul.mubr.msk.bf16.vlgmr.msra.gmra.mrb[24].mxu0 %vm1099_vm2, %v1559_v50 }
 0x50e   :  { %5527 = vmatpush3.bf16.msra.mxu0 %v1799_v55  ;;  %5528 = vmatprep.mubr.msk.bf16.mxu0 %vm5920_vm1, %v5919_v15  ;;  %v1561_v61 = vpack.c.bf16 %v1553_v38, %v1553_v38 }
 0x50f   :  { %v5826_v57 = vpop.eup %5825  ;;  %5538 = vmatprep.subr.bf16.mxu0 %v5919_v15 }
 0x510   :  { %5523 = vmatmul.mubr.msk.bf16.vlgmr.msra.gmra.mrb[24].mxu1 %vm1099_vm2, %v1560_v54  ;;  %v1554_v58 = vmul.f32 %v5826_v57, %v6379_v45  ;;  %v5828_v62 = vpop.eup %5827 }
 0x511   :  { %5533 = vmatpush3.bf16.msra.mxu1 %v1845_v43  ;;  %5534 = vmatprep.mubr.msk.bf16.mxu1 %vm5920_vm1, %v5919_v15  ;;  %v1555_v0 = vmul.f32 %v5828_v62, %v6375_v20 }
 0x512   :  { %5544 = vmatprep.subr.bf16.mxu1 %v5919_v15  ;;  %v1562_v6 = vpack.c.bf16 %v1554_v58, %v1554_v58 }
 0x513   :  { %v1563_v45 = vpack.c.bf16 %v1555_v0, %v1555_v0 }
 0x515   :  { %5529 = vmatmul.mubr.msk.bf16.vlgmr.msra.gmra.mrb[28].mxu0 %vm1099_vm2, %v1561_v61 }
 0x516   :  { %5539 = vmatpush3.bf16.msra.mxu0 %v1891_v63  ;;  %5540 = vmatprep.mubr.msk.bf16.mxu0 %vm5920_vm1, %v5919_v15 }
 0x517   :  { %5552 = vmatprep.subr.bf16.mxu0 %v5919_v15 }
 0x518   :  { %5535 = vmatmul.mubr.msk.bf16.vlgmr.msra.gmra.mrb[28].mxu1 %vm1099_vm2, %v1562_v6 }
 0x519   :  { %5548 = vmatprep.mubr.msk.bf16.mxu1 %vm5920_vm1, %v5919_v15 }
 0x51d   :  { %5541 = vmatmul.mubr.msk.bf16.vlgmr.msra.gmra.mrb[32].mxu0 %vm1099_vm2, %v1563_v45 }
 0x51e   :  { %5556 = vmatprep.mubr.msk.bf16.mxu0 %vm5920_vm1, %v5919_v15 }
 0x5b3   :  { %v1605_v7 = vpop.f32.mrb[16].mxu1 }
 0x5b4   :  { %v5500_v10 = vpop.f32.mrb[17].mxu1 }
 0x5b5   :  { %v1608_v2 = vpop.f32.mrb[18].mxu1 }
 0x5b6   :  { %v5501_v12 = vpop.f32.mrb[19].mxu1 }
 0x5b8   :  { %v1651_v13 = vpop.f32.mrb[20].mxu0 }
 0x5b9   :  { %v5506_v9 = vpop.f32.mrb[21].mxu0 }
 0x5ba   :  { %v1654_v20 = vpop.f32.mrb[22].mxu0 }
 0x5bb   :  { %v5507_v1 = vpop.f32.mrb[23].mxu0 }
 0x5db   :  { %v1697_v14 = vpop.f32.mrb[20].mxu1 }
 0x5dc   :  { %v5512_v16 = vpop.f32.mrb[21].mxu1 }
 0x5dd   :  { %v1700_v17 = vpop.f32.mrb[22].mxu1 }
 0x5de   :  { %v5513_v4 = vpop.f32.mrb[23].mxu1 }
 0x5e0   :  { %v1743_v28 = vpop.f32.mrb[24].mxu0 }
 0x5e1   :  { %v5518_v8 = vpop.f32.mrb[25].mxu0 }
 0x5e2   :  { %v1746_v18 = vpop.f32.mrb[26].mxu0 }
 0x5e3   :  { %v1789_v29 = vpop.f32.mrb[24].mxu1  ;;  %v5519_v25 = vpop.f32.mrb[27].mxu0 }
 0x5e4   :  { %v1933_v30 = vcombine.low %v1605_v7, %v1789_v29  ;;  %v1934_v24 = vcombine.high %v1605_v7, %v1789_v29  ;;  %v5524_v3 = vpop.f32.mrb[25].mxu1 }
 0x5e5   :  { %v1792_v21 = vpop.f32.mrb[26].mxu1 }
 0x5e6   :  { %v5525_v22 = vpop.f32.mrb[27].mxu1  ;;  %v1941_v26 = vrot.slane %v1933_v30, %v6125_v53  ;;  %v1948_v5 = vrot.slane %v1934_v24, %v6125_v53 }
 0x5e8   :  { %v1835_v35 = vpop.f32.mrb[28].mxu0 }
 0x5e9   :  { %v2001_v37 = vcombine.low %v1651_v13, %v1835_v35  ;;  %v2002_v36 = vcombine.high %v1651_v13, %v1835_v35  ;;  %v5530_v39 = vpop.f32.mrb[29].mxu0 }
 0x5ea   :  { %v1838_v33 = vpop.f32.mrb[30].mxu0 }
 0x5eb   :  { %v1881_v40 = vpop.f32.mrb[28].mxu1  ;;  %v5531_v41 = vpop.f32.mrb[31].mxu0  ;;  %v2009_v63 = vrot.slane %v2001_v37, %v6125_v53  ;;  %v2016_v0 = vrot.slane %v2002_v36, %v6125_v53 }
 0x5ec   :  { %v1949_v34 = vcombine.low %v1697_v14, %v1881_v40  ;;  %v1950_v11 = vcombine.high %v1697_v14, %v1881_v40  ;;  %v5536_v27 = vpop.f32.mrb[29].mxu1 }
 0x5ed   :  { %v1884_v23 = vpop.f32.mrb[30].mxu1 }
 0x5ee   :  { %v1957_v19 = vrot.slane %v1949_v34, %v6125_v53  ;;  %v1964_v44 = vrot.slane %v1950_v11, %v6125_v53  ;;  %v5537_v46 = vpop.f32.mrb[31].mxu1  ;;  %v5771_v11 = vld [vmem:[%s7159_s6] sm:$0xff]  }
 0x5ef   :  { %5545 = vmatpush3.bf16.msra.mxu1 %v5771_v11 }
 0x5f0   :  { %v1965_v47 = vcombine.low %v1941_v26, %v1957_v19  ;;  %v1966_v48 = vcombine.high %v1941_v26, %v1957_v19  ;;  %v1981_v42 = vcombine.low %v1948_v5, %v1964_v44  ;;  %v1982_v49 = vcombine.high %v1948_v5, %v1964_v44  ;;  %v1927_v50 = vpop.f32.mrb[32].mxu0  ;;  %5546 = vmatprep.subr.bf16.mxu1 %v5919_v15 }
 0x5f1   :  { %v5542_v56 = vpop.f32.mrb[33].mxu0  ;;  %v2017_v57 = vcombine.low %v1743_v28, %v1927_v50  ;;  %v2018_v38 = vcombine.high %v1743_v28, %v1927_v50  ;;  %v5772_v50 = vld [vmem:[%s7159_s6 + $0x8] sm:$0xff]  }
 0x5f2   :  { %v1973_v51 = vrot.slane %v1965_v47, %v6127_v60  ;;  %v1980_v52 = vrot.slane %v1966_v48, %v6127_v60  ;;  %v1989_v54 = vrot.slane %v1981_v42, %v6127_v60  ;;  %v1996_v55 = vrot.slane %v1982_v49, %v6127_v60  ;;  %v1930_v43 = vpop.f32.mrb[34].mxu0 }
 0x5f3   :  { %v5543_v6 = vpop.f32.mrb[35].mxu0  ;;  %v2025_v45 = vrot.slane %v2017_v57, %v6125_v53  ;;  %v2032_v7 = vrot.slane %v2018_v38, %v6125_v53  ;;  %5547 = vmatpush3.bf16.msra.mxu1 %v5772_v50 }
 0x5f4   :  { %v2069_v58 = vcombine.low %v1973_v51, %v1980_v52  ;;  %v5222_v59 = vcombine.high %v1973_v51, %v1980_v52  ;;  %v2085_v61 = vcombine.low %v1989_v54, %v1996_v55  ;;  %v5223_v62 = vcombine.high %v1989_v54, %v1996_v55  ;;  %5560 = vmatprep.subr.bf16.mxu1 %v5919_v15 }
 0x5f5   :  { %v2033_v9 = vcombine.low %v2009_v63, %v2025_v45  ;;  %v2034_v20 = vcombine.high %v2009_v63, %v2025_v45  ;;  %v2049_v1 = vcombine.low %v2016_v0, %v2032_v7  ;;  %v2050_v14 = vcombine.high %v2016_v0, %v2032_v7 }
 0x5f6   :  { %v2076_v10 = vrot.slane %v2069_v58, %v6125_v53  ;;  %v2084_v2 = vrot.slane %v5222_v59, %v6125_v53  ;;  %v2092_v12 = vrot.slane %v2085_v61, %v6125_v53  ;;  %v2100_v13 = vrot.slane %v5223_v62, %v6125_v53 }
 0x5f7   :  { %v2041_v8 = vrot.slane %v2033_v9, %v6127_v60  ;;  %v2048_v29 = vrot.slane %v2034_v20, %v6127_v60  ;;  %v2057_v18 = vrot.slane %v2049_v1, %v6127_v60  ;;  %v2064_v30 = vrot.slane %v2050_v14, %v6127_v60  ;;  %v5226_v1 = vld [vmem:[%s7160_s7] ss:$0 sm:$0xff] }
 0x5f8   :  { %v2102_v16 = vcombine.high %v2076_v10, %v2084_v2  ;;  %v2118_v17 = vcombine.high %v2092_v12, %v2100_v13  ;;  %v2101_v4 = vcombine.low %v2076_v10, %v2084_v2  ;;  %v2117_v28 = vcombine.low %v2092_v12, %v2100_v13 }
 0x5f9   :  { %v2137_v22 = vcombine.low %v2041_v8, %v2048_v29  ;;  %v5224_v35 = vcombine.high %v2041_v8, %v2048_v29  ;;  %v2153_v37 = vcombine.low %v2057_v18, %v2064_v30  ;;  %v5225_v36 = vcombine.high %v2057_v18, %v2064_v30 }
 0x5fa   :  { %v2116_v24 = vrot.slane %v2102_v16, %v6127_v60  ;;  %v2132_v3 = vrot.slane %v2118_v17, %v6127_v60  ;;  %v2109_v25 = vrot.slane %v2101_v4, %v6127_v60  ;;  %v2125_v21 = vrot.slane %v2117_v28, %v6127_v60 }
 0x5fb   :  { %v2144_v27 = vrot.slane %v2137_v22, %v6125_v53  ;;  %v2152_v41 = vrot.slane %v5224_v35, %v6125_v53  ;;  %v2160_v23 = vrot.slane %v2153_v37, %v6125_v53  ;;  %v2168_v26 = vrot.slane %v5225_v36, %v6125_v53 }
 0x5fc   :  { %v2135_v39 = vcombine.low %v2116_v24, %v2132_v3  ;;  %v2133_v40 = vcombine.low %v2109_v25, %v2125_v21  ;;  %v2134_v33 = vcombine.high %v2109_v25, %v2125_v21  ;;  %v2136_v34 = vcombine.high %v2116_v24, %v2132_v3 }
 0x5fd   :  { %v2170_v5 = vcombine.high %v2144_v27, %v2152_v41  ;;  %v2186_v19 = vcombine.high %v2160_v23, %v2168_v26  ;;  %v2169_v44 = vcombine.low %v2144_v27, %v2152_v41  ;;  %v2185_v46 = vcombine.low %v2160_v23, %v2168_v26 }
 0x5ff   :  { %v2184_v47 = vrot.slane %v2170_v5, %v6127_v60  ;;  %v2200_v48 = vrot.slane %v2186_v19, %v6127_v60  ;;  %v2177_v42 = vrot.slane %v2169_v44, %v6127_v60  ;;  %v2193_v49 = vrot.slane %v2185_v46, %v6127_v60  ;;  %v5230_v44 = vld [vmem:[%s7161_s8] ss:$0 sm:$0xff] }
 0x601   :  { %v2203_v51 = vcombine.low %v2184_v47, %v2200_v48  ;;  %v2202_v52 = vcombine.high %v2177_v42, %v2193_v49  ;;  %v2201_v54 = vcombine.low %v2177_v42, %v2193_v49  ;;  %v2204_v55 = vcombine.high %v2184_v47, %v2200_v48  ;;  %v5231_v42 = vld [vmem:[%s7162_s9] ss:$0 sm:$0xff] }
 0x603   :  { %v5744_v56 = vpack.i.bf16 %v2203_v51, %v2135_v39  ;;  %v5739_v57 = vpack.i.bf16 %v2202_v52, %v2134_v33  ;;  %v5749_v38 = vpack.i.bf16 %v2204_v55, %v2136_v34  ;;  %v5774_v33 = vld [vmem:[%s7163_s10 + $0x8] sm:$0xff]  }
 0x604   :  { %v5776_v55 = vld [vmem:[%s7165_s12 + $0x8] sm:$0xff]  }
 0x605   :  { %5745 = vrot.lane.b32.xlu1 %v5744_v56, %s7185_s29  ;;  %5740 = vrot.lane.b32.xlu0 %v5739_v57, %s7184_s30  ;;  %v5777_v56 = vld [vmem:[%s7165_s12 + $0x10] sm:$0xff]   ;;  %v5778_v57 = vld [vmem:[%s7165_s12 + $0x18] sm:$0xff]   ;;  %s7208_s29 = smov 16  }
 0x609   :  { %5750 = vrot.lane.b32.xlu1 %v5749_v38, %s7183_s23  ;;  %v5232_v38 = vld [vmem:[%s7164_s11] ss:$0 sm:$0xff] }
 0x677   :  { %v5746_v43 = vpop.permute.xlu1 %5745  ;;  %v5741_v58 = vpop.permute.xlu0 %5740 }
 0x678   :  { %v5743_v59 = vunpack.i.h.bf16 %v5741_v58  ;;  %v5742_v61 = vunpack.i.l.bf16 %v5741_v58  ;;  %v5748_v62 = vunpack.i.h.bf16 %v5746_v43  ;;  %v5747_v6 = vunpack.i.l.bf16 %v5746_v43 }
 0x67a   :  { %v2229_v63 = vsel %vm1099_vm2, %v2133_v40, %v5742_v61  ;;  %v2230_v0 = vsel %vm1099_vm2, %v2201_v54, %v5743_v59  ;;  %v5775_v54 = vld [vmem:[%s7165_s12] sm:$0xff]  }
 0x67b   :  { %v5751_v45 = vpop.permute.xlu1 %5750  ;;  %v2232_v2 = vsel %vm2231_vm4, %v2229_v63, %v5747_v6  ;;  %v2233_v12 = vsel %vm2231_vm4, %v2230_v0, %v5748_v62 }
 0x67c   :  { %v5753_v7 = vunpack.i.h.bf16 %v5751_v45  ;;  %v5752_v10 = vunpack.i.l.bf16 %v5751_v45 }
 0x67e   :  { %v2235_v13 = vsel %vm2234_vm5, %v2232_v2, %v5752_v10  ;;  %v2236_v9 = vsel %vm2234_vm5, %v2233_v12, %v5753_v7 }
 0x67f   :  { %v2237_v20 = vpack.c.bf16 %v2236_v9, %v2235_v13 }
 0x681   :  { %5549 = vmatmul.mubr.msk.bf16.vlgmr.msra.gmra.mrb[32].mxu1 %vm71_vm0, %v2237_v20 }
 0x682   :  { %5568 = vmatprep.mubr.msk.bf16.mxu1 %vm5920_vm1, %v5919_v15  ;;  %5561 = vmatpush3.bf16.msra.mxu1 %v5775_v54 }
 0x683   :  { %5562 = vmatprep.subr.bf16.mxu1 %v5919_v15 }
 0x686   :  { %5563 = vmatpush3.bf16.msra.mxu1 %v5776_v55 }
 0x687   :  { %5564 = vmatprep.subr.bf16.mxu1 %v5919_v15 }
 0x68a   :  { %5565 = vmatpush3.bf16.msra.mxu1 %v5777_v56 }
 0x68b   :  { %5566 = vmatprep.subr.bf16.mxu1 %v5919_v15 }
 0x68e   :  { %5567 = vmatpush3.bf16.msra.mxu1 %v5778_v57 }
 0x68f   :  { %5586 = vmatprep.subr.bf16.mxu1 %v5919_v15 }
 0x754   :  { %v2298_v14 = vpop.f32.mrb[32].mxu1 }
 0x755   :  { %v2299_v16 = vadd.f32 %v5226_v1, %v2298_v14  ;;  %v5550_v17 = vpop.f32.mrb[33].mxu1 }
 0x756   :  { %v2301_v4 = vpop.f32.mrb[34].mxu1 }
 0x757   :  { %v2302_v28 = vadd.f32 %v5226_v1, %v2301_v4  ;;  %v5551_v8 = vpop.f32.mrb[35].mxu1  ;;  %v2305_v29 = vadd.f32 %v2299_v16, %v6073_v31 }
 0x759   :  { %v2309_v18 = vsel %vm71_vm0, %v2305_v29, 0.0  ;;  %v2306_v30 = vadd.f32 %v2302_v28, %v6075_v32  ;;  %v5773_v32 = vld [vmem:[%s7163_s10] sm:$0xff]  }
 0x75a   :  { %2310 = vadd.xlane.f32.xlu1 %v2309_v18  ;;  %5553 = vmatpush3.bf16.msra.mxu0 %v5773_v32 }
 0x75b   :  { %v2312_v24 = vsel %vm71_vm0, %v2306_v30, 0.0  ;;  %5554 = vmatprep.subr.bf16.mxu0 %v5919_v15 }
 0x75c   :  { %2313 = vadd.xlane.f32.xlu0 %v2312_v24 }
 0x75e   :  { %5555 = vmatpush3.bf16.msra.mxu0 %v5774_v33 }
 0x75f   :  { %5572 = vmatprep.subr.bf16.mxu0 %v5919_v15 }
 0x7e7   :  { %v2311_v3 = vpop.xlane.xlu1 %2310 }
 0x7e8   :  { %v2315_v25 = vmul.f32 0.03125, %v2311_v3 }
 0x7e9   :  { %v2314_v21 = vpop.xlane.xlu0 %2313 }
 0x7ea   :  { %v2317_v22 = vsub.f32 %v2305_v29, %v2315_v25  ;;  %v2316_v35 = vmul.f32 0.03125, %v2314_v21 }
 0x7ec   :  { %v2318_v37 = vsub.f32 %v2306_v30, %v2316_v35  ;;  %v2319_v36 = vmul.f32 %v2317_v22, %v2317_v22  ;;  %v5236_v30 = vld [vmem:[%s7166_s13] ss:$0 sm:$0xff] }
 0x7ee   :  { %v2321_v39 = vsel %vm71_vm0, %v2319_v36, 0.0  ;;  %v2320_v40 = vmul.f32 %v2318_v37, %v2318_v37 }
 0x7ef   :  { %2322 = vadd.xlane.f32.xlu0 %v2321_v39 }
 0x7f0   :  { %v2324_v31 = vsel %vm71_vm0, %v2320_v40, 0.0 }
 0x7f3   :  { %2325 = vadd.xlane.f32.xlu0 %v2324_v31 }
 0x87c   :  { %v2323_v34 = vpop.xlane.xlu0 %2322 }
 0x87d   :  { %v2327_v11 = vmul.f32 0.03125, %v2323_v34 }
 0x87f   :  { %v2329_v27 = vadd.f32 1e-12, %v2327_v11 }
 0x880   :  { %v2326_v41 = vpop.xlane.xlu0 %2325 }
 0x881   :  { %5829 = vrsqrt.f32 %v2329_v27  ;;  %v2328_v23 = vmul.f32 0.03125, %v2326_v41 }
 0x883   :  { %v2330_v26 = vadd.f32 1e-12, %v2328_v23 }
 0x885   :  { %5831 = vrsqrt.f32 %v2330_v26 }
 0x88b   :  { %v5830_v5 = vpop.eup %5829 }
 0x88c   :  { %v2333_v19 = vmul.f32 %v5830_v5, %v2317_v22 }
 0x88e   :  { %v2341_v47 = vmul.f32 %v5230_v44, %v2333_v19  ;;  %v5779_v19 = vld [vmem:[%s7198_s26 + $0x10] sm:$0xff]  }
 0x88f   :  { %v5832_v46 = vpop.eup %5831 }
 0x890   :  { %v2334_v48 = vmul.f32 %v5832_v46, %v2318_v37  ;;  %v2349_v50 = vadd.f32 %v5231_v42, %v2341_v47 }
 0x892   :  { %v2342_v49 = vmul.f32 %v5230_v44, %v2334_v48  ;;  %v5780_v44 = vld [vmem:[%s7198_s26 + $0x18] sm:$0xff]   ;;  %s7209_s26 = smov 8  }
 0x894   :  { %v2350_v51 = vadd.f32 %v5231_v42, %v2342_v49 }
 0x896   :  { %v2351_v52 = vpack.c.bf16 %v2350_v51, %v2349_v50 }
 0x898   :  { %5557 = vmatmul.mubr.msk.bf16.vlgmr.msra.gmra.mrb[36].mxu0 %vm71_vm0, %v2351_v52  ;;  %v5242_v52 = vld [vmem:[%s7167_s14] ss:$0 sm:$0xff] }
 0x899   :  { %5576 = vmatprep.mubr.msk.bf16.mxu0 %vm5920_vm1, %v5919_v15  ;;  %5573 = vmatpush3.bf16.msra.mxu0 %v5779_v19 }
 0x89a   :  { %5574 = vmatprep.subr.bf16.mxu0 %v5919_v15 }
 0x89d   :  { %5575 = vmatpush3.bf16.msra.mxu0 %v5780_v44 }
 0x89e   :  { %5580 = vmatprep.subr.bf16.mxu0 %v5919_v15 }
 0x96b   :  { %v2412_v43 = vpop.f32.mrb[36].mxu0 }
 0x96c   :  { %v2413_v58 = vadd.f32 %v5232_v38, %v2412_v43  ;;  %v5558_v59 = vpop.f32.mrb[37].mxu0 }
 0x96d   :  { %v2415_v61 = vpop.f32.mrb[38].mxu0 }
 0x96e   :  { %v2421_v62 = vmul.f32 0.044715, %v2413_v58  ;;  %v2416_v6 = vadd.f32 %v5232_v38, %v2415_v61  ;;  %v5559_v63 = vpop.f32.mrb[39].mxu0  ;;  %v2419_v17 = vmul.f32 0.5, %v2413_v58  ;;  %v5243_v38 = vld [vmem:[%s7168_s15] ss:$0 sm:$0xff] }
 0x970   :  { %v2423_v0 = vmul.f32 %v2421_v62, %v2413_v58  ;;  %v2422_v45 = vmul.f32 0.044715, %v2416_v6  ;;  %v2420_v4 = vmul.f32 0.5, %v2416_v6  ;;  %v5249_v62 = vld [vmem:[%s7158_s5 + $0x1] ss:$0 sm:$0xff]  ;;  %s7202_s5 = smov 112  }
 0x972   :  { %v2425_v7 = vmul.f32 %v2423_v0, %v2413_v58  ;;  %v2424_v10 = vmul.f32 %v2422_v45, %v2416_v6 }
 0x974   :  { %v2427_v2 = vadd.f32 %v2425_v7, %v2413_v58  ;;  %v2426_v12 = vmul.f32 %v2424_v10, %v2416_v6 }
 0x976   :  { %v2429_v13 = vmul.f32 0.7978846, %v2427_v2  ;;  %v2428_v9 = vadd.f32 %v2426_v12, %v2416_v6 }
 0x978   :  { %5833 = vtanh.f32 %v2429_v13  ;;  %v2430_v20 = vmul.f32 0.7978846, %v2428_v9 }
 0x97a   :  { %5835 = vtanh.f32 %v2430_v20 }
 0x982   :  { %v5834_v1 = vpop.eup %5833 }
 0x983   :  { %v2433_v14 = vadd.f32 1.0, %v5834_v1 }
 0x984   :  { %v5836_v16 = vpop.eup %5835 }
 0x985   :  { %v2434_v28 = vadd.f32 1.0, %v5836_v16  ;;  %v2435_v8 = vmul.f32 %v2433_v14, %v2419_v17 }
 0x987   :  { %v2436_v29 = vmul.f32 %v2434_v28, %v2420_v4 }
 0x989   :  { %v2437_v18 = vpack.c.bf16 %v2436_v29, %v2435_v8 }
 0x98b   :  { %5569 = vmatmul.mubr.msk.bf16.vlgmr.msra.gmra.mrb[36].mxu1 %vm2477_vm6, %v2437_v18 }
 0x98c   :  { %5588 = vmatprep.mubr.msk.bf16.mxu1 %vm5920_vm1, %v5919_v15 }
 0xa5e   :  { %v2515_v24 = vpop.f32.mrb[36].mxu1 }
 0xa5f   :  { %v2516_v3 = vadd.f32 %v5236_v30, %v2515_v24  ;;  %v5570_v25 = vpop.f32.mrb[37].mxu1 }
 0xa60   :  { %v2518_v21 = vpop.f32.mrb[38].mxu1 }
 0xa61   :  { %v2519_v22 = vadd.f32 %v5236_v30, %v2518_v21  ;;  %v5571_v35 = vpop.f32.mrb[39].mxu1  ;;  %v2522_v37 = vadd.f32 %v2516_v3, %v2349_v50 }
 0xa63   :  { %v2526_v36 = vsel %vm71_vm0, %v2522_v37, 0.0  ;;  %v2523_v39 = vadd.f32 %v2519_v22, %v2350_v51 }
 0xa64   :  { %2527 = vadd.xlane.f32.xlu1 %v2526_v36 }
 0xa65   :  { %v2529_v40 = vsel %vm71_vm0, %v2523_v39, 0.0 }
 0xa66   :  { %2530 = vadd.xlane.f32.xlu0 %v2529_v40 }
 0xaf1   :  { %v2528_v31 = vpop.xlane.xlu1 %2527 }
 0xaf2   :  { %v2532_v32 = vmul.f32 0.03125, %v2528_v31 }
 0xaf3   :  { %v2531_v33 = vpop.xlane.xlu0 %2530 }
 0xaf4   :  { %v2534_v34 = vsub.f32 %v2522_v37, %v2532_v32  ;;  %v2533_v11 = vmul.f32 0.03125, %v2531_v33 }
 0xaf6   :  { %v2535_v27 = vsub.f32 %v2523_v39, %v2533_v11  ;;  %v2536_v41 = vmul.f32 %v2534_v34, %v2534_v34 }
 0xaf8   :  { %v2538_v23 = vsel %vm71_vm0, %v2536_v41, 0.0  ;;  %v2537_v26 = vmul.f32 %v2535_v27, %v2535_v27 }
 0xaf9   :  { %2539 = vadd.xlane.f32.xlu1 %v2538_v23 }
 0xafa   :  { %v2541_v5 = vsel %vm71_vm0, %v2537_v26, 0.0 }
 0xafb   :  { %2542 = vadd.xlane.f32.xlu0 %v2541_v5 }
 0xb86   :  { %v2540_v46 = vpop.xlane.xlu1 %2539 }
 0xb87   :  { %v2544_v47 = vmul.f32 0.03125, %v2540_v46 }
 0xb88   :  { %v2543_v48 = vpop.xlane.xlu0 %2542 }
 0xb89   :  { %v2546_v42 = vadd.f32 1e-12, %v2544_v47  ;;  %v2545_v49 = vmul.f32 0.03125, %v2543_v48 }
 0xb8b   :  { %5837 = vrsqrt.f32 %v2546_v42  ;;  %v2547_v50 = vadd.f32 1e-12, %v2545_v49 }
 0xb8d   :  { %5839 = vrsqrt.f32 %v2547_v50 }
 0xb95   :  { %v5838_v51 = vpop.eup %5837 }
 0xb96   :  { %v2550_v54 = vmul.f32 %v5838_v51, %v2534_v34 }
 0xb97   :  { %v5840_v55 = vpop.eup %5839 }
 0xb98   :  { %v2558_v56 = vmul.f32 %v5242_v52, %v2550_v54  ;;  %v2551_v57 = vmul.f32 %v5840_v55, %v2535_v27 }
 0xb9a   :  { %v2559_v43 = vmul.f32 %v5242_v52, %v2551_v57  ;;  %v6610_v58 = vadd.f32 %v5243_v38, %v2558_v56 }
 0xb9c   :  { %v6612_v59 = vadd.f32 %v5243_v38, %v2559_v43 }
 0xb9e   :  { %v2568_v61 = vpack.c.bf16 %v6612_v59, %v6610_v58 }
 0xba0   :  { %5577 = vmatmul.mubr.msk.bf16.vlgmr.msra.gmra.mrb[40].mxu0 %vm71_vm0, %v2568_v61 }
 0xba1   :  { %5582 = vmatprep.mubr.msk.bf16.mxu0 %vm5920_vm1, %v5919_v15 }
 0xc73   :  { %v2631_v6 = vpop.f32.mrb[40].mxu0 }
 0xc74   :  { %v6622_v63 = vadd.f32 %v5249_v62, %v2631_v6  ;;  %v5578_v0 = vpop.f32.mrb[41].mxu0 }
 0xc75   :  { %v2634_v45 = vpop.f32.mrb[42].mxu0 }
 0xc76   :  { %v6624_v7 = vadd.f32 %v5249_v62, %v2634_v45  ;;  %2658 = vrot.lane.b32.xlu1 %v6622_v63, %s5922_s2  ;;  %v5579_v10 = vpop.f32.mrb[43].mxu0 }
 0xc78   :  { %2660 = vrot.lane.b32.xlu0 %v6624_v7, %s5922_s2  ;;  %s7203_s2 = smov 104  }
 0xc7a   :  { %2664 = vrot.lane.b32.xlu1 %v6622_v63, %s5921_s24 }
 0xc7c   :  { %2672 = vrot.lane.b32.xlu0 %v6624_v7, %s5923_s25 }
 0xc7e   :  { %2670 = vrot.lane.b32.xlu1 %v6622_v63, %s5923_s25  ;;  %s7204_s25 = smov 64  }
 0xc80   :  { %2678 = vrot.lane.b32.xlu0 %v6624_v7, %s5924_s3 }
 0xc82   :  { %2676 = vrot.lane.b32.xlu1 %v6622_v63, %s5924_s3  ;;  %s7205_s3 = smov 56  }
 0xc84   :  { %2642 = vrot.lane.b32.xlu0 %v6624_v7, %s5925_s27 }
 0xc86   :  { %2640 = vrot.lane.b32.xlu1 %v6622_v63, %s5925_s27  ;;  %s7206_s27 = smov 48  }
 0xc88   :  { %2648 = vrot.lane.b32.xlu0 %v6624_v7, %s7202_s5 }
 0xc8a   :  { %2666 = vrot.lane.b32.xlu1 %v6624_v7, %s5921_s24 }
 0xc8c   :  { %2654 = vrot.lane.b32.xlu0 %v6624_v7, %s7203_s2 }
 0xc8e   :  { %2646 = vrot.lane.b32.xlu1 %v6622_v63, %s7202_s5 }
 0xc90   :  { %2684 = vrot.lane.b32.xlu0 %v6624_v7, %s7204_s25 }
 0xc92   :  { %2652 = vrot.lane.b32.xlu1 %v6622_v63, %s7203_s2 }
 0xc96   :  { %2682 = vrot.lane.b32.xlu1 %v6622_v63, %s7204_s25 }
 0xc9a   :  { %2688 = vrot.lane.b32.xlu1 %v6622_v63, %s7205_s3 }
 0xc9e   :  { %2690 = vrot.lane.b32.xlu1 %v6624_v7, %s7205_s3 }
 0xce8   :  { %v2659_v2 = vpop.permute.xlu1 %2658 }
 0xcea   :  { %v2661_v12 = vpop.permute.xlu0 %2660 }
 0xcec   :  { %v2665_v13 = vpop.permute.xlu1 %2664 }
 0xcee   :  { %v2673_v9 = vpop.permute.xlu0 %2672 }
 0xcef   :  { %v2942_v37 = vcombine.low %v2661_v12, %v2673_v9  ;;  %v2943_v36 = vcombine.high %v2661_v12, %v2673_v9 }
 0xcf0   :  { %v2671_v20 = vpop.permute.xlu1 %2670 }
 0xcf1   :  { %v2738_v14 = vcombine.low %v2659_v2, %v2671_v20  ;;  %v2739_v16 = vcombine.high %v2659_v2, %v2671_v20  ;;  %v2950_v19 = vrot.slane %v2942_v37, %v6125_v53  ;;  %v2957_v44 = vrot.slane %v2943_v36, %v6125_v53 }
 0xcf2   :  { %v2679_v1 = vpop.permute.xlu0 %2678 }
 0xcf3   :  { %v2746_v29 = vrot.slane %v2738_v14, %v6125_v53  ;;  %v2753_v18 = vrot.slane %v2739_v16, %v6125_v53 }
 0xcf4   :  { %v2677_v17 = vpop.permute.xlu1 %2676 }
 0xcf5   :  { %v2754_v4 = vcombine.low %v2665_v13, %v2677_v17  ;;  %v2755_v28 = vcombine.high %v2665_v13, %v2677_v17 }
 0xcf6   :  { %v2643_v8 = vpop.permute.xlu0 %2642 }
 0xcf7   :  { %v2762_v30 = vrot.slane %v2754_v4, %v6125_v53  ;;  %v2769_v24 = vrot.slane %v2755_v28, %v6125_v53 }
 0xcf8   :  { %v6666_v3 = vpop.permute.xlu1 %2640 }
 0xcf9   :  { %v2802_v25 = vcombine.low %v2746_v29, %v2762_v30  ;;  %v2803_v21 = vcombine.high %v2746_v29, %v2762_v30  ;;  %v2818_v22 = vcombine.low %v2753_v18, %v2769_v24  ;;  %v2819_v35 = vcombine.high %v2753_v18, %v2769_v24 }
 0xcfa   :  { %v2649_v39 = vpop.permute.xlu0 %2648 }
 0xcfb   :  { %v2810_v40 = vrot.slane %v2802_v25, %v6127_v60  ;;  %v2817_v31 = vrot.slane %v2803_v21, %v6127_v60  ;;  %v2826_v32 = vrot.slane %v2818_v22, %v6127_v60  ;;  %v2833_v33 = vrot.slane %v2819_v35, %v6127_v60 }
 0xcfc   :  { %v2910_v34 = vcombine.low %v6624_v7, %v2649_v39  ;;  %v2911_v11 = vcombine.high %v6624_v7, %v2649_v39  ;;  %v2667_v27 = vpop.permute.xlu1 %2666 }
 0xcfd   :  { %v5254_v41 = vcombine.low %v2810_v40, %v2817_v31  ;;  %v5256_v23 = vcombine.high %v2810_v40, %v2817_v31  ;;  %v5258_v26 = vcombine.low %v2826_v32, %v2833_v33  ;;  %v5260_v5 = vcombine.high %v2826_v32, %v2833_v33 }
 0xcfe   :  { %v2958_v46 = vcombine.low %v2667_v27, %v2679_v1  ;;  %v2959_v47 = vcombine.high %v2667_v27, %v2679_v1  ;;  %v2655_v48 = vpop.permute.xlu0 %2654  ;;  %v2918_v38 = vrot.slane %v2910_v34, %v6125_v53  ;;  %v2925_v43 = vrot.slane %v2911_v11, %v6125_v53 }
 0xcff   :  { %v6677_v42 = vrot.slane %v5254_v41, %v6125_v53  ;;  %v6680_v49 = vrot.slane %v5256_v23, %v6125_v53  ;;  %v6683_v50 = vrot.slane %v5258_v26, %v6125_v53  ;;  %v6686_v51 = vrot.slane %v5260_v5, %v6125_v53 }
 0xd00   :  { %v2966_v52 = vrot.slane %v2958_v46, %v6125_v53  ;;  %v2973_v54 = vrot.slane %v2959_v47, %v6125_v53  ;;  %v2926_v55 = vcombine.low %v2643_v8, %v2655_v48  ;;  %v2927_v56 = vcombine.high %v2643_v8, %v2655_v48  ;;  %v2647_v57 = vpop.permute.xlu1 %2646 }
 0xd01   :  { %v2706_v61 = vcombine.low %v6622_v63, %v2647_v57  ;;  %v2707_v62 = vcombine.high %v6622_v63, %v2647_v57  ;;  %v3194_v13 = vcombine.low %v6677_v42, %v6680_v49  ;;  %v3226_v9 = vcombine.low %v6683_v50, %v6686_v51 }
 0xd02   :  { %v3006_v6 = vcombine.low %v2950_v19, %v2966_v52  ;;  %v3007_v0 = vcombine.high %v2950_v19, %v2966_v52  ;;  %v3022_v45 = vcombine.low %v2957_v44, %v2973_v54  ;;  %v3023_v10 = vcombine.high %v2957_v44, %v2973_v54 }
 0xd03   :  { %v2934_v2 = vrot.slane %v2926_v55, %v6125_v53  ;;  %v2941_v12 = vrot.slane %v2927_v56, %v6125_v53  ;;  %v3202_v27 = vrot.slane %v3194_v13, %v6127_v60  ;;  %v3234_v41 = vrot.slane %v3226_v9, %v6127_v60 }
 0xd04   :  { %v3014_v20 = vrot.slane %v3006_v6, %v6127_v60  ;;  %v3021_v1 = vrot.slane %v3007_v0, %v6127_v60  ;;  %v3030_v14 = vrot.slane %v3022_v45, %v6127_v60  ;;  %v3037_v16 = vrot.slane %v3023_v10, %v6127_v60  ;;  %v2653_v37 = vpop.permute.xlu1 %2652 }
 0xd05   :  { %v2974_v17 = vcombine.low %v2918_v38, %v2934_v2  ;;  %v2975_v4 = vcombine.high %v2918_v38, %v2934_v2  ;;  %v2990_v28 = vcombine.low %v2925_v43, %v2941_v12  ;;  %v2991_v8 = vcombine.high %v2925_v43, %v2941_v12 }
 0xd06   :  { %v5264_v29 = vcombine.low %v3014_v20, %v3021_v1  ;;  %v5266_v18 = vcombine.high %v3014_v20, %v3021_v1  ;;  %v5268_v30 = vcombine.low %v3030_v14, %v3037_v16  ;;  %v5270_v24 = vcombine.high %v3030_v14, %v3037_v16 }
 0xd07   :  { %v2982_v25 = vrot.slane %v2974_v17, %v6127_v60  ;;  %v2989_v21 = vrot.slane %v2975_v4, %v6127_v60  ;;  %v2998_v22 = vrot.slane %v2990_v28, %v6127_v60  ;;  %v3005_v35 = vrot.slane %v2991_v8, %v6127_v60 }
 0xd08   :  { %v6709_v36 = vrot.slane %v5264_v29, %v6125_v53  ;;  %v6712_v39 = vrot.slane %v5266_v18, %v6125_v53  ;;  %v2722_v34 = vcombine.low %v6666_v3, %v2653_v37  ;;  %v2723_v11 = vcombine.high %v6666_v3, %v2653_v37 }
 0xd09   :  { %v5263_v40 = vcombine.low %v2982_v25, %v2989_v21  ;;  %v5265_v31 = vcombine.high %v2982_v25, %v2989_v21  ;;  %v5267_v32 = vcombine.low %v2998_v22, %v3005_v35  ;;  %v5269_v33 = vcombine.high %v2998_v22, %v3005_v35 }
 0xd0a   :  { %v3365_v23 = vrot.slane %v5268_v30, %v6125_v53  ;;  %v3381_v26 = vrot.slane %v5270_v24, %v6125_v53  ;;  %v2714_v5 = vrot.slane %v2706_v61, %v6125_v53  ;;  %v2721_v19 = vrot.slane %v2707_v62, %v6125_v53 }
 0xd0b   :  { %v2730_v44 = vrot.slane %v2722_v34, %v6125_v53  ;;  %v2737_v46 = vrot.slane %v2723_v11, %v6125_v53  ;;  %v3246_v47 = vcombine.low %v3202_v27, %v3234_v41  ;;  %v3398_v3 = vcombine.low %v6709_v36, %v6712_v39 }
 0xd0c   :  { %v6727_v48 = vrot.slane %v5263_v40, %v6125_v53  ;;  %v6730_v52 = vrot.slane %v5265_v31, %v6125_v53  ;;  %v6733_v54 = vrot.slane %v5267_v32, %v6125_v53  ;;  %v6736_v55 = vrot.slane %v5269_v33, %v6125_v53 }
 0xd0d   :  { %v2770_v56 = vcombine.low %v2714_v5, %v2730_v44  ;;  %v2771_v57 = vcombine.high %v2714_v5, %v2730_v44  ;;  %v2786_v38 = vcombine.low %v2721_v19, %v2737_v46  ;;  %v2787_v43 = vcombine.high %v2721_v19, %v2737_v46 }
 0xd0e   :  { %v3530_v61 = vpack.c.bf16 %v3246_v47, %v3246_v47  ;;  %v3406_v62 = vrot.slane %v3398_v3, %v6127_v60  ;;  %v3430_v6 = vcombine.low %v3365_v23, %v3381_v26  ;;  %v3382_v12 = vcombine.low %v6727_v48, %v6730_v52 }
 0xd0f   :  { %v2778_v0 = vrot.slane %v2770_v56, %v6127_v60  ;;  %v2785_v45 = vrot.slane %v2771_v57, %v6127_v60  ;;  %v2794_v10 = vrot.slane %v2786_v38, %v6127_v60  ;;  %v2801_v2 = vrot.slane %v2787_v43, %v6127_v60 }
 0xd10   :  { %v3414_v13 = vcombine.low %v6733_v54, %v6736_v55  ;;  %v3550_v9 = vsel %vm1099_vm2, %v3530_v61, 0  ;;  %v3438_v20 = vrot.slane %v3430_v6, %v6127_v60  ;;  %v3390_v24 = vrot.slane %v3382_v12, %v6127_v60 }
 0xd11   :  { %v5253_v1 = vcombine.low %v2778_v0, %v2785_v45  ;;  %v5255_v14 = vcombine.high %v2778_v0, %v2785_v45  ;;  %v5257_v16 = vcombine.low %v2794_v10, %v2801_v2  ;;  %v5259_v17 = vcombine.high %v2794_v10, %v2801_v2  ;;  %5581 = vmatpush3.bf16.xpose.msra.mxu0 %v3550_v9 }
 0xd12   :  { %v3450_v4 = vcombine.low %v3406_v62, %v3438_v20  ;;  %5592 = vmatprep.subr.bf16.mxu0 %v5919_v15  ;;  %v3422_v25 = vrot.slane %v3414_v13, %v6127_v60  ;;  %v3247_v35 = vcombine.high %v3202_v27, %v3234_v41  ;;  %v3451_v40 = vcombine.high %v3406_v62, %v3438_v20 }
 0xd13   :  { %v3122_v28 = vrot.slane %v5253_v1, %v6125_v53  ;;  %v3138_v8 = vrot.slane %v5255_v14, %v6125_v53  ;;  %v3154_v29 = vrot.slane %v5257_v16, %v6125_v53  ;;  %v3170_v18 = vrot.slane %v5259_v17, %v6125_v53 }
 0xd14   :  { %v3531_v30 = vpack.c.bf16 %v3450_v4, %v3450_v4  ;;  %v3195_v31 = vcombine.high %v6677_v42, %v6680_v49  ;;  %v3227_v34 = vcombine.high %v6683_v50, %v6686_v51  ;;  %v3399_v11 = vcombine.high %v6709_v36, %v6712_v39 }
 0xd15   :  { %v3178_v21 = vcombine.low %v3122_v28, %v3138_v8  ;;  %v3210_v22 = vcombine.low %v3154_v29, %v3170_v18  ;;  %v3446_v5 = vcombine.low %v3390_v24, %v3422_v25  ;;  %v3431_v27 = vcombine.high %v3365_v23, %v3381_v26 }
 0xd16   :  { %v3596_v37 = vsel %vm1099_vm2, %v3531_v30, 0  ;;  %v3532_v19 = vpack.c.bf16 %v3247_v35, %v3247_v35  ;;  %v3209_v44 = vrot.slane %v3195_v31, %v6127_v60  ;;  %v3241_v42 = vrot.slane %v3227_v34, %v6127_v60 }
 0xd17   :  { %5587 = vmatpush3.bf16.xpose.msra.mxu1 %v3596_v37  ;;  %v3186_v32 = vrot.slane %v3178_v21, %v6127_v60  ;;  %v3218_v33 = vrot.slane %v3210_v22, %v6127_v60  ;;  %v3533_v49 = vpack.c.bf16 %v3451_v40, %v3451_v40  ;;  %v3413_v46 = vrot.slane %v3399_v11, %v6127_v60  ;;  %v5888_v37 = vld [vmem:[%s7201_s1 + $0x8] sm:$0xff] }
 0xd18   :  { %5598 = vmatprep.subr.bf16.mxu1 %v5919_v15  ;;  %v3445_v47 = vrot.slane %v3431_v27, %v6127_v60  ;;  %v3523_v50 = vpack.c.bf16 %v3446_v5, %v3446_v5  ;;  %v3642_v51 = vsel %vm1099_vm2, %v3532_v19, 0  ;;  %v3248_v36 = vcombine.low %v3209_v44, %v3241_v42  ;;  %v5889_v19 = vld [vmem:[%s7201_s1 + $0x10] sm:$0xff] }
 0xd19   :  { %v3242_v41 = vcombine.low %v3186_v32, %v3218_v33  ;;  %v3688_v39 = vsel %vm1099_vm2, %v3533_v49, 0  ;;  %v3179_v26 = vcombine.high %v3122_v28, %v3138_v8  ;;  %v3211_v56 = vcombine.high %v3154_v29, %v3170_v18 }
 0xd1a   :  { %v3452_v23 = vcombine.low %v3413_v46, %v3445_v47  ;;  %v3243_v57 = vcombine.high %v3186_v32, %v3218_v33  ;;  %v3383_v38 = vcombine.high %v6727_v48, %v6730_v52  ;;  %v3415_v43 = vcombine.high %v6733_v54, %v6736_v55 }
 0xd1b   :  { %v3522_v3 = vpack.c.bf16 %v3242_v41, %v3242_v41  ;;  %v3447_v61 = vcombine.high %v3390_v24, %v3422_v25  ;;  %v3534_v62 = vpack.c.bf16 %v3248_v36, %v3248_v36  ;;  %v3193_v45 = vrot.slane %v3179_v26, %v6127_v60  ;;  %v5887_v25 = vld [vmem:[%s7201_s1] sm:$0xff] }
 0xd1c   :  { %v3535_v6 = vpack.c.bf16 %v3452_v23, %v3452_v23  ;;  %v3524_v0 = vpack.c.bf16 %v3243_v57, %v3243_v57  ;;  %v3225_v10 = vrot.slane %v3211_v56, %v6127_v60  ;;  %v3397_v48 = vrot.slane %v3383_v38, %v6127_v60  ;;  %v5891_v38 = vld [vmem:[%s7201_s1 + $0x20] sm:$0xff] }
 0xd1d   :  { %5583 = vmatmul.mubr.msk.bf16.vlgmr.msra.gmra.mrb[44].mxu0 %vm1099_vm2, %v3522_v3  ;;  %v3525_v2 = vpack.c.bf16 %v3447_v61, %v3447_v61  ;;  %v3429_v52 = vrot.slane %v3415_v43, %v6127_v60  ;;  %v3734_v54 = vsel %vm1099_vm2, %v3534_v62, 0  ;;  %v3249_v55 = vcombine.high %v3209_v44, %v3241_v42  ;;  %v5890_v3 = vld [vmem:[%s7201_s1 + $0x18] sm:$0xff]  ;;  %v5892_v62 = vld [vmem:[%s7201_s1 + $0x28] sm:$0xff] }
 0xd1e   :  { %5589 = vmatmul.mubr.msk.bf16.vlgmr.msra.gmra.mrb[40].mxu1 %vm1099_vm2, %v3523_v50  ;;  %5593 = vmatpush3.bf16.xpose.msra.mxu0 %v3642_v51  ;;  %v3780_v12 = vsel %vm1099_vm2, %v3535_v6, 0  ;;  %v3453_v13 = vcombine.high %v3413_v46, %v3445_v47  ;;  %v3244_v9 = vcombine.low %v3193_v45, %v3225_v10  ;;  %v3245_v8 = vcombine.high %v3193_v45, %v3225_v10 }
 0xd1f   :  { %5599 = vmatpush3.bf16.xpose.msra.mxu1 %v3688_v39  ;;  %5594 = vmatprep.mubr.msk.bf16.mxu0 %vm5920_vm1, %v5919_v15  ;;  %v3448_v20 = vcombine.low %v3397_v48, %v3429_v52  ;;  %v3536_v1 = vpack.c.bf16 %v3249_v55, %v3249_v55  ;;  %v3449_v29 = vcombine.high %v3397_v48, %v3429_v52 }
 0xd20   :  { %5600 = vmatprep.mubr.msk.bf16.mxu1 %vm5920_vm1, %v5919_v15  ;;  %5604 = vmatprep.subr.bf16.mxu0 %v5919_v15  ;;  %v3537_v14 = vpack.c.bf16 %v3453_v13, %v3453_v13  ;;  %v3526_v16 = vpack.c.bf16 %v3244_v9, %v3244_v9  ;;  %v3528_v18 = vpack.c.bf16 %v3245_v8, %v3245_v8 }
 0xd21   :  { %5610 = vmatprep.subr.bf16.mxu1 %v5919_v15  ;;  %v3527_v17 = vpack.c.bf16 %v3448_v20, %v3448_v20  ;;  %v3826_v4 = vsel %vm1099_vm2, %v3536_v1, 0  ;;  %v3529_v30 = vpack.c.bf16 %v3449_v29, %v3449_v29  ;;  %v5894_v1 = vld [vmem:[%s7201_s1 + $0x38] sm:$0xff] }
 0xd22   :  { %v3872_v28 = vsel %vm1099_vm2, %v3537_v14, 0 }
 0xd25   :  { %5595 = vmatmul.mubr.msk.bf16.vlgmr.msra.gmra.mrb[48].mxu0 %vm1099_vm2, %v3524_v0 }
 0xd26   :  { %5601 = vmatmul.mubr.msk.bf16.vlgmr.msra.gmra.mrb[44].mxu1 %vm1099_vm2, %v3525_v2  ;;  %5605 = vmatpush3.bf16.xpose.msra.mxu0 %v3734_v54 }
 0xd27   :  { %5611 = vmatpush3.bf16.xpose.msra.mxu1 %v3780_v12  ;;  %5606 = vmatprep.mubr.msk.bf16.mxu0 %vm5920_vm1, %v5919_v15  ;;  %v5893_v12 = vld [vmem:[%s7201_s1 + $0x30] sm:$0xff]  ;;  %s7207_s1 = smov 40  }
 0xd28   :  { %5612 = vmatprep.mubr.msk.bf16.mxu1 %vm5920_vm1, %v5919_v15  ;;  %5616 = vmatprep.subr.bf16.mxu0 %v5919_v15 }
 0xd29   :  { %5622 = vmatprep.subr.bf16.mxu1 %v5919_v15 }
 0xd2d   :  { %5607 = vmatmul.mubr.msk.bf16.vlgmr.msra.gmra.mrb[52].mxu0 %vm1099_vm2, %v3526_v16 }
 0xd2e   :  { %5613 = vmatmul.mubr.msk.bf16.vlgmr.msra.gmra.mrb[48].mxu1 %vm1099_vm2, %v3527_v17  ;;  %5617 = vmatpush3.bf16.xpose.msra.mxu0 %v3826_v4 }
 0xd2f   :  { %5623 = vmatpush3.bf16.xpose.msra.mxu1 %v3872_v28  ;;  %5618 = vmatprep.mubr.msk.bf16.mxu0 %vm5920_vm1, %v5919_v15 }
 0xd30   :  { %5624 = vmatprep.mubr.msk.bf16.mxu1 %vm5920_vm1, %v5919_v15  ;;  %5628 = vmatprep.subr.bf16.mxu0 %v5919_v15 }
 0xd31   :  { %5634 = vmatprep.subr.bf16.mxu1 %v5919_v15 }
 0xd35   :  { %5619 = vmatmul.mubr.msk.bf16.vlgmr.msra.gmra.mrb[56].mxu0 %vm1099_vm2, %v3528_v18 }
 0xd36   :  { %5625 = vmatmul.mubr.msk.bf16.vlgmr.msra.gmra.mrb[52].mxu1 %vm1099_vm2, %v3529_v30  ;;  %5630 = vmatprep.mubr.msk.bf16.mxu0 %vm5920_vm1, %v5919_v15  ;;  %v6868_v30 = vpop.permute.xlu1 %2682 }
 0xd37   :  { %5636 = vmatprep.mubr.msk.bf16.mxu1 %vm5920_vm1, %v5919_v15 }
 0xdf0   :  { %v3586_v24 = vpop.f32.mrb[44].mxu0 }
 0xdf1   :  { %v6817_v21 = vadd.f32 %v5887_v25, %v3586_v24  ;;  %v3632_v22 = vpop.f32.mrb[40].mxu1  ;;  %v5584_v35 = vpop.f32.mrb[45].mxu0 }
 0xdf2   :  { %v6822_v40 = vadd.f32 %v5888_v37, %v3632_v22  ;;  %v5590_v31 = vpop.f32.mrb[41].mxu1  ;;  %v3589_v32 = vpop.f32.mrb[46].mxu0 }
 0xdf3   :  { %v3635_v33 = vpop.f32.mrb[42].mxu1  ;;  %v5585_v34 = vpop.f32.mrb[47].mxu0  ;;  %v3914_v11 = vsel %vm1099_vm2, %v6817_v21, -inf }
 0xdf4   :  { %v5591_v5 = vpop.f32.mrb[43].mxu1  ;;  %v3917_v27 = vsel %vm1099_vm2, %v6822_v40, -inf  ;;  %3915 = vmax.xlane.f32.xlu1 %v3914_v11  ;;  %v6870_v24 = vpop.permute.xlu1 %2688 }
 0xdf5   :  { %3918 = vmax.xlane.f32.xlu0 %v3917_v27  ;;  %v6874_v22 = vpop.permute.xlu0 %2684 }
 0xdf8   :  { %v3678_v41 = vpop.f32.mrb[48].mxu0  ;;  %v6872_v25 = vpop.permute.xlu1 %2690 }
 0xdf9   :  { %v6831_v44 = vadd.f32 %v5889_v19, %v3678_v41  ;;  %v3724_v42 = vpop.f32.mrb[44].mxu1  ;;  %v5596_v49 = vpop.f32.mrb[49].mxu0 }
 0xdfa   :  { %v5602_v46 = vpop.f32.mrb[45].mxu1  ;;  %v3681_v47 = vpop.f32.mrb[50].mxu0  ;;  %v6836_v50 = vadd.f32 %v5890_v3, %v3724_v42 }
 0xdfb   :  { %v3727_v51 = vpop.f32.mrb[46].mxu1  ;;  %v5597_v36 = vpop.f32.mrb[51].mxu0  ;;  %v3920_v39 = vsel %vm1099_vm2, %v6831_v44, -inf }
 0xdfc   :  { %v5603_v23 = vpop.f32.mrb[47].mxu1  ;;  %3921 = vmax.xlane.f32.xlu0 %v3920_v39  ;;  %v3923_v26 = vsel %vm1099_vm2, %v6836_v50, -inf }
 0xe00   :  { %3924 = vmax.xlane.f32.xlu0 %v3923_v26  ;;  %v3770_v56 = vpop.f32.mrb[52].mxu0 }
 0xe01   :  { %v3816_v57 = vpop.f32.mrb[48].mxu1  ;;  %v6845_v43 = vadd.f32 %v5891_v38, %v3770_v56  ;;  %v5608_v61 = vpop.f32.mrb[53].mxu0 }
 0xe02   :  { %v6850_v6 = vadd.f32 %v5892_v62, %v3816_v57  ;;  %v5614_v0 = vpop.f32.mrb[49].mxu1  ;;  %v3773_v45 = vpop.f32.mrb[54].mxu0 }
 0xe03   :  { %v3819_v10 = vpop.f32.mrb[50].mxu1  ;;  %v5609_v2 = vpop.f32.mrb[55].mxu0  ;;  %v3926_v48 = vsel %vm1099_vm2, %v6845_v43, -inf }
 0xe04   :  { %v5615_v52 = vpop.f32.mrb[51].mxu1  ;;  %v3929_v54 = vsel %vm1099_vm2, %v6850_v6, -inf  ;;  %3927 = vmax.xlane.f32.xlu1 %v3926_v48 }
 0xe05   :  { %3930 = vmax.xlane.f32.xlu0 %v3929_v54 }
 0xe08   :  { %v3862_v55 = vpop.f32.mrb[56].mxu0 }
 0xe09   :  { %v3863_v13 = vadd.f32 %v5893_v12, %v3862_v55  ;;  %v3908_v9 = vpop.f32.mrb[52].mxu1  ;;  %v5620_v20 = vpop.f32.mrb[57].mxu0 }
 0xe0a   :  { %v3909_v14 = vadd.f32 %v5894_v1, %v3908_v9  ;;  %v5626_v16 = vpop.f32.mrb[53].mxu1  ;;  %v3865_v17 = vpop.f32.mrb[58].mxu0 }
 0xe0b   :  { %v3911_v4 = vpop.f32.mrb[54].mxu1  ;;  %v5621_v28 = vpop.f32.mrb[59].mxu0  ;;  %v3932_v8 = vsel %vm1099_vm2, %v3863_v13, -inf }
 0xe0c   :  { %v5627_v29 = vpop.f32.mrb[55].mxu1  ;;  %v3935_v18 = vsel %vm1099_vm2, %v3909_v14, -inf  ;;  %3933 = vmax.xlane.f32.xlu1 %v3932_v8 }
 0xe0d   :  { %3936 = vmax.xlane.f32.xlu0 %v3935_v18 }
 0xe1d   :  { %2694 = vrot.lane.b32.xlu1 %v6622_v63, %s7206_s27 }
 0xe23   :  { %2696 = vrot.lane.b32.xlu0 %v6624_v7, %s7206_s27 }
 0xe81   :  { %v3916_v35 = vpop.xlane.xlu1 %3915 }
 0xe82   :  { %v3919_v37 = vpop.xlane.xlu0 %3918  ;;  %v3938_v31 = vsub.f32 %v6817_v21, %v3916_v35 }
 0xe83   :  { %v3939_v32 = vsub.f32 %v6822_v40, %v3919_v37 }
 0xe84   :  { %v3946_v33 = vmul.f32 1.442695, %v3938_v31 }
 0xe85   :  { %v3948_v34 = vmul.f32 1.442695, %v3939_v32 }
 0xe86   :  { %5841 = vpow2.f32 %v3946_v33 }
 0xe87   :  { %5843 = vpow2.f32 %v3948_v34 }
 0xe89   :  { %v3922_v21 = vpop.xlane.xlu0 %3921 }
 0xe8a   :  { %v3940_v42 = vsub.f32 %v6831_v44, %v3922_v21 }
 0xe8c   :  { %v3950_v47 = vmul.f32 1.442695, %v3940_v42 }
 0xe8d   :  { %v3925_v19 = vpop.xlane.xlu0 %3924 }
 0xe8e   :  { %v3941_v49 = vsub.f32 %v6836_v50, %v3925_v19  ;;  %5845 = vpow2.f32 %v3950_v47 }
 0xe90   :  { %v6878_v11 = vpop.eup %5841  ;;  %v3952_v51 = vmul.f32 1.442695, %v3941_v49 }
 0xe91   :  { %v6880_v5 = vpop.eup %5843  ;;  %v3962_v27 = vsel %vm1099_vm2, %v6878_v11, 0.0  ;;  %v3928_v40 = vpop.xlane.xlu1 %3927 }
 0xe92   :  { %v3965_v41 = vsel %vm1099_vm2, %v6880_v5, 0.0  ;;  %3963 = vadd.xlane.f32.xlu1 %v3962_v27  ;;  %v3942_v36 = vsub.f32 %v6845_v43, %v3928_v40  ;;  %v3931_v39 = vpop.xlane.xlu0 %3930  ;;  %5847 = vpow2.f32 %v3952_v51 }
 0xe93   :  { %3966 = vadd.xlane.f32.xlu0 %v3965_v41 }
 0xe94   :  { %v3954_v26 = vmul.f32 1.442695, %v3942_v36 }
 0xe98   :  { %v6894_v57 = vpop.eup %5845 }
 0xe99   :  { %v3934_v46 = vpop.xlane.xlu1 %3933  ;;  %v3968_v43 = vsel %vm1099_vm2, %v6894_v57, 0.0 }
 0xe9a   :  { %v3944_v3 = vsub.f32 %v3863_v13, %v3934_v46 }
 0xe9c   :  { %v3958_v23 = vmul.f32 1.442695, %v3944_v3  ;;  %v6896_v38 = vpop.eup %5847 }
 0xe9d   :  { %v3971_v62 = vsel %vm1099_vm2, %v6896_v38, 0.0  ;;  %v2695_v54 = vpop.permute.xlu1 %2694 }
 0xe9e   :  { %5849 = vpow2.f32 %v3958_v23  ;;  %v2842_v9 = vcombine.low %v6868_v30, %v2695_v54  ;;  %v2843_v1 = vcombine.high %v6868_v30, %v2695_v54 }
 0xe9f   :  { %5851 = vpow2.f32 %v3954_v26 }
 0xea0   :  { %v2850_v8 = vrot.slane %v2842_v9, %v6125_v53  ;;  %v2857_v37 = vrot.slane %v2843_v1, %v6125_v53 }
 0xea3   :  { %2700 = vrot.lane.b32.xlu1 %v6622_v63, %s7207_s1  ;;  %v3943_v63 = vsub.f32 %v6850_v6, %v3931_v39 }
 0xea5   :  { %v3956_v56 = vmul.f32 1.442695, %v3943_v63 }
 0xea7   :  { %5853 = vpow2.f32 %v3956_v56 }
 0xea8   :  { %v6900_v61 = vpop.eup %5849 }
 0xea9   :  { %2702 = vrot.lane.b32.xlu0 %v6624_v7, %s7207_s1  ;;  %v3937_v7 = vpop.xlane.xlu0 %3936  ;;  %v6904_v6 = vpop.eup %5851  ;;  %v3980_v0 = vsel %vm1099_vm2, %v6900_v61, 0.0 }
 0xeaa   :  { %v3945_v44 = vsub.f32 %v3909_v14, %v3937_v7  ;;  %v3974_v45 = vsel %vm1099_vm2, %v6904_v6, 0.0 }
 0xeac   :  { %v3960_v50 = vmul.f32 1.442695, %v3945_v44 }
 0xead   :  { %v2697_v55 = vpop.permute.xlu0 %2696 }
 0xeae   :  { %5855 = vpow2.f32 %v3960_v50  ;;  %v3046_v20 = vcombine.low %v6874_v22, %v2697_v55  ;;  %v3047_v14 = vcombine.high %v6874_v22, %v2697_v55 }
 0xeb0   :  { %v3054_v35 = vrot.slane %v3046_v20, %v6125_v53  ;;  %v3061_v31 = vrot.slane %v3047_v14, %v6125_v53 }
 0xeb1   :  { %v6910_v10 = vpop.eup %5853 }
 0xeb2   :  { %v3977_v2 = vsel %vm1099_vm2, %v6910_v10, 0.0 }
 0xeb8   :  { %v6914_v48 = vpop.eup %5855 }
 0xeb9   :  { %v3983_v52 = vsel %vm1099_vm2, %v6914_v48, 0.0 }
 0xec7   :  { %3969 = vadd.xlane.f32.xlu1 %v3968_v43 }
 0xec8   :  { %3972 = vadd.xlane.f32.xlu0 %v3971_v62 }
 0xecb   :  { %3981 = vadd.xlane.f32.xlu1 %v3980_v0 }
 0xecc   :  { %3975 = vadd.xlane.f32.xlu0 %v3974_v45 }
 0xed0   :  { %3978 = vadd.xlane.f32.xlu0 %v3977_v2 }
 0xed4   :  { %3984 = vadd.xlane.f32.xlu0 %v3983_v52 }
 0xf1f   :  { %v3964_v12 = vpop.xlane.xlu1 %3963 }
 0xf20   :  { %v3967_v13 = vpop.xlane.xlu0 %3966  ;;  %5857 = vrcp.f32 %v3964_v12 }
 0xf21   :  { %5859 = vrcp.f32 %v3967_v13 }
 0xf23   :  { %v2701_v16 = vpop.permute.xlu1 %2700 }
 0xf24   :  { %v2703_v17 = vpop.permute.xlu0 %2702  ;;  %v2858_v4 = vcombine.low %v6870_v24, %v2701_v16  ;;  %v2859_v28 = vcombine.high %v6870_v24, %v2701_v16 }
 0xf25   :  { %v3062_v29 = vcombine.low %v6872_v25, %v2703_v17  ;;  %v3063_v18 = vcombine.high %v6872_v25, %v2703_v17 }
 0xf26   :  { %v2866_v30 = vrot.slane %v2858_v4, %v6125_v53  ;;  %v2873_v22 = vrot.slane %v2859_v28, %v6125_v53 }
 0xf27   :  { %v3070_v32 = vrot.slane %v3062_v29, %v6125_v53  ;;  %v3077_v24 = vrot.slane %v3063_v18, %v6125_v53 }
 0xf28   :  { %v2874_v33 = vcombine.low %v2850_v8, %v2866_v30  ;;  %v2875_v34 = vcombine.high %v2850_v8, %v2866_v30  ;;  %v2890_v27 = vcombine.low %v2857_v37, %v2873_v22  ;;  %v2891_v41 = vcombine.high %v2857_v37, %v2873_v22 }
 0xf29   :  { %v3078_v25 = vcombine.low %v3054_v35, %v3070_v32  ;;  %v3079_v21 = vcombine.high %v3054_v35, %v3070_v32  ;;  %v3094_v40 = vcombine.low %v3061_v31, %v3077_v24  ;;  %v3095_v19 = vcombine.high %v3061_v31, %v3077_v24 }
 0xf2a   :  { %v2882_v42 = vrot.slane %v2874_v33, %v6127_v60  ;;  %v2889_v49 = vrot.slane %v2875_v34, %v6127_v60  ;;  %v2898_v46 = vrot.slane %v2890_v27, %v6127_v60  ;;  %v2905_v47 = vrot.slane %v2891_v41, %v6127_v60  ;;  %v5858_v9 = vpop.eup %5857 }
 0xf2b   :  { %v3086_v3 = vrot.slane %v3078_v25, %v6127_v60  ;;  %v3093_v51 = vrot.slane %v3079_v21, %v6127_v60  ;;  %v3102_v36 = vrot.slane %v3094_v40, %v6127_v60  ;;  %v3109_v39 = vrot.slane %v3095_v19, %v6127_v60  ;;  %v5860_v8 = vpop.eup %5859 }
 0xf2c   :  { %v3250_v23 = vcombine.low %v2882_v42, %v2889_v49  ;;  %v5261_v63 = vcombine.high %v2882_v42, %v2889_v49  ;;  %v3266_v56 = vcombine.low %v2898_v46, %v2905_v47  ;;  %v5262_v44 = vcombine.high %v2898_v46, %v2905_v47 }
 0xf2d   :  { %v3454_v26 = vcombine.low %v3086_v3, %v3093_v51  ;;  %v5271_v7 = vcombine.high %v3086_v3, %v3093_v51  ;;  %v3470_v50 = vcombine.low %v3102_v36, %v3109_v39  ;;  %v5272_v43 = vcombine.high %v3102_v36, %v3109_v39 }
 0xf2e   :  { %v3257_v62 = vrot.slane %v3250_v23, %v6125_v53  ;;  %v3265_v0 = vrot.slane %v5261_v63, %v6125_v53  ;;  %v3273_v52 = vrot.slane %v3266_v56, %v6125_v53  ;;  %v3281_v54 = vrot.slane %v5262_v44, %v6125_v53 }
 0xf2f   :  { %v3461_v45 = vrot.slane %v3454_v26, %v6125_v53  ;;  %v3469_v2 = vrot.slane %v5271_v7, %v6125_v53  ;;  %v3477_v55 = vrot.slane %v3470_v50, %v6125_v53  ;;  %v3485_v12 = vrot.slane %v5272_v43, %v6125_v53 }
 0xf30   :  { %v3282_v13 = vcombine.low %v3257_v62, %v3265_v0  ;;  %v3298_v20 = vcombine.low %v3273_v52, %v3281_v54  ;;  %v3994_v30 = vmul.f32 %v5858_v9, %v6878_v11  ;;  %v3995_v31 = vmul.f32 %v5860_v8, %v6880_v5 }
 0xf31   :  { %v3486_v1 = vcombine.low %v3461_v45, %v3469_v2  ;;  %v3502_v16 = vcombine.low %v3477_v55, %v3485_v12  ;;  %v3283_v40 = vcombine.high %v3257_v62, %v3265_v0  ;;  %v3299_v19 = vcombine.high %v3273_v52, %v3281_v54 }
 0xf32   :  { %v3290_v14 = vrot.slane %v3282_v13, %v6127_v60  ;;  %v3306_v17 = vrot.slane %v3298_v20, %v6127_v60  ;;  %v4002_v41 = vpack.c.bf16 %v3994_v30, %v3994_v30  ;;  %v4003_v25 = vpack.c.bf16 %v3995_v31, %v3995_v31 }
 0xf33   :  { %v3494_v4 = vrot.slane %v3486_v1, %v6127_v60  ;;  %v3510_v28 = vrot.slane %v3502_v16, %v6127_v60  ;;  %v3487_v49 = vcombine.high %v3461_v45, %v3469_v2  ;;  %v3503_v46 = vcombine.high %v3477_v55, %v3485_v12 }
 0xf34   :  { %v3314_v29 = vcombine.low %v3290_v14, %v3306_v17  ;;  %v3315_v18 = vcombine.high %v3290_v14, %v3306_v17  ;;  %v3297_v47 = vrot.slane %v3283_v40, %v6127_v60  ;;  %v3313_v3 = vrot.slane %v3299_v19, %v6127_v60 }
 0xf35   :  { %v3518_v35 = vcombine.low %v3494_v4, %v3510_v28  ;;  %v3519_v37 = vcombine.high %v3494_v4, %v3510_v28  ;;  %v3501_v36 = vrot.slane %v3487_v49, %v6127_v60  ;;  %v3517_v39 = vrot.slane %v3503_v46, %v6127_v60 }
 0xf36   :  { %v3538_v22 = vpack.c.bf16 %v3314_v29, %v3314_v29  ;;  %v3540_v33 = vpack.c.bf16 %v3315_v18, %v3315_v18  ;;  %v3316_v23 = vcombine.low %v3297_v47, %v3313_v3  ;;  %v3317_v12 = vcombine.high %v3297_v47, %v3313_v3 }
 0xf37   :  { %v3539_v32 = vpack.c.bf16 %v3518_v35, %v3518_v35  ;;  %v3541_v27 = vpack.c.bf16 %v3519_v37, %v3519_v37  ;;  %v3520_v26 = vcombine.low %v3501_v36, %v3517_v39  ;;  %v3521_v13 = vcombine.high %v3501_v36, %v3517_v39 }
 0xf38   :  { %v4014_v24 = vsel %vm1567_vm3, %v3538_v22, 0  ;;  %v4106_v11 = vsel %vm1567_vm3, %v3540_v33, 0  ;;  %v3542_v43 = vpack.c.bf16 %v3316_v23, %v3316_v23  ;;  %v3544_v20 = vpack.c.bf16 %v3317_v12, %v3317_v12 }
 0xf39   :  { %5629 = vmatpush3.bf16.msra.mxu0 %v4014_v24  ;;  %v4060_v34 = vsel %vm1567_vm3, %v3539_v32, 0  ;;  %v4152_v5 = vsel %vm1567_vm3, %v3541_v27, 0  ;;  %v3543_v45 = vpack.c.bf16 %v3520_v26, %v3520_v26  ;;  %v3545_v14 = vpack.c.bf16 %v3521_v13, %v3521_v13 }
 0xf3a   :  { %5635 = vmatpush3.bf16.msra.mxu1 %v4060_v34  ;;  %5640 = vmatprep.subr.bf16.mxu0 %v5919_v15  ;;  %v4198_v55 = vsel %vm1567_vm3, %v3542_v43, 0  ;;  %v4290_v28 = vsel %vm1567_vm3, %v3544_v20, 0 }
 0xf3b   :  { %5646 = vmatprep.subr.bf16.mxu1 %v5919_v15  ;;  %v4336_v8 = vsel %vm1567_vm3, %v3545_v14, 0 }
 0xf3c   :  { %5631 = vmatmul.mubr.msk.bf16.vlgmr.msra.gmra.mrb[60].mxu0 %vm1099_vm2, %v4002_v41 }
 0xf3d   :  { %5637 = vmatmul.mubr.msk.bf16.vlgmr.msra.gmra.mrb[56].mxu1 %vm1099_vm2, %v4003_v25  ;;  %5641 = vmatpush3.bf16.msra.mxu0 %v4106_v11 }
 0xf3e   :  { %5647 = vmatpush3.bf16.msra.mxu1 %v4152_v5  ;;  %5642 = vmatprep.mubr.msk.bf16.mxu0 %vm5920_vm1, %v5919_v15 }
 0xf3f   :  { %5648 = vmatprep.mubr.msk.bf16.mxu1 %vm5920_vm1, %v5919_v15  ;;  %5652 = vmatprep.subr.bf16.mxu0 %v5919_v15 }
 0xf40   :  { %5658 = vmatprep.subr.bf16.mxu1 %v5919_v15 }
 0xf54   :  { %v3970_v21 = vpop.xlane.xlu1 %3969 }
 0xf55   :  { %v3973_v42 = vpop.xlane.xlu0 %3972  ;;  %5861 = vrcp.f32 %v3970_v21 }
 0xf56   :  { %5863 = vrcp.f32 %v3973_v42 }
 0xf58   :  { %v3982_v7 = vpop.xlane.xlu1 %3981 }
 0xf59   :  { %v3976_v51 = vpop.xlane.xlu0 %3975 }
 0xf5a   :  { %5865 = vrcp.f32 %v3976_v51 }
 0xf5d   :  { %v3979_v63 = vpop.xlane.xlu0 %3978 }
 0xf5e   :  { %5867 = vrcp.f32 %v3979_v63 }
 0xf5f   :  { %v5862_v56 = vpop.eup %5861  ;;  %5869 = vrcp.f32 %v3982_v7 }
 0xf60   :  { %v5864_v44 = vpop.eup %5863  ;;  %v3996_v50 = vmul.f32 %v5862_v56, %v6894_v57  ;;  %v4244_v57 = vsel %vm1567_vm3, %v3543_v45, 0 }
 0xf61   :  { %v3997_v62 = vmul.f32 %v5864_v44, %v6896_v38  ;;  %v3985_v0 = vpop.xlane.xlu0 %3984 }
 0xf62   :  { %5871 = vrcp.f32 %v3985_v0  ;;  %v4004_v2 = vpack.c.bf16 %v3996_v50, %v3996_v50 }
 0xf63   :  { %v4005_v52 = vpack.c.bf16 %v3997_v62, %v3997_v62 }
 0xf64   :  { %v5866_v54 = vpop.eup %5865  ;;  %5643 = vmatmul.mubr.msk.bf16.vlgmr.msra.gmra.mrb[64].mxu0 %vm1099_vm2, %v4004_v2 }
 0xf65   :  { %5649 = vmatmul.mubr.msk.bf16.vlgmr.msra.gmra.mrb[60].mxu1 %vm1099_vm2, %v4005_v52  ;;  %5653 = vmatpush3.bf16.msra.mxu0 %v4198_v55  ;;  %v3998_v38 = vmul.f32 %v5866_v54, %v6904_v6 }
 0xf66   :  { %5659 = vmatpush3.bf16.msra.mxu1 %v4244_v57  ;;  %5654 = vmatprep.mubr.msk.bf16.mxu0 %vm5920_vm1, %v5919_v15 }
 0xf67   :  { %5660 = vmatprep.mubr.msk.bf16.mxu1 %vm5920_vm1, %v5919_v15  ;;  %5664 = vmatprep.subr.bf16.mxu0 %v5919_v15  ;;  %v4006_v16 = vpack.c.bf16 %v3998_v38, %v3998_v38 }
 0xf68   :  { %v5868_v9 = vpop.eup %5867  ;;  %5670 = vmatprep.subr.bf16.mxu1 %v5919_v15 }
 0xf69   :  { %v3999_v1 = vmul.f32 %v5868_v9, %v6910_v10  ;;  %v5870_v17 = vpop.eup %5869 }
 0xf6a   :  { %v4000_v29 = vmul.f32 %v5870_v17, %v6900_v61 }
 0xf6b   :  { %v4007_v4 = vpack.c.bf16 %v3999_v1, %v3999_v1 }
 0xf6c   :  { %v5872_v6 = vpop.eup %5871  ;;  %5655 = vmatmul.mubr.msk.bf16.vlgmr.msra.gmra.mrb[68].mxu0 %vm1099_vm2, %v4006_v16  ;;  %v4008_v18 = vpack.c.bf16 %v4000_v29, %v4000_v29 }
 0xf6d   :  { %5661 = vmatmul.mubr.msk.bf16.vlgmr.msra.gmra.mrb[64].mxu1 %vm1099_vm2, %v4007_v4  ;;  %5665 = vmatpush3.bf16.msra.mxu0 %v4290_v28  ;;  %v4001_v10 = vmul.f32 %v5872_v6, %v6914_v48 }
 0xf6e   :  { %5671 = vmatpush3.bf16.msra.mxu1 %v4336_v8  ;;  %5666 = vmatprep.mubr.msk.bf16.mxu0 %vm5920_vm1, %v5919_v15 }
 0xf6f   :  { %5672 = vmatprep.mubr.msk.bf16.mxu1 %vm5920_vm1, %v5919_v15  ;;  %5676 = vmatprep.subr.bf16.mxu0 %v5919_v15  ;;  %v4009_v35 = vpack.c.bf16 %v4001_v10, %v4001_v10 }
 0xf70   :  { %5684 = vmatprep.subr.bf16.mxu1 %v5919_v15 }
 0xf74   :  { %5667 = vmatmul.mubr.msk.bf16.vlgmr.msra.gmra.mrb[72].mxu0 %vm1099_vm2, %v4008_v18 }
 0xf75   :  { %5673 = vmatmul.mubr.msk.bf16.vlgmr.msra.gmra.mrb[68].mxu1 %vm1099_vm2, %v4009_v35  ;;  %5680 = vmatprep.mubr.msk.bf16.mxu0 %vm5920_vm1, %v5919_v15 }
 0xf76   :  { %5688 = vmatprep.mubr.msk.bf16.mxu1 %vm5920_vm1, %v5919_v15 }
0x100f   :  { %v4050_v61 = vpop.f32.mrb[60].mxu0 }
0x1010   :  { %v4096_v48 = vpop.f32.mrb[56].mxu1  ;;  %v5632_v37 = vpop.f32.mrb[61].mxu0 }
0x1011   :  { %v5638_v30 = vpop.f32.mrb[57].mxu1  ;;  %v4053_v22 = vpop.f32.mrb[62].mxu0 }
0x1012   :  { %v4099_v31 = vpop.f32.mrb[58].mxu1  ;;  %v5633_v32 = vpop.f32.mrb[63].mxu0 }
0x1013   :  { %v5639_v24 = vpop.f32.mrb[59].mxu1 }
0x1037   :  { %v4142_v33 = vpop.f32.mrb[64].mxu0 }
0x1038   :  { %v4188_v34 = vpop.f32.mrb[60].mxu1  ;;  %v5644_v27 = vpop.f32.mrb[65].mxu0 }
0x1039   :  { %v5650_v41 = vpop.f32.mrb[61].mxu1  ;;  %v4145_v25 = vpop.f32.mrb[66].mxu0 }
0x103a   :  { %v4191_v11 = vpop.f32.mrb[62].mxu1  ;;  %v5645_v5 = vpop.f32.mrb[67].mxu0 }
0x103b   :  { %v5651_v21 = vpop.f32.mrb[63].mxu1 }
0x103f   :  { %v4234_v40 = vpop.f32.mrb[68].mxu0 }
0x1040   :  { %v4378_v19 = vcombine.low %v4050_v61, %v4234_v40  ;;  %v4379_v42 = vcombine.high %v4050_v61, %v4234_v40  ;;  %v4280_v49 = vpop.f32.mrb[64].mxu1  ;;  %v5656_v46 = vpop.f32.mrb[69].mxu0 }
0x1041   :  { %v4446_v47 = vcombine.low %v4096_v48, %v4280_v49  ;;  %v4447_v3 = vcombine.high %v4096_v48, %v4280_v49  ;;  %v5662_v51 = vpop.f32.mrb[65].mxu1  ;;  %v4237_v36 = vpop.f32.mrb[70].mxu0 }
0x1042   :  { %v4283_v39 = vpop.f32.mrb[66].mxu1  ;;  %v5657_v23 = vpop.f32.mrb[71].mxu0  ;;  %v4386_v2 = vrot.slane %v4378_v19, %v6125_v53  ;;  %v4393_v52 = vrot.slane %v4379_v42, %v6125_v53  ;;  %v5781_v19 = vld [vmem:[%s7159_s6 + $0x10] sm:$0xff]  }
0x1043   :  { %v5663_v63 = vpop.f32.mrb[67].mxu1  ;;  %v4454_v13 = vrot.slane %v4446_v47, %v6125_v53  ;;  %v4461_v38 = vrot.slane %v4447_v3, %v6125_v53  ;;  %5677 = vmatpush3.bf16.msra.mxu0 %v5781_v19 }
0x1044   :  { %5678 = vmatprep.subr.bf16.mxu0 %v5919_v15 }
0x1047   :  { %v4326_v26 = vpop.f32.mrb[72].mxu0 }
0x1048   :  { %v4394_v7 = vcombine.low %v4142_v33, %v4326_v26  ;;  %v4395_v56 = vcombine.high %v4142_v33, %v4326_v26  ;;  %v4372_v44 = vpop.f32.mrb[68].mxu1  ;;  %v5668_v50 = vpop.f32.mrb[73].mxu0 }
0x1049   :  { %v4462_v43 = vcombine.low %v4188_v34, %v4372_v44  ;;  %v4463_v62 = vcombine.high %v4188_v34, %v4372_v44  ;;  %v5674_v0 = vpop.f32.mrb[69].mxu1  ;;  %v4329_v45 = vpop.f32.mrb[74].mxu0 }
0x104a   :  { %v4402_v54 = vrot.slane %v4394_v7, %v6125_v53  ;;  %v4409_v55 = vrot.slane %v4395_v56, %v6125_v53  ;;  %v4375_v12 = vpop.f32.mrb[70].mxu1  ;;  %v5669_v57 = vpop.f32.mrb[75].mxu0 }
0x104b   :  { %v4470_v9 = vrot.slane %v4462_v43, %v6125_v53  ;;  %v4477_v20 = vrot.slane %v4463_v62, %v6125_v53  ;;  %v5675_v1 = vpop.f32.mrb[71].mxu1 }
0x104c   :  { %v4410_v14 = vcombine.low %v4386_v2, %v4402_v54  ;;  %v4411_v16 = vcombine.high %v4386_v2, %v4402_v54  ;;  %v4426_v17 = vcombine.low %v4393_v52, %v4409_v55  ;;  %v4427_v4 = vcombine.high %v4393_v52, %v4409_v55  ;;  %v5782_v2 = vld [vmem:[%s7159_s6 + $0x18] sm:$0xff]  }
0x104d   :  { %v4478_v6 = vcombine.low %v4454_v13, %v4470_v9  ;;  %v4479_v28 = vcombine.high %v4454_v13, %v4470_v9  ;;  %v4494_v8 = vcombine.low %v4461_v38, %v4477_v20  ;;  %v4495_v29 = vcombine.high %v4461_v38, %v4477_v20  ;;  %5679 = vmatpush3.bf16.msra.mxu0 %v5782_v2  ;;  %v5305_v2 = vld [vmem:[%s7162_s9 + $0x1] ss:$0 sm:$0xff] }
0x104e   :  { %v4418_v10 = vrot.slane %v4410_v14, %v6127_v60  ;;  %v4425_v18 = vrot.slane %v4411_v16, %v6127_v60  ;;  %v4434_v35 = vrot.slane %v4426_v17, %v6127_v60  ;;  %v4441_v61 = vrot.slane %v4427_v4, %v6127_v60  ;;  %5692 = vmatprep.subr.bf16.mxu0 %v5919_v15 }
0x104f   :  { %v4486_v48 = vrot.slane %v4478_v6, %v6127_v60  ;;  %v4493_v37 = vrot.slane %v4479_v28, %v6127_v60  ;;  %v4502_v30 = vrot.slane %v4494_v8, %v6127_v60  ;;  %v4509_v22 = vrot.slane %v4495_v29, %v6127_v60 }
0x1050   :  { %v4514_v31 = vcombine.low %v4418_v10, %v4425_v18  ;;  %v5289_v32 = vcombine.high %v4418_v10, %v4425_v18  ;;  %v4530_v24 = vcombine.low %v4434_v35, %v4441_v61  ;;  %v5290_v33 = vcombine.high %v4434_v35, %v4441_v61 }
0x1051   :  { %v4582_v34 = vcombine.low %v4486_v48, %v4493_v37  ;;  %v5291_v27 = vcombine.high %v4486_v48, %v4493_v37  ;;  %v4598_v41 = vcombine.low %v4502_v30, %v4509_v22  ;;  %v5292_v25 = vcombine.high %v4502_v30, %v4509_v22 }
0x1052   :  { %v4521_v11 = vrot.slane %v4514_v31, %v6125_v53  ;;  %v4529_v5 = vrot.slane %v5289_v32, %v6125_v53  ;;  %v4537_v21 = vrot.slane %v4530_v24, %v6125_v53  ;;  %v4545_v40 = vrot.slane %v5290_v33, %v6125_v53  ;;  %v5298_v31 = vld [vmem:[%s7160_s7 + $0x1] ss:$0 sm:$0xff] }
0x1053   :  { %v4589_v42 = vrot.slane %v4582_v34, %v6125_v53  ;;  %v4597_v49 = vrot.slane %v5291_v27, %v6125_v53  ;;  %v4605_v46 = vrot.slane %v4598_v41, %v6125_v53  ;;  %v4613_v47 = vrot.slane %v5292_v25, %v6125_v53 }
0x1054   :  { %v4547_v3 = vcombine.high %v4521_v11, %v4529_v5  ;;  %v4563_v51 = vcombine.high %v4537_v21, %v4545_v40  ;;  %v4546_v36 = vcombine.low %v4521_v11, %v4529_v5  ;;  %v4562_v39 = vcombine.low %v4537_v21, %v4545_v40 }
0x1055   :  { %v4615_v23 = vcombine.high %v4589_v42, %v4597_v49  ;;  %v4631_v63 = vcombine.high %v4605_v46, %v4613_v47  ;;  %v4614_v26 = vcombine.low %v4589_v42, %v4597_v49  ;;  %v4630_v7 = vcombine.low %v4605_v46, %v4613_v47 }
0x1056   :  { %v4561_v56 = vrot.slane %v4547_v3, %v6127_v60  ;;  %v4577_v44 = vrot.slane %v4563_v51, %v6127_v60  ;;  %v4554_v50 = vrot.slane %v4546_v36, %v6127_v60  ;;  %v4570_v43 = vrot.slane %v4562_v39, %v6127_v60  ;;  %v5784_v39 = vld [vmem:[%s7163_s10 + $0x18] sm:$0xff]  }
0x1057   :  { %v4629_v53 = vrot.slane %v4615_v23, %v6127_v60  ;;  %v4645_v62 = vrot.slane %v4631_v63, %v6127_v60  ;;  %v4622_v0 = vrot.slane %v4614_v26, %v6127_v60  ;;  %v4638_v45 = vrot.slane %v4630_v7, %v6127_v60 }
0x1058   :  { %v4580_v52 = vcombine.low %v4561_v56, %v4577_v44  ;;  %v4579_v54 = vcombine.high %v4554_v50, %v4570_v43  ;;  %v4578_v55 = vcombine.low %v4554_v50, %v4570_v43  ;;  %v4581_v12 = vcombine.high %v4561_v56, %v4577_v44  ;;  %v5304_v43 = vld [vmem:[%s7161_s8 + $0x1] ss:$0 sm:$0xff] }
0x1059   :  { %v4648_v57 = vcombine.low %v4629_v53, %v4645_v62  ;;  %v4646_v13 = vcombine.low %v4622_v0, %v4638_v45  ;;  %v4647_v38 = vcombine.high %v4622_v0, %v4638_v45  ;;  %v4649_v9 = vcombine.high %v4629_v53, %v4645_v62 }
0x105b   :  { %v5759_v20 = vpack.i.bf16 %v4648_v57, %v4580_v52  ;;  %v5754_v1 = vpack.i.bf16 %v4647_v38, %v4579_v54  ;;  %v5764_v14 = vpack.i.bf16 %v4649_v9, %v4581_v12  ;;  %v5785_v57 = vld [vmem:[%s7165_s12 + $0x20] sm:$0xff]   ;;  %v5787_v38 = vld [vmem:[%s7165_s12 + $0x30] sm:$0xff]   ;;  %v5788_v9 = vld [vmem:[%s7165_s12 + $0x38] sm:$0xff]  }
0x105d   :  { %5760 = vrot.lane.b32.xlu0 %v5759_v20, %s7208_s29  ;;  %5755 = vrot.lane.b32.xlu1 %v5754_v1, %s7209_s26  ;;  %v5311_v20 = vld [vmem:[%s7164_s11 + $0x1] ss:$0 sm:$0xff] }
0x1061   :  { %5765 = vrot.lane.b32.xlu1 %v5764_v14, %s7210_s28 }
0x10cf   :  { %v5761_v60 = vpop.permute.xlu0 %5760  ;;  %v5756_v16 = vpop.permute.xlu1 %5755 }
0x10d0   :  { %v5758_v17 = vunpack.i.h.bf16 %v5756_v16  ;;  %v5757_v4 = vunpack.i.l.bf16 %v5756_v16  ;;  %v5763_v6 = vunpack.i.h.bf16 %v5761_v60  ;;  %v5762_v28 = vunpack.i.l.bf16 %v5761_v60 }
0x10d2   :  { %v4675_v8 = vsel %vm1099_vm2, %v4646_v13, %v5758_v17  ;;  %v4674_v29 = vsel %vm1099_vm2, %v4578_v55, %v5757_v4  ;;  %v5786_v13 = vld [vmem:[%s7165_s12 + $0x28] sm:$0xff]  }
0x10d3   :  { %v5766_v10 = vpop.permute.xlu1 %5765  ;;  %v4676_v61 = vsel %vm2231_vm4, %v4674_v29, %v5762_v28  ;;  %v4677_v48 = vsel %vm2231_vm4, %v4675_v8, %v5763_v6 }
0x10d4   :  { %v5768_v18 = vunpack.i.h.bf16 %v5766_v10  ;;  %v5767_v35 = vunpack.i.l.bf16 %v5766_v10 }
0x10d6   :  { %v4678_v37 = vsel %vm2234_vm5, %v4676_v61, %v5767_v35  ;;  %v4679_v30 = vsel %vm2234_vm5, %v4677_v48, %v5768_v18 }
0x10d7   :  { %v4680_v22 = vpack.c.bf16 %v4679_v30, %v4678_v37 }
0x10d9   :  { %5681 = vmatmul.mubr.msk.bf16.vlgmr.msra.gmra.mrb[76].mxu0 %vm71_vm0, %v4680_v22 }
0x10da   :  { %5700 = vmatprep.mubr.msk.bf16.mxu0 %vm5920_vm1, %v5919_v15  ;;  %5693 = vmatpush3.bf16.msra.mxu0 %v5785_v57  ;;  %v5333_v57 = vld [vmem:[%s7168_s15 + $0x1] ss:$0 sm:$0xff] }
0x10db   :  { %5694 = vmatprep.subr.bf16.mxu0 %v5919_v15 }
0x10de   :  { %5695 = vmatpush3.bf16.msra.mxu0 %v5786_v13 }
0x10df   :  { %5696 = vmatprep.subr.bf16.mxu0 %v5919_v15 }
0x10e2   :  { %5697 = vmatpush3.bf16.msra.mxu0 %v5787_v38 }
0x10e3   :  { %5698 = vmatprep.subr.bf16.mxu0 %v5919_v15 }
0x10e6   :  { %5699 = vmatpush3.bf16.msra.mxu0 %v5788_v9 }
0x11ac   :  { %v4743_v32 = vpop.f32.mrb[76].mxu0 }
0x11ad   :  { %v4744_v24 = vadd.f32 %v5298_v31, %v4743_v32  ;;  %v5682_v33 = vpop.f32.mrb[77].mxu0 }
0x11ae   :  { %v4746_v34 = vpop.f32.mrb[78].mxu0 }
0x11af   :  { %v4747_v27 = vadd.f32 %v5298_v31, %v4746_v34  ;;  %v5683_v41 = vpop.f32.mrb[79].mxu0  ;;  %v4750_v25 = vadd.f32 %v4744_v24, %v6610_v58 }
0x11b1   :  { %v4756_v11 = vsel %vm71_vm0, %v4750_v25, 0.0  ;;  %v4751_v5 = vadd.f32 %v4747_v27, %v6612_v59  ;;  %v5783_v59 = vld [vmem:[%s7163_s10 + $0x10] sm:$0xff]  }
0x11b2   :  { %4757 = vadd.xlane.f32.xlu1 %v4756_v11  ;;  %5685 = vmatpush3.bf16.msra.mxu1 %v5783_v59 }
0x11b3   :  { %v4759_v21 = vsel %vm71_vm0, %v4751_v5, 0.0  ;;  %5686 = vmatprep.subr.bf16.mxu1 %v5919_v15 }
0x11b4   :  { %4760 = vadd.xlane.f32.xlu0 %v4759_v21 }
0x11b6   :  { %5687 = vmatpush3.bf16.msra.mxu1 %v5784_v39 }
0x11b7   :  { %5704 = vmatprep.subr.bf16.mxu1 %v5919_v15 }
0x123f   :  { %v4758_v40 = vpop.xlane.xlu1 %4757 }
0x1240   :  { %v4762_v19 = vmul.f32 0.03125, %v4758_v40 }
0x1241   :  { %v4761_v42 = vpop.xlane.xlu0 %4760 }
0x1242   :  { %v4764_v49 = vsub.f32 %v4750_v25, %v4762_v19  ;;  %v4763_v46 = vmul.f32 0.03125, %v4761_v42  ;;  %v5324_v25 = vld [vmem:[%s7166_s13 + $0x1] ss:$0 sm:$0xff] }
0x1244   :  { %v4765_v47 = vsub.f32 %v4751_v5, %v4763_v46  ;;  %v4766_v3 = vmul.f32 %v4764_v49, %v4764_v49 }
0x1246   :  { %v4768_v51 = vsel %vm71_vm0, %v4766_v3, 0.0  ;;  %v4767_v36 = vmul.f32 %v4765_v47, %v4765_v47 }
0x1247   :  { %4769 = vadd.xlane.f32.xlu0 %v4768_v51 }
0x1248   :  { %v4771_v58 = vsel %vm71_vm0, %v4767_v36, 0.0 }
0x1249   :  { %4772 = vadd.xlane.f32.xlu1 %v4771_v58 }
0x12d4   :  { %v4770_v23 = vpop.xlane.xlu0 %4769 }
0x12d5   :  { %v4774_v63 = vmul.f32 0.03125, %v4770_v23 }
0x12d6   :  { %v4773_v26 = vpop.xlane.xlu1 %4772 }
0x12d7   :  { %v4776_v7 = vadd.f32 1e-12, %v4774_v63  ;;  %v4775_v56 = vmul.f32 0.03125, %v4773_v26 }
0x12d9   :  { %5873 = vrsqrt.f32 %v4776_v7  ;;  %v4777_v44 = vadd.f32 1e-12, %v4775_v56 }
0x12db   :  { %5875 = vrsqrt.f32 %v4777_v44  ;;  %v5789_v44 = vld [vmem:[%s7169_s16] sm:$0xff]  }
0x12e3   :  { %v5874_v50 = vpop.eup %5873 }
0x12e4   :  { %v4780_v53 = vmul.f32 %v5874_v50, %v4764_v49  ;;  %v5790_v50 = vld [vmem:[%s7169_s16 + $0x8] sm:$0xff]  }
0x12e5   :  { %v5876_v62 = vpop.eup %5875 }
0x12e6   :  { %v4788_v0 = vmul.f32 %v5304_v43, %v4780_v53  ;;  %v4781_v45 = vmul.f32 %v5876_v62, %v4765_v47 }
0x12e8   :  { %v4789_v52 = vmul.f32 %v5304_v43, %v4781_v45  ;;  %v4796_v54 = vadd.f32 %v5305_v2, %v4788_v0 }
0x12ea   :  { %v4797_v55 = vadd.f32 %v5305_v2, %v4789_v52 }
0x12ec   :  { %v4798_v12 = vpack.c.bf16 %v4797_v55, %v4796_v54 }
0x12ee   :  { %5689 = vmatmul.mubr.msk.bf16.vlgmr.msra.gmra.mrb[72].mxu1 %vm71_vm0, %v4798_v12 }
0x12ef   :  { %5708 = vmatprep.mubr.msk.bf16.mxu1 %vm5920_vm1, %v5919_v15  ;;  %5705 = vmatpush3.bf16.msra.mxu1 %v5789_v44 }
0x12f0   :  { %5706 = vmatprep.subr.bf16.mxu1 %v5919_v15 }
0x12f3   :  { %5707 = vmatpush3.bf16.msra.mxu1 %v5790_v50 }
0x12f4   :  { %5712 = vmatprep.subr.bf16.mxu1 %v5919_v15 }
0x13c1   :  { %v4861_v1 = vpop.f32.mrb[72].mxu1 }
0x13c2   :  { %v4862_v14 = vadd.f32 %v5311_v20, %v4861_v1  ;;  %v5690_v60 = vpop.f32.mrb[73].mxu1 }
0x13c3   :  { %v4864_v16 = vpop.f32.mrb[74].mxu1 }
0x13c4   :  { %v4870_v17 = vmul.f32 0.044715, %v4862_v14  ;;  %v4865_v4 = vadd.f32 %v5311_v20, %v4864_v16  ;;  %v5691_v6 = vpop.f32.mrb[75].mxu1  ;;  %v4868_v32 = vmul.f32 0.5, %v4862_v14 }
0x13c6   :  { %v4872_v28 = vmul.f32 %v4870_v17, %v4862_v14  ;;  %v4871_v8 = vmul.f32 0.044715, %v4865_v4  ;;  %v4869_v24 = vmul.f32 0.5, %v4865_v4 }
0x13c8   :  { %v4874_v29 = vmul.f32 %v4872_v28, %v4862_v14  ;;  %v4873_v10 = vmul.f32 %v4871_v8, %v4865_v4  ;;  %v5791_v8 = vld [vmem:[%s7171_s18] sm:$0xff]  }
0x13ca   :  { %v4876_v18 = vadd.f32 %v4874_v29, %v4862_v14  ;;  %v4875_v35 = vmul.f32 %v4873_v10, %v4865_v4  ;;  %v5792_v29 = vld [vmem:[%s7171_s18 + $0x8] sm:$0xff]   ;;  %v5334_v10 = vld [vmem:[%s7170_s17] ss:$0 sm:$0xff]  ;;  %s5937_s18 = smov [#allocation2]  }
0x13cb   :  { %s5172_s1 = sshll.u32 %s5937_s18, 4  ;;  %s5173_s1 = int_to_ptr.vmem [resolvable:$true] %s5172_s1 }
0x13cc   :  { %v4878_v61 = vmul.f32 0.7978846, %v4876_v18  ;;  %v4877_v48 = vadd.f32 %v4875_v35, %v4865_v4  ;;  %s5895_s17 = scalar_lea.vmem %s5173_s1, 32  ;;  %p5900_p1 = scmp.lt.s32.totalorder %s5173_s1, %s5173_s1 }
0x13cd   :  { %p5896_p0 = scmp.ne.s32.totalorder %s5173_s1, %s5895_s17  ;;  %p5901_p2 = scmp.lt.s32.totalorder %s5895_s17, %s5895_s17 }
0x13ce   :  { %5877 = vtanh.f32 %v4878_v61  ;;  %v4879_v37 = vmul.f32 0.7978846, %v4877_v48 }
0x13cf   :  { %p5902_p3 = por %p5901_p2, %p5900_p1 }
0x13d0   :  { %5879 = vtanh.f32 %v4879_v37 }
0x13d1   :  { %p5903_p4 = pnand %p5902_p3, %p5896_p0 }
0x13d8   :  { %v5878_v30 = vpop.eup %5877 }
0x13d9   :  { %v4882_v22 = vadd.f32 1.0, %v5878_v30 }
0x13da   :  { %v5880_v31 = vpop.eup %5879 }
0x13db   :  { %v4883_v33 = vadd.f32 1.0, %v5880_v31  ;;  %v4884_v34 = vmul.f32 %v4882_v22, %v4868_v32  ;;  %v5338_v31 = vld [vmem:[%s7172_s19] ss:$0 sm:$0xff] }
0x13dd   :  { %v4885_v27 = vmul.f32 %v4883_v33, %v4869_v24 }
0x13df   :  { %v4886_v41 = vpack.c.bf16 %v4885_v27, %v4884_v34 }
0x13e1   :  { %5701 = vmatmul.mubr.msk.bf16.vlgmr.msra.gmra.mrb[80].mxu0 %vm2477_vm6, %v4886_v41 }
0x14b4   :  { %v4965_v11 = vpop.f32.mrb[80].mxu0 }
0x14b5   :  { %v4966_v5 = vadd.f32 %v5324_v25, %v4965_v11  ;;  %v5702_v21 = vpop.f32.mrb[81].mxu0 }
0x14b6   :  { %v4968_v40 = vpop.f32.mrb[82].mxu0 }
0x14b7   :  { %v4972_v19 = vadd.f32 %v4966_v5, %v4796_v54  ;;  %v4969_v42 = vadd.f32 %v5324_v25, %v4968_v40  ;;  %v5703_v49 = vpop.f32.mrb[83].mxu0  ;;  %v5332_v54 = vld [vmem:[%s7167_s14 + $0x1] ss:$0 sm:$0xff] }
0x14b9   :  { %v4973_v46 = vadd.f32 %v4969_v42, %v4797_v55  ;;  %v4978_v47 = vsel %vm71_vm0, %v4972_v19, 0.0 }
0x14ba   :  { %4979 = vadd.xlane.f32.xlu1 %v4978_v47 }
0x14bb   :  { %v4981_v3 = vsel %vm71_vm0, %v4973_v46, 0.0 }
0x14bc   :  { %4982 = vadd.xlane.f32.xlu0 %v4981_v3 }
0x1547   :  { %v4980_v51 = vpop.xlane.xlu1 %4979 }
0x1548   :  { %v4984_v36 = vmul.f32 0.03125, %v4980_v51 }
0x1549   :  { %v4983_v58 = vpop.xlane.xlu0 %4982 }
0x154a   :  { %v4986_v59 = vsub.f32 %v4972_v19, %v4984_v36  ;;  %v4985_v39 = vmul.f32 0.03125, %v4983_v58 }
0x154c   :  { %v4987_v23 = vsub.f32 %v4973_v46, %v4985_v39  ;;  %v4988_v63 = vmul.f32 %v4986_v59, %v4986_v59 }
0x154e   :  { %v4990_v26 = vsel %vm71_vm0, %v4988_v63, 0.0  ;;  %v4989_v7 = vmul.f32 %v4987_v23, %v4987_v23 }
0x154f   :  { %4991 = vadd.xlane.f32.xlu1 %v4990_v26 }
0x1550   :  { %v4993_v56 = vsel %vm71_vm0, %v4989_v7, 0.0 }
0x1551   :  { %4994 = vadd.xlane.f32.xlu0 %v4993_v56 }
0x15dc   :  { %v4992_v43 = vpop.xlane.xlu1 %4991 }
0x15dd   :  { %v4996_v53 = vmul.f32 0.03125, %v4992_v43 }
0x15de   :  { %v4995_v62 = vpop.xlane.xlu0 %4994 }
0x15df   :  { %v4998_v0 = vadd.f32 1e-12, %v4996_v53  ;;  %v4997_v45 = vmul.f32 0.03125, %v4995_v62 }
0x15e1   :  { %5881 = vrsqrt.f32 %v4998_v0  ;;  %v4999_v2 = vadd.f32 1e-12, %v4997_v45 }
0x15e3   :  { %5883 = vrsqrt.f32 %v4999_v2 }
0x15eb   :  { %v5882_v52 = vpop.eup %5881 }
0x15ec   :  { %v5002_v55 = vmul.f32 %v5882_v52, %v4986_v59 }
0x15ed   :  { %v5884_v12 = vpop.eup %5883 }
0x15ee   :  { %v5010_v13 = vmul.f32 %v5332_v54, %v5002_v55  ;;  %v5003_v38 = vmul.f32 %v5884_v12, %v4987_v23 }
0x15f0   :  { %v5018_v9 = vadd.f32 %v5333_v57, %v5010_v13  ;;  %v5011_v20 = vmul.f32 %v5332_v54, %v5003_v38 }
0x15f2   :  { %v5019_v1 = vadd.f32 %v5333_v57, %v5011_v20  ;;  %v5020_v14 = vpack.c.bf16 %v5018_v9, %v5018_v9 }
0x15f4   :  { %v5021_v60 = vpack.c.bf16 %v5019_v1, %v5019_v1  ;;  %v5035_v17 = vunpack.c.l.b16 %v5020_v14 }
0x15f6   :  { %v5036_v16 = vunpack.c.l.b16 %v5021_v60 }
0x15f8   :  { %v5037_v4 = vrot.slane %v5036_v16, 7 }
0x15fa   :  { %v5039_v6 = vsel %vm5038_vm7, %v5037_v4, %v5035_v17 }
0x15fb   :  { %v5040_v28 = vpack.c.b16 %v5039_v6, %v5039_v6 }
0x15fd   :  { %5709 = vmatmul.mubr.msk.bf16.vlgmr.msra.gmra.mrb[76].mxu1 %vm71_vm0, %v5040_v28 }
0x15fe   :  { %5716 = vmatprep.mubr.msk.bf16.mxu1 %vm5920_vm1, %v5919_v15  ;;  %5713 = vmatpush3.bf16.msra.mxu1 %v5791_v8 }
0x15ff   :  { %5714 = vmatprep.subr.bf16.mxu1 %v5919_v15 }
0x1602   :  { %5715 = vmatpush3.bf16.msra.mxu1 %v5792_v29 }
0x16d0   :  { %v5090_v18 = vpop.f32.mrb[76].mxu1 }
0x16d1   :  { %v5091_v35 = vadd.f32 %v5334_v10, %v5090_v18  ;;  %v5710_v61 = vpop.f32.mrb[77].mxu1 }
0x16d2   :  { %v5093_v48 = vpop.f32.mrb[78].mxu1 }
0x16d3   :  { %5885 = vtanh.f32 %v5091_v35  ;;  %v5711_v37 = vpop.f32.mrb[79].mxu1 }
0x16dd   :  { %v5886_v30 = vpop.eup %5885 }
0x16de   :  { %v5097_v22 = vpack.c.bf16 %v5886_v30, %v5886_v30 }
0x16e0   :  { %5717 = vmatmul.mubr.msk.bf16.vlgmr.msra.gmra.mrb[80].mxu1 %vm71_vm0, %v5097_v22 }
0x17b3   :  { %v5158_v15 = vpop.f32.mrb[80].mxu1 }
0x17b4   :  { %v5159_v32 = vadd.f32 %v5338_v31, %v5158_v15  ;;  %v5718_v24 = vpop.f32.mrb[81].mxu1 }
0x17b5   :  { %v5161_v33 = vpop.f32.mrb[82].mxu1 }
0x17b6   :  { %v5719_v34 = vpop.f32.mrb[83].mxu1  ;;  %5165 = vst.msk [vmem:[#allocation2] sm:$0x3] %vm5164_vm8, %v5159_v32 }
0x17b7   :  { %5906 = shalt.err (!%p5903_p4)
}
0x17b8   :  { %s5907_s19 = scalar_lea.hbm %s7173_s20, 32 }
0x17b9   :  { %p5908_p5 = scmp.ne.s32.totalorder %s7173_s20, %s5907_s19  ;;  %p5911_p6 = scmp.lt.u32.totalorder %s5907_s19, %s7173_s20 }
0x17bb   :  { %p5913_p7 = pnand %p5911_p6, %p5908_p5 }
0x17bd   :  { %5916 = shalt.err (!%p5913_p7)
}
0x17be   :  { %5175 = dma.vmem_to_hbm [thread:$0]  %s5173_s1, 32, %s7173_s20, [#allocation3]  }
0x17bf   :  { %5917 = dma.done.wait [#allocation3], 32  }
0x17c0   :  { %5918 = vsyncadd [#allocation3], 4294967264 }
0x17c1   :  { %5179 = vsyncpa [#allocation3], 1 }

</bundles_post_ra>
